<compile_context>
chip_gen: v6e
topology: v6e:2x2x1
jax: 0.10.0
libtpu: 0.0.40
codegen_flags: <defaults>
</compile_context>

<pallas_src>
import math

import jax
import jax.numpy as jnp
from jax import lax
from jax.experimental import pallas as pl
from jax.experimental.pallas import tpu as pltpu

F32 = jnp.float32
BF16 = jnp.bfloat16
VMEM_SPEC = pl.BlockSpec(memory_space=pltpu.MemorySpace.VMEM)

# layout of the per-encoder-layer [9, D] vector slab
_BQ, _BK, _BV, _BO, _G1, _BE1, _B2, _G2, _BE2 = range(9)


# ----------------------------- fused kernel ----------------------------------


def make_fused_kernel(num_gnn_layers, num_sa, hidden):
    d = hidden
    inv_sqrt_d = 1.0 / math.sqrt(d)

    def kernel(a_ref, pool_ref, h_ref, emb_w_ref, emb_b_ref,
               enc_w_ref, enc_w1_ref, enc_w2_ref, enc_vec_ref, enc_b1_ref,
               gcn_w_ref, gcn_b_ref, pred_w_ref, pred_b_ref, o_ref):
        # a_ref      [N, N]         bf16  (normalized block-diag adjacency)
        # pool_ref   [B, N]         bf16  (mean-readout pooling matrix)
        # h_ref      [N, in_dim]    bf16
        # enc_w_ref  [L*S, 4, D, D] bf16  (wq, wk, wv, wo)
        # enc_w1_ref [L*S, D, FF]   bf16
        # enc_w2_ref [L*S, FF, D]   bf16
        # enc_vec_ref[L*S, 9, D]    f32   (bq,bk,bv,bo,ln1_g,ln1_b,b2,ln2_g,ln2_b)
        # enc_b1_ref [L*S, FF]      f32
        # gcn_w_ref  [L, D, D]      bf16  (BN folded)
        # gcn_b_ref  [L, D]         f32   (BN folded)
        # o_ref      [B, n_classes] f32

        def layer_norm(x, g, b):
            mu = jnp.mean(x, axis=-1, keepdims=True)
            var = jnp.mean((x - mu) ** 2, axis=-1, keepdims=True)
            return (x - mu) * lax.rsqrt(var + 1e-5) * g + b

        def encoder_block(x, idx):
            # weights (bf16) via static slab indices -- no lane-offset slicing (d=32)
            wq = enc_w_ref[idx, 0]
            wk = enc_w_ref[idx, 1]
            wv = enc_w_ref[idx, 2]
            wo = enc_w_ref[idx, 3]
            w1 = enc_w1_ref[idx]
            w2 = enc_w2_ref[idx]
            vec = enc_vec_ref[idx]                       # [9, D] f32
            bq, bk, bv, bo = vec[_BQ:_BQ + 1], vec[_BK:_BK + 1], \
                vec[_BV:_BV + 1], vec[_BO:_BO + 1]
            g1, be1 = vec[_G1:_G1 + 1], vec[_BE1:_BE1 + 1]
            b2, g2, be2 = vec[_B2:_B2 + 1], vec[_G2:_G2 + 1], vec[_BE2:_BE2 + 1]
            b1 = enc_b1_ref[idx:idx + 1, :]              # [1, FF] f32

            xb = x.astype(BF16)
            q = jnp.dot(xb, wq, preferred_element_type=F32) + bq
            k = jnp.dot(xb, wk, preferred_element_type=F32) + bk
            v = jnp.dot(xb, wv, preferred_element_type=F32) + bv
            # scores = q @ k^T / sqrt(d)  (contract feature dims; MXU in bf16)
            s = lax.dot_general(
                q.astype(BF16), k.astype(BF16),
                (((1,), (1,)), ((), ())), preferred_element_type=F32
            ) * inv_sqrt_d
            s = s - jnp.max(s, axis=-1, keepdims=True)
            p_att = jnp.exp(s)                           # f32 softmax statistics
            p_att = p_att * pl.reciprocal(
                jnp.sum(p_att, axis=-1, keepdims=True), approx=True)
            attn = jnp.dot(p_att.astype(BF16), v.astype(BF16),
                           preferred_element_type=F32)
            attn = jnp.dot(attn.astype(BF16), wo, preferred_element_type=F32) + bo
            # residual + LayerNorm1 (post-norm), f32
            x = layer_norm(x + attn, g1, be1)
            # FFN: linear2(relu(linear1(x)))
            hmid = jnp.maximum(
                jnp.dot(x.astype(BF16), w1, preferred_element_type=F32) + b1, 0.0)
            ff = jnp.dot(hmid.astype(BF16), w2, preferred_element_type=F32) + b2
            # residual + LayerNorm2
            return layer_norm(x + ff, g2, be2)

        # embedding_h (in_feat_dropout is identity in eval mode)
        h = jnp.dot(h_ref[...], emb_w_ref[...],
                    preferred_element_type=F32) + emb_b_ref[...]

        for li in range(num_gnn_layers):
            # TransformerEncoder (num_sa post-norm layers) over all nodes of the batch
            x = h
            for si in range(num_sa):
                x = encoder_block(x, li * num_sa + si)
            # GCNLayer: GraphConv(norm='both') + BN(eval, folded) + ReLU + residual
            hw = jnp.dot(x.astype(BF16), gcn_w_ref[li], preferred_element_type=F32)
            agg = jnp.dot(a_ref[...], hw.astype(BF16),       # a_hat loaded at use
                          preferred_element_type=F32) + gcn_b_ref[li:li + 1, :]
            h = x + jnp.maximum(agg, 0.0)

        # mean readout (pooling matmul) fused with prediction Linear; dropout = identity
        hg = jnp.dot(pool_ref[...], h.astype(BF16), preferred_element_type=F32)
        o_ref[...] = (
            jnp.dot(hg.astype(BF16), pred_w_ref[...], preferred_element_type=F32)
            + pred_b_ref[...]
        )

    return kernel


# ----------------------------- wrapper ----------------------------------------


def graph_transformer_forward(params, a_hat, pool, h, e):
    num_layers = params["num_gnn_layers"]
    num_sa = len(params["ugformer"][0])
    hidden = params["emb_h_w"].shape[1]
    in_dim = params["emb_h_w"].shape[0]
    ff_hidden = params["ugformer"][0][0]["w1"].shape[1]
    n_total = a_hat.shape[0]
    batch = pool.shape[0]
    n_classes = params["pred_w"].shape[1]

    # ---- trace-time weight prep: pack into stacked slabs, bf16 matmul operands ----
    flat_enc = [p for layer in params["ugformer"] for p in layer]
    enc_w = jnp.stack(
        [jnp.stack([p["wq"], p["wk"], p["wv"], p["wo"]], axis=0) for p in flat_enc],
        axis=0).astype(BF16)                                        # [L*S, 4, D, D]
    enc_w1 = jnp.stack([p["w1"] for p in flat_enc], axis=0).astype(BF16)  # [L*S, D, FF]
    enc_w2 = jnp.stack([p["w2"] for p in flat_enc], axis=0).astype(BF16)  # [L*S, FF, D]
    enc_vec = jnp.stack(
        [jnp.concatenate([p["bq"], p["bk"], p["bv"], p["bo"],
                          p["ln1_g"], p["ln1_b"],
                          p["b2"], p["ln2_g"], p["ln2_b"]], axis=0)
         for p in flat_enc], axis=0).astype(F32)                    # [L*S, 9, D]
    enc_b1 = jnp.concatenate([p["b1"] for p in flat_enc], axis=0).astype(F32)  # [L*S, FF]

    # BatchNorm(eval) folded into GCN weight/bias
    gcn_w_list, gcn_b_list = [], []
    for li in range(num_layers):
        g = params["gcn"][li]
        scale = g["bn_g"] * lax.rsqrt(g["bn_v"] + 1e-5)       # [1, hidden]
        gcn_w_list.append(g["w"] * scale)                     # per-output-channel
        gcn_b_list.append((g["b"] - g["bn_m"]) * scale + g["bn_b"])
    gcn_w = jnp.stack(gcn_w_list, axis=0).astype(BF16)        # [L, D, D]
    gcn_b = jnp.concatenate(gcn_b_list, axis=0).astype(F32)   # [L, D]

    args = [
        a_hat.astype(BF16), pool.astype(BF16), h.astype(BF16),
        params["emb_h_w"].astype(BF16), params["emb_h_b"].astype(F32),
        enc_w, enc_w1, enc_w2, enc_vec, enc_b1,
        gcn_w, gcn_b,
        params["pred_w"].astype(BF16), params["pred_b"].astype(F32),
    ]

    # ---- advisory cost estimate ----
    enc_flops = (3 * 2 * n_total * hidden * hidden           # Q, K, V
                 + 2 * 2 * n_total * n_total * hidden        # scores + p@v
                 + 2 * n_total * hidden * hidden             # out proj
                 + 2 * 2 * n_total * hidden * ff_hidden)     # FFN
    gcn_flops = 2 * n_total * hidden * hidden + 2 * n_total * n_total * hidden
    flops = (2 * n_total * in_dim * hidden
             + num_layers * num_sa * enc_flops
             + num_layers * gcn_flops
             + 2 * batch * n_total * hidden
             + 2 * batch * hidden * n_classes)
    transcendentals = num_layers * num_sa * (n_total * n_total + 5 * n_total)
    arg_bytes = sum(int(a.size) * a.dtype.itemsize for a in args)
    bytes_accessed = arg_bytes + batch * n_classes * 4
    cost = pl.CostEstimate(flops=int(flops),
                           transcendentals=int(transcendentals),
                           bytes_accessed=int(bytes_accessed))

    # ---- explicit scoped-VMEM limit sized from actual buffers (+ headroom) ----
    act_bytes = (3 * n_total * n_total * 4
                 + 4 * n_total * max(4 * hidden, ff_hidden) * 4)
    vmem_limit = int(min(100 * 1024 * 1024,
                         max(16 * 1024 * 1024, 4 * (arg_bytes + act_bytes))))

    kernel = make_fused_kernel(num_layers, num_sa, hidden)
    scores = pl.pallas_call(
        kernel,
        out_shape=jax.ShapeDtypeStruct((batch, n_classes), F32),
        in_specs=[VMEM_SPEC] * len(args),
        out_specs=VMEM_SPEC,
        compiler_params=pltpu.CompilerParams(vmem_limit_bytes=vmem_limit),
        cost_estimate=cost,
    )(*args)
    # edge_feat=False -> edge features pass through unchanged
    return scores, e


# ----------------------------- param init ------------------------------------


def _dense_init(key, fan_in, fan_out):
    kw, kb = jax.random.split(key)
    bound = 1.0 / math.sqrt(fan_in)
    w = jax.random.uniform(kw, (fan_in, fan_out), F32, -bound, bound)
    b = jax.random.uniform(kb, (1, fan_out), F32, -bound, bound)
    return w, b


def init_params(key, in_dim, hidden, ff_hidden, n_classes, num_gnn_layers, num_sa):
    keys = iter(jax.random.split(key, 256))
    params = {"num_gnn_layers": num_gnn_layers}
    params["emb_h_w"], params["emb_h_b"] = _dense_init(next(keys), in_dim, hidden)

    params["ugformer"] = []
    params["gcn"] = []
    for _ in range(num_gnn_layers):
        enc_layers = []
        for _ in range(num_sa):
            p = {}
            p["wq"], p["bq"] = _dense_init(next(keys), hidden, hidden)
            p["wk"], p["bk"] = _dense_init(next(keys), hidden, hidden)
            p["wv"], p["bv"] = _dense_init(next(keys), hidden, hidden)
            p["wo"], p["bo"] = _dense_init(next(keys), hidden, hidden)
            p["ln1_g"] = jnp.ones((1, hidden), F32)
            p["ln1_b"] = jnp.zeros((1, hidden), F32)
            p["w1"], p["b1"] = _dense_init(next(keys), hidden, ff_hidden)
            p["w2"], p["b2"] = _dense_init(next(keys), ff_hidden, hidden)
            p["ln2_g"] = jnp.ones((1, hidden), F32)
            p["ln2_b"] = jnp.zeros((1, hidden), F32)
            enc_layers.append(p)
        params["ugformer"].append(enc_layers)

        g = {}
        g["w"], g["b"] = _dense_init(next(keys), hidden, hidden)
        g["bn_g"] = jnp.ones((1, hidden), F32)
        g["bn_b"] = jnp.zeros((1, hidden), F32)
        g["bn_m"] = jnp.zeros((1, hidden), F32)   # running mean (eval)
        g["bn_v"] = jnp.ones((1, hidden), F32)    # running var  (eval)
        params["gcn"].append(g)

    params["pred_w"], params["pred_b"] = _dense_init(next(keys), hidden, n_classes)
    return params


def build_batched_graph(batch, nodes_per_graph):
    """Block-diagonal ring graph with self loops; returns (A_hat, pool)."""
    n_total = batch * nodes_per_graph
    a = jnp.zeros((n_total, n_total), F32)
    for b in range(batch):
        off = b * nodes_per_graph
        for i in range(nodes_per_graph):
            j = (i + 1) % nodes_per_graph
            a = a.at[off + i, off + j].set(1.0)
            a = a.at[off + j, off + i].set(1.0)
            a = a.at[off + i, off + i].set(1.0)
    deg = jnp.sum(a, axis=1)
    d_inv_sqrt = 1.0 / jnp.sqrt(deg)
    a_hat = a * d_inv_sqrt[:, None] * d_inv_sqrt[None, :]   # D^-1/2 A D^-1/2
    pool = jnp.zeros((batch, n_total), F32)
    for b in range(batch):
        pool = pool.at[b, b * nodes_per_graph:(b + 1) * nodes_per_graph].set(
            1.0 / nodes_per_graph
        )
    return a_hat, pool


# ----------------------------- main -------------------------------------------

if __name__ == "__main__":
    # net_params: in_dim=8, edge_dim=4, hidden_dim=32, n_classes=6,
    #             readout='mean', batch_norm=True, residual=True, edge_feat=False
    B, N, IN_DIM, EDGE_DIM, HIDDEN, FF, N_CLASSES = 2, 8, 8, 4, 32, 256, 6
    NUM_GNN_LAYERS, NUM_SELF_ATT = 2, 3
    N_TOTAL = B * N

    key = jax.random.PRNGKey(0)
    k_param, k_h, k_e = jax.random.split(key, 3)

    params = init_params(
        k_param, IN_DIM, HIDDEN, FF, N_CLASSES, NUM_GNN_LAYERS, NUM_SELF_ATT
    )
    a_hat, pool = build_batched_graph(B, N)

    h = jax.random.normal(k_h, (N_TOTAL, IN_DIM), F32)
    num_edges = 3 * N_TOTAL
    e = jax.random.normal(k_e, (num_edges, EDGE_DIM), F32)   # edge_feat=False -> unused

    scores, e_out = graph_transformer_forward(params, a_hat, pool, h, e)
    scores = jax.block_until_ready(scores)
    assert scores.shape == (B, N_CLASSES)
    assert bool(jnp.all(jnp.isfinite(scores)))
    print("KERNEL_OK")
</pallas_src>

<mosaic_0001>
module attributes {stable_mosaic.version = 11 : i64} {
  func.func @kernel(%arg0: memref<16x16xbf16, #tpu.memory_space<vmem>>, %arg1: memref<2x16xbf16, #tpu.memory_space<vmem>>, %arg2: memref<16x8xbf16, #tpu.memory_space<vmem>>, %arg3: memref<8x32xbf16, #tpu.memory_space<vmem>>, %arg4: memref<1x32xf32, #tpu.memory_space<vmem>>, %arg5: memref<6x4x32x32xbf16, #tpu.memory_space<vmem>>, %arg6: memref<6x32x256xbf16, #tpu.memory_space<vmem>>, %arg7: memref<6x256x32xbf16, #tpu.memory_space<vmem>>, %arg8: memref<6x9x32xf32, #tpu.memory_space<vmem>>, %arg9: memref<6x256xf32, #tpu.memory_space<vmem>>, %arg10: memref<2x32x32xbf16, #tpu.memory_space<vmem>>, %arg11: memref<2x32xf32, #tpu.memory_space<vmem>>, %arg12: memref<32x6xbf16, #tpu.memory_space<vmem>>, %arg13: memref<1x6xf32, #tpu.memory_space<vmem>>, %arg14: memref<2x6xf32, #tpu.memory_space<vmem>>) attributes {dimension_semantics = [], scalar_prefetch = 0 : i64, scratch_operands = 0 : i64, tpu.core_type = #tpu.core_type<tc>} {
    %c0 = arith.constant 0 : index
    %c0_0 = arith.constant 0 : index
    %0 = vector.load %arg2[%c0, %c0_0] : memref<16x8xbf16, #tpu.memory_space<vmem>>, vector<16x8xbf16>
    %c0_1 = arith.constant 0 : index
    %c0_2 = arith.constant 0 : index
    %1 = vector.load %arg3[%c0_1, %c0_2] : memref<8x32xbf16, #tpu.memory_space<vmem>>, vector<8x32xbf16>
    %cst = arith.constant dense<0.000000e+00> : vector<16x32xf32>
    %2 = tpu.matmul %0, %1, %cst {dimension_numbers = #tpu.dot_dimension_numbers<[1], [0], [0], [1], [0, 0, 1, 1], [], []>} : vector<16x8xbf16>, vector<8x32xbf16>, vector<16x32xf32> -> vector<16x32xf32>
    %c0_3 = arith.constant 0 : index
    %c0_4 = arith.constant 0 : index
    %3 = vector.load %arg4[%c0_3, %c0_4] : memref<1x32xf32, #tpu.memory_space<vmem>>, vector<1x32xf32>
    %4 = vector.broadcast %3 : vector<1x32xf32> to vector<16x32xf32>
    %5 = arith.addf %2, %4 : vector<16x32xf32>
    %c0_5 = arith.constant 0 : index
    %c0_6 = arith.constant 0 : index
    %c0_7 = arith.constant 0 : index
    %c0_8 = arith.constant 0 : index
    %6 = vector.load %arg5[%c0_5, %c0_6, %c0_7, %c0_8] : memref<6x4x32x32xbf16, #tpu.memory_space<vmem>>, vector<1x1x32x32xbf16>
    %7 = vector.shape_cast %6 : vector<1x1x32x32xbf16> to vector<32x32xbf16>
    %c0_9 = arith.constant 0 : index
    %c1 = arith.constant 1 : index
    %c0_10 = arith.constant 0 : index
    %c0_11 = arith.constant 0 : index
    %8 = vector.load %arg5[%c0_9, %c1, %c0_10, %c0_11] : memref<6x4x32x32xbf16, #tpu.memory_space<vmem>>, vector<1x1x32x32xbf16>
    %9 = vector.shape_cast %8 : vector<1x1x32x32xbf16> to vector<32x32xbf16>
    %c0_12 = arith.constant 0 : index
    %c2 = arith.constant 2 : index
    %c0_13 = arith.constant 0 : index
    %c0_14 = arith.constant 0 : index
    %10 = vector.load %arg5[%c0_12, %c2, %c0_13, %c0_14] : memref<6x4x32x32xbf16, #tpu.memory_space<vmem>>, vector<1x1x32x32xbf16>
    %11 = vector.shape_cast %10 : vector<1x1x32x32xbf16> to vector<32x32xbf16>
    %c0_15 = arith.constant 0 : index
    %c3 = arith.constant 3 : index
    %c0_16 = arith.constant 0 : index
    %c0_17 = arith.constant 0 : index
    %12 = vector.load %arg5[%c0_15, %c3, %c0_16, %c0_17] : memref<6x4x32x32xbf16, #tpu.memory_space<vmem>>, vector<1x1x32x32xbf16>
    %13 = vector.shape_cast %12 : vector<1x1x32x32xbf16> to vector<32x32xbf16>
    %c0_18 = arith.constant 0 : index
    %c0_19 = arith.constant 0 : index
    %c0_20 = arith.constant 0 : index
    %14 = vector.load %arg6[%c0_18, %c0_19, %c0_20] : memref<6x32x256xbf16, #tpu.memory_space<vmem>>, vector<1x32x256xbf16>
    %15 = vector.shape_cast %14 : vector<1x32x256xbf16> to vector<32x256xbf16>
    %c0_21 = arith.constant 0 : index
    %c0_22 = arith.constant 0 : index
    %c0_23 = arith.constant 0 : index
    %16 = vector.load %arg7[%c0_21, %c0_22, %c0_23] : memref<6x256x32xbf16, #tpu.memory_space<vmem>>, vector<1x256x32xbf16>
    %17 = vector.shape_cast %16 : vector<1x256x32xbf16> to vector<256x32xbf16>
    %c0_24 = arith.constant 0 : index
    %c0_25 = arith.constant 0 : index
    %c0_26 = arith.constant 0 : index
    %18 = vector.load %arg8[%c0_24, %c0_25, %c0_26] : memref<6x9x32xf32, #tpu.memory_space<vmem>>, vector<1x9x32xf32>
    %19 = vector.shape_cast %18 : vector<1x9x32xf32> to vector<9x32xf32>
    %20 = vector.extract_strided_slice %19 {offsets = [0, 0], sizes = [1, 32], strides = [1, 1]} : vector<9x32xf32> to vector<1x32xf32>
    %21 = vector.extract_strided_slice %19 {offsets = [1, 0], sizes = [1, 32], strides = [1, 1]} : vector<9x32xf32> to vector<1x32xf32>
    %22 = vector.extract_strided_slice %19 {offsets = [2, 0], sizes = [1, 32], strides = [1, 1]} : vector<9x32xf32> to vector<1x32xf32>
    %23 = vector.extract_strided_slice %19 {offsets = [3, 0], sizes = [1, 32], strides = [1, 1]} : vector<9x32xf32> to vector<1x32xf32>
    %24 = vector.extract_strided_slice %19 {offsets = [4, 0], sizes = [1, 32], strides = [1, 1]} : vector<9x32xf32> to vector<1x32xf32>
    %25 = vector.extract_strided_slice %19 {offsets = [5, 0], sizes = [1, 32], strides = [1, 1]} : vector<9x32xf32> to vector<1x32xf32>
    %26 = vector.extract_strided_slice %19 {offsets = [6, 0], sizes = [1, 32], strides = [1, 1]} : vector<9x32xf32> to vector<1x32xf32>
    %27 = vector.extract_strided_slice %19 {offsets = [7, 0], sizes = [1, 32], strides = [1, 1]} : vector<9x32xf32> to vector<1x32xf32>
    %28 = vector.extract_strided_slice %19 {offsets = [8, 0], sizes = [1, 32], strides = [1, 1]} : vector<9x32xf32> to vector<1x32xf32>
    %c0_27 = arith.constant 0 : index
    %c0_28 = arith.constant 0 : index
    %29 = vector.load %arg9[%c0_27, %c0_28] : memref<6x256xf32, #tpu.memory_space<vmem>>, vector<1x256xf32>
    %30 = arith.truncf %5 : vector<16x32xf32> to vector<16x32xbf16>
    %cst_29 = arith.constant dense<0.000000e+00> : vector<16x32xf32>
    %31 = tpu.matmul %30, %7, %cst_29 {dimension_numbers = #tpu.dot_dimension_numbers<[1], [0], [0], [1], [0, 0, 1, 1], [], []>} : vector<16x32xbf16>, vector<32x32xbf16>, vector<16x32xf32> -> vector<16x32xf32>
    %32 = vector.broadcast %20 : vector<1x32xf32> to vector<16x32xf32>
    %33 = arith.addf %31, %32 : vector<16x32xf32>
    %cst_30 = arith.constant dense<0.000000e+00> : vector<16x32xf32>
    %34 = tpu.matmul %30, %9, %cst_30 {dimension_numbers = #tpu.dot_dimension_numbers<[1], [0], [0], [1], [0, 0, 1, 1], [], []>} : vector<16x32xbf16>, vector<32x32xbf16>, vector<16x32xf32> -> vector<16x32xf32>
    %35 = vector.broadcast %21 : vector<1x32xf32> to vector<16x32xf32>
    %36 = arith.addf %34, %35 : vector<16x32xf32>
    %cst_31 = arith.constant dense<0.000000e+00> : vector<16x32xf32>
    %37 = tpu.matmul %30, %11, %cst_31 {dimension_numbers = #tpu.dot_dimension_numbers<[1], [0], [0], [1], [0, 0, 1, 1], [], []>} : vector<16x32xbf16>, vector<32x32xbf16>, vector<16x32xf32> -> vector<16x32xf32>
    %38 = vector.broadcast %22 : vector<1x32xf32> to vector<16x32xf32>
    %39 = arith.addf %37, %38 : vector<16x32xf32>
    %40 = arith.truncf %33 : vector<16x32xf32> to vector<16x32xbf16>
    %41 = arith.truncf %36 : vector<16x32xf32> to vector<16x32xbf16>
    %cst_32 = arith.constant dense<0.000000e+00> : vector<16x16xf32>
    %42 = tpu.matmul %40, %41, %cst_32 {dimension_numbers = #tpu.dot_dimension_numbers<[1], [1], [0], [0], [0, 0, 1, 0], [], []>} : vector<16x32xbf16>, vector<16x32xbf16>, vector<16x16xf32> -> vector<16x16xf32>
    %cst_33 = arith.constant 0.176776692 : f32
    %43 = vector.broadcast %cst_33 : f32 to vector<16x16xf32>
    %44 = arith.mulf %42, %43 : vector<16x16xf32>
    %cst_34 = arith.constant dense<0xFF800000> : vector<16xf32>
    %45 = vector.multi_reduction <maximumf>, %44, %cst_34 [1] : vector<16x16xf32> to vector<16xf32>
    %46 = vector.shape_cast %45 : vector<16xf32> to vector<16x1xf32>
    %47 = vector.broadcast %46 : vector<16x1xf32> to vector<16x16xf32>
    %48 = arith.subf %44, %47 : vector<16x16xf32>
    %49 = math.exp %48 : vector<16x16xf32>
    %cst_35 = arith.constant dense<0.000000e+00> : vector<16xf32>
    %50 = vector.multi_reduction <add>, %49, %cst_35 [1] : vector<16x16xf32> to vector<16xf32>
    %51 = vector.shape_cast %50 : vector<16xf32> to vector<16x1xf32>
    %52 = tpu.reciprocal %51 {approx = true} : vector<16x1xf32> -> vector<16x1xf32>
    %53 = vector.broadcast %52 : vector<16x1xf32> to vector<16x16xf32>
    %54 = arith.mulf %49, %53 : vector<16x16xf32>
    %55 = arith.truncf %54 : vector<16x16xf32> to vector<16x16xbf16>
    %56 = arith.truncf %39 : vector<16x32xf32> to vector<16x32xbf16>
    %cst_36 = arith.constant dense<0.000000e+00> : vector<16x32xf32>
    %57 = tpu.matmul %55, %56, %cst_36 {dimension_numbers = #tpu.dot_dimension_numbers<[1], [0], [0], [1], [0, 0, 1, 1], [], []>} : vector<16x16xbf16>, vector<16x32xbf16>, vector<16x32xf32> -> vector<16x32xf32>
    %58 = arith.truncf %57 : vector<16x32xf32> to vector<16x32xbf16>
    %cst_37 = arith.constant dense<0.000000e+00> : vector<16x32xf32>
    %59 = tpu.matmul %58, %13, %cst_37 {dimension_numbers = #tpu.dot_dimension_numbers<[1], [0], [0], [1], [0, 0, 1, 1], [], []>} : vector<16x32xbf16>, vector<32x32xbf16>, vector<16x32xf32> -> vector<16x32xf32>
    %60 = vector.broadcast %23 : vector<1x32xf32> to vector<16x32xf32>
    %61 = arith.addf %59, %60 : vector<16x32xf32>
    %62 = arith.addf %5, %61 : vector<16x32xf32>
    %cst_38 = arith.constant dense<0.000000e+00> : vector<16xf32>
    %63 = vector.multi_reduction <add>, %62, %cst_38 [1] : vector<16x32xf32> to vector<16xf32>
    %64 = vector.shape_cast %63 : vector<16xf32> to vector<16x1xf32>
    %cst_39 = arith.constant 3.200000e+01 : f32
    %65 = vector.broadcast %cst_39 : f32 to vector<16x1xf32>
    %66 = arith.divf %64, %65 : vector<16x1xf32>
    %67 = vector.broadcast %66 : vector<16x1xf32> to vector<16x32xf32>
    %68 = arith.subf %62, %67 : vector<16x32xf32>
    %69 = arith.mulf %68, %68 : vector<16x32xf32>
    %cst_40 = arith.constant dense<0.000000e+00> : vector<16xf32>
    %70 = vector.multi_reduction <add>, %69, %cst_40 [1] : vector<16x32xf32> to vector<16xf32>
    %71 = vector.shape_cast %70 : vector<16xf32> to vector<16x1xf32>
    %cst_41 = arith.constant 3.200000e+01 : f32
    %72 = vector.broadcast %cst_41 : f32 to vector<16x1xf32>
    %73 = arith.divf %71, %72 : vector<16x1xf32>
    %74 = vector.broadcast %66 : vector<16x1xf32> to vector<16x32xf32>
    %75 = arith.subf %62, %74 : vector<16x32xf32>
    %cst_42 = arith.constant 9.99999974E-6 : f32
    %76 = vector.broadcast %cst_42 : f32 to vector<16x1xf32>
    %77 = arith.addf %73, %76 : vector<16x1xf32>
    %78 = math.rsqrt %77 : vector<16x1xf32>
    %79 = vector.broadcast %78 : vector<16x1xf32> to vector<16x32xf32>
    %80 = arith.mulf %75, %79 : vector<16x32xf32>
    %81 = vector.broadcast %24 : vector<1x32xf32> to vector<16x32xf32>
    %82 = arith.mulf %80, %81 : vector<16x32xf32>
    %83 = vector.broadcast %25 : vector<1x32xf32> to vector<16x32xf32>
    %84 = arith.addf %82, %83 : vector<16x32xf32>
    %85 = arith.truncf %84 : vector<16x32xf32> to vector<16x32xbf16>
    %cst_43 = arith.constant dense<0.000000e+00> : vector<16x256xf32>
    %86 = tpu.matmul %85, %15, %cst_43 {dimension_numbers = #tpu.dot_dimension_numbers<[1], [0], [0], [1], [0, 0, 1, 1], [], []>} : vector<16x32xbf16>, vector<32x256xbf16>, vector<16x256xf32> -> vector<16x256xf32>
    %87 = vector.broadcast %29 : vector<1x256xf32> to vector<16x256xf32>
    %88 = arith.addf %86, %87 : vector<16x256xf32>
    %cst_44 = arith.constant 0.000000e+00 : f32
    %89 = vector.broadcast %cst_44 : f32 to vector<16x256xf32>
    %90 = arith.maximumf %88, %89 : vector<16x256xf32>
    %91 = arith.truncf %90 : vector<16x256xf32> to vector<16x256xbf16>
    %cst_45 = arith.constant dense<0.000000e+00> : vector<16x32xf32>
    %92 = tpu.matmul %91, %17, %cst_45 {dimension_numbers = #tpu.dot_dimension_numbers<[1], [0], [0], [1], [0, 0, 1, 1], [], []>} : vector<16x256xbf16>, vector<256x32xbf16>, vector<16x32xf32> -> vector<16x32xf32>
    %93 = vector.broadcast %26 : vector<1x32xf32> to vector<16x32xf32>
    %94 = arith.addf %92, %93 : vector<16x32xf32>
    %95 = arith.addf %84, %94 : vector<16x32xf32>
    %cst_46 = arith.constant dense<0.000000e+00> : vector<16xf32>
    %96 = vector.multi_reduction <add>, %95, %cst_46 [1] : vector<16x32xf32> to vector<16xf32>
    %97 = vector.shape_cast %96 : vector<16xf32> to vector<16x1xf32>
    %cst_47 = arith.constant 3.200000e+01 : f32
    %98 = vector.broadcast %cst_47 : f32 to vector<16x1xf32>
    %99 = arith.divf %97, %98 : vector<16x1xf32>
    %100 = vector.broadcast %99 : vector<16x1xf32> to vector<16x32xf32>
    %101 = arith.subf %95, %100 : vector<16x32xf32>
    %102 = arith.mulf %101, %101 : vector<16x32xf32>
    %cst_48 = arith.constant dense<0.000000e+00> : vector<16xf32>
    %103 = vector.multi_reduction <add>, %102, %cst_48 [1] : vector<16x32xf32> to vector<16xf32>
    %104 = vector.shape_cast %103 : vector<16xf32> to vector<16x1xf32>
    %cst_49 = arith.constant 3.200000e+01 : f32
    %105 = vector.broadcast %cst_49 : f32 to vector<16x1xf32>
    %106 = arith.divf %104, %105 : vector<16x1xf32>
    %107 = vector.broadcast %99 : vector<16x1xf32> to vector<16x32xf32>
    %108 = arith.subf %95, %107 : vector<16x32xf32>
    %cst_50 = arith.constant 9.99999974E-6 : f32
    %109 = vector.broadcast %cst_50 : f32 to vector<16x1xf32>
    %110 = arith.addf %106, %109 : vector<16x1xf32>
    %111 = math.rsqrt %110 : vector<16x1xf32>
    %112 = vector.broadcast %111 : vector<16x1xf32> to vector<16x32xf32>
    %113 = arith.mulf %108, %112 : vector<16x32xf32>
    %114 = vector.broadcast %27 : vector<1x32xf32> to vector<16x32xf32>
    %115 = arith.mulf %113, %114 : vector<16x32xf32>
    %116 = vector.broadcast %28 : vector<1x32xf32> to vector<16x32xf32>
    %117 = arith.addf %115, %116 : vector<16x32xf32>
    %c1_51 = arith.constant 1 : index
    %c0_52 = arith.constant 0 : index
    %c0_53 = arith.constant 0 : index
    %c0_54 = arith.constant 0 : index
    %118 = vector.load %arg5[%c1_51, %c0_52, %c0_53, %c0_54] : memref<6x4x32x32xbf16, #tpu.memory_space<vmem>>, vector<1x1x32x32xbf16>
    %119 = vector.shape_cast %118 : vector<1x1x32x32xbf16> to vector<32x32xbf16>
    %c1_55 = arith.constant 1 : index
    %c1_56 = arith.constant 1 : index
    %c0_57 = arith.constant 0 : index
    %c0_58 = arith.constant 0 : index
    %120 = vector.load %arg5[%c1_55, %c1_56, %c0_57, %c0_58] : memref<6x4x32x32xbf16, #tpu.memory_space<vmem>>, vector<1x1x32x32xbf16>
    %121 = vector.shape_cast %120 : vector<1x1x32x32xbf16> to vector<32x32xbf16>
    %c1_59 = arith.constant 1 : index
    %c2_60 = arith.constant 2 : index
    %c0_61 = arith.constant 0 : index
    %c0_62 = arith.constant 0 : index
    %122 = vector.load %arg5[%c1_59, %c2_60, %c0_61, %c0_62] : memref<6x4x32x32xbf16, #tpu.memory_space<vmem>>, vector<1x1x32x32xbf16>
    %123 = vector.shape_cast %122 : vector<1x1x32x32xbf16> to vector<32x32xbf16>
    %c1_63 = arith.constant 1 : index
    %c3_64 = arith.constant 3 : index
    %c0_65 = arith.constant 0 : index
    %c0_66 = arith.constant 0 : index
    %124 = vector.load %arg5[%c1_63, %c3_64, %c0_65, %c0_66] : memref<6x4x32x32xbf16, #tpu.memory_space<vmem>>, vector<1x1x32x32xbf16>
    %125 = vector.shape_cast %124 : vector<1x1x32x32xbf16> to vector<32x32xbf16>
    %c1_67 = arith.constant 1 : index
    %c0_68 = arith.constant 0 : index
    %c0_69 = arith.constant 0 : index
    %126 = vector.load %arg6[%c1_67, %c0_68, %c0_69] : memref<6x32x256xbf16, #tpu.memory_space<vmem>>, vector<1x32x256xbf16>
    %127 = vector.shape_cast %126 : vector<1x32x256xbf16> to vector<32x256xbf16>
    %c1_70 = arith.constant 1 : index
    %c0_71 = arith.constant 0 : index
    %c0_72 = arith.constant 0 : index
    %128 = vector.load %arg7[%c1_70, %c0_71, %c0_72] : memref<6x256x32xbf16, #tpu.memory_space<vmem>>, vector<1x256x32xbf16>
    %129 = vector.shape_cast %128 : vector<1x256x32xbf16> to vector<256x32xbf16>
    %c1_73 = arith.constant 1 : index
    %c0_74 = arith.constant 0 : index
    %c0_75 = arith.constant 0 : index
    %130 = vector.load %arg8[%c1_73, %c0_74, %c0_75] : memref<6x9x32xf32, #tpu.memory_space<vmem>>, vector<1x9x32xf32>
    %131 = vector.shape_cast %130 : vector<1x9x32xf32> to vector<9x32xf32>
    %132 = vector.extract_strided_slice %131 {offsets = [0, 0], sizes = [1, 32], strides = [1, 1]} : vector<9x32xf32> to vector<1x32xf32>
    %133 = vector.extract_strided_slice %131 {offsets = [1, 0], sizes = [1, 32], strides = [1, 1]} : vector<9x32xf32> to vector<1x32xf32>
    %134 = vector.extract_strided_slice %131 {offsets = [2, 0], sizes = [1, 32], strides = [1, 1]} : vector<9x32xf32> to vector<1x32xf32>
    %135 = vector.extract_strided_slice %131 {offsets = [3, 0], sizes = [1, 32], strides = [1, 1]} : vector<9x32xf32> to vector<1x32xf32>
    %136 = vector.extract_strided_slice %131 {offsets = [4, 0], sizes = [1, 32], strides = [1, 1]} : vector<9x32xf32> to vector<1x32xf32>
    %137 = vector.extract_strided_slice %131 {offsets = [5, 0], sizes = [1, 32], strides = [1, 1]} : vector<9x32xf32> to vector<1x32xf32>
    %138 = vector.extract_strided_slice %131 {offsets = [6, 0], sizes = [1, 32], strides = [1, 1]} : vector<9x32xf32> to vector<1x32xf32>
    %139 = vector.extract_strided_slice %131 {offsets = [7, 0], sizes = [1, 32], strides = [1, 1]} : vector<9x32xf32> to vector<1x32xf32>
    %140 = vector.extract_strided_slice %131 {offsets = [8, 0], sizes = [1, 32], strides = [1, 1]} : vector<9x32xf32> to vector<1x32xf32>
    %c1_76 = arith.constant 1 : index
    %c0_77 = arith.constant 0 : index
    %141 = vector.load %arg9[%c1_76, %c0_77] : memref<6x256xf32, #tpu.memory_space<vmem>>, vector<1x256xf32>
    %142 = arith.truncf %117 : vector<16x32xf32> to vector<16x32xbf16>
    %cst_78 = arith.constant dense<0.000000e+00> : vector<16x32xf32>
    %143 = tpu.matmul %142, %119, %cst_78 {dimension_numbers = #tpu.dot_dimension_numbers<[1], [0], [0], [1], [0, 0, 1, 1], [], []>} : vector<16x32xbf16>, vector<32x32xbf16>, vector<16x32xf32> -> vector<16x32xf32>
    %144 = vector.broadcast %132 : vector<1x32xf32> to vector<16x32xf32>
    %145 = arith.addf %143, %144 : vector<16x32xf32>
    %cst_79 = arith.constant dense<0.000000e+00> : vector<16x32xf32>
    %146 = tpu.matmul %142, %121, %cst_79 {dimension_numbers = #tpu.dot_dimension_numbers<[1], [0], [0], [1], [0, 0, 1, 1], [], []>} : vector<16x32xbf16>, vector<32x32xbf16>, vector<16x32xf32> -> vector<16x32xf32>
    %147 = vector.broadcast %133 : vector<1x32xf32> to vector<16x32xf32>
    %148 = arith.addf %146, %147 : vector<16x32xf32>
    %cst_80 = arith.constant dense<0.000000e+00> : vector<16x32xf32>
    %149 = tpu.matmul %142, %123, %cst_80 {dimension_numbers = #tpu.dot_dimension_numbers<[1], [0], [0], [1], [0, 0, 1, 1], [], []>} : vector<16x32xbf16>, vector<32x32xbf16>, vector<16x32xf32> -> vector<16x32xf32>
    %150 = vector.broadcast %134 : vector<1x32xf32> to vector<16x32xf32>
    %151 = arith.addf %149, %150 : vector<16x32xf32>
    %152 = arith.truncf %145 : vector<16x32xf32> to vector<16x32xbf16>
    %153 = arith.truncf %148 : vector<16x32xf32> to vector<16x32xbf16>
    %cst_81 = arith.constant dense<0.000000e+00> : vector<16x16xf32>
    %154 = tpu.matmul %152, %153, %cst_81 {dimension_numbers = #tpu.dot_dimension_numbers<[1], [1], [0], [0], [0, 0, 1, 0], [], []>} : vector<16x32xbf16>, vector<16x32xbf16>, vector<16x16xf32> -> vector<16x16xf32>
    %cst_82 = arith.constant 0.176776692 : f32
    %155 = vector.broadcast %cst_82 : f32 to vector<16x16xf32>
    %156 = arith.mulf %154, %155 : vector<16x16xf32>
    %cst_83 = arith.constant dense<0xFF800000> : vector<16xf32>
    %157 = vector.multi_reduction <maximumf>, %156, %cst_83 [1] : vector<16x16xf32> to vector<16xf32>
    %158 = vector.shape_cast %157 : vector<16xf32> to vector<16x1xf32>
    %159 = vector.broadcast %158 : vector<16x1xf32> to vector<16x16xf32>
    %160 = arith.subf %156, %159 : vector<16x16xf32>
    %161 = math.exp %160 : vector<16x16xf32>
    %cst_84 = arith.constant dense<0.000000e+00> : vector<16xf32>
    %162 = vector.multi_reduction <add>, %161, %cst_84 [1] : vector<16x16xf32> to vector<16xf32>
    %163 = vector.shape_cast %162 : vector<16xf32> to vector<16x1xf32>
    %164 = tpu.reciprocal %163 {approx = true} : vector<16x1xf32> -> vector<16x1xf32>
    %165 = vector.broadcast %164 : vector<16x1xf32> to vector<16x16xf32>
    %166 = arith.mulf %161, %165 : vector<16x16xf32>
    %167 = arith.truncf %166 : vector<16x16xf32> to vector<16x16xbf16>
    %168 = arith.truncf %151 : vector<16x32xf32> to vector<16x32xbf16>
    %cst_85 = arith.constant dense<0.000000e+00> : vector<16x32xf32>
    %169 = tpu.matmul %167, %168, %cst_85 {dimension_numbers = #tpu.dot_dimension_numbers<[1], [0], [0], [1], [0, 0, 1, 1], [], []>} : vector<16x16xbf16>, vector<16x32xbf16>, vector<16x32xf32> -> vector<16x32xf32>
    %170 = arith.truncf %169 : vector<16x32xf32> to vector<16x32xbf16>
    %cst_86 = arith.constant dense<0.000000e+00> : vector<16x32xf32>
    %171 = tpu.matmul %170, %125, %cst_86 {dimension_numbers = #tpu.dot_dimension_numbers<[1], [0], [0], [1], [0, 0, 1, 1], [], []>} : vector<16x32xbf16>, vector<32x32xbf16>, vector<16x32xf32> -> vector<16x32xf32>
    %172 = vector.broadcast %135 : vector<1x32xf32> to vector<16x32xf32>
    %173 = arith.addf %171, %172 : vector<16x32xf32>
    %174 = arith.addf %117, %173 : vector<16x32xf32>
    %cst_87 = arith.constant dense<0.000000e+00> : vector<16xf32>
    %175 = vector.multi_reduction <add>, %174, %cst_87 [1] : vector<16x32xf32> to vector<16xf32>
    %176 = vector.shape_cast %175 : vector<16xf32> to vector<16x1xf32>
    %cst_88 = arith.constant 3.200000e+01 : f32
    %177 = vector.broadcast %cst_88 : f32 to vector<16x1xf32>
    %178 = arith.divf %176, %177 : vector<16x1xf32>
    %179 = vector.broadcast %178 : vector<16x1xf32> to vector<16x32xf32>
    %180 = arith.subf %174, %179 : vector<16x32xf32>
    %181 = arith.mulf %180, %180 : vector<16x32xf32>
    %cst_89 = arith.constant dense<0.000000e+00> : vector<16xf32>
    %182 = vector.multi_reduction <add>, %181, %cst_89 [1] : vector<16x32xf32> to vector<16xf32>
    %183 = vector.shape_cast %182 : vector<16xf32> to vector<16x1xf32>
    %cst_90 = arith.constant 3.200000e+01 : f32
    %184 = vector.broadcast %cst_90 : f32 to vector<16x1xf32>
    %185 = arith.divf %183, %184 : vector<16x1xf32>
    %186 = vector.broadcast %178 : vector<16x1xf32> to vector<16x32xf32>
    %187 = arith.subf %174, %186 : vector<16x32xf32>
    %cst_91 = arith.constant 9.99999974E-6 : f32
    %188 = vector.broadcast %cst_91 : f32 to vector<16x1xf32>
    %189 = arith.addf %185, %188 : vector<16x1xf32>
    %190 = math.rsqrt %189 : vector<16x1xf32>
    %191 = vector.broadcast %190 : vector<16x1xf32> to vector<16x32xf32>
    %192 = arith.mulf %187, %191 : vector<16x32xf32>
    %193 = vector.broadcast %136 : vector<1x32xf32> to vector<16x32xf32>
    %194 = arith.mulf %192, %193 : vector<16x32xf32>
    %195 = vector.broadcast %137 : vector<1x32xf32> to vector<16x32xf32>
    %196 = arith.addf %194, %195 : vector<16x32xf32>
    %197 = arith.truncf %196 : vector<16x32xf32> to vector<16x32xbf16>
    %cst_92 = arith.constant dense<0.000000e+00> : vector<16x256xf32>
    %198 = tpu.matmul %197, %127, %cst_92 {dimension_numbers = #tpu.dot_dimension_numbers<[1], [0], [0], [1], [0, 0, 1, 1], [], []>} : vector<16x32xbf16>, vector<32x256xbf16>, vector<16x256xf32> -> vector<16x256xf32>
    %199 = vector.broadcast %141 : vector<1x256xf32> to vector<16x256xf32>
    %200 = arith.addf %198, %199 : vector<16x256xf32>
    %cst_93 = arith.constant 0.000000e+00 : f32
    %201 = vector.broadcast %cst_93 : f32 to vector<16x256xf32>
    %202 = arith.maximumf %200, %201 : vector<16x256xf32>
    %203 = arith.truncf %202 : vector<16x256xf32> to vector<16x256xbf16>
    %cst_94 = arith.constant dense<0.000000e+00> : vector<16x32xf32>
    %204 = tpu.matmul %203, %129, %cst_94 {dimension_numbers = #tpu.dot_dimension_numbers<[1], [0], [0], [1], [0, 0, 1, 1], [], []>} : vector<16x256xbf16>, vector<256x32xbf16>, vector<16x32xf32> -> vector<16x32xf32>
    %205 = vector.broadcast %138 : vector<1x32xf32> to vector<16x32xf32>
    %206 = arith.addf %204, %205 : vector<16x32xf32>
    %207 = arith.addf %196, %206 : vector<16x32xf32>
    %cst_95 = arith.constant dense<0.000000e+00> : vector<16xf32>
    %208 = vector.multi_reduction <add>, %207, %cst_95 [1] : vector<16x32xf32> to vector<16xf32>
    %209 = vector.shape_cast %208 : vector<16xf32> to vector<16x1xf32>
    %cst_96 = arith.constant 3.200000e+01 : f32
    %210 = vector.broadcast %cst_96 : f32 to vector<16x1xf32>
    %211 = arith.divf %209, %210 : vector<16x1xf32>
    %212 = vector.broadcast %211 : vector<16x1xf32> to vector<16x32xf32>
    %213 = arith.subf %207, %212 : vector<16x32xf32>
    %214 = arith.mulf %213, %213 : vector<16x32xf32>
    %cst_97 = arith.constant dense<0.000000e+00> : vector<16xf32>
    %215 = vector.multi_reduction <add>, %214, %cst_97 [1] : vector<16x32xf32> to vector<16xf32>
    %216 = vector.shape_cast %215 : vector<16xf32> to vector<16x1xf32>
    %cst_98 = arith.constant 3.200000e+01 : f32
    %217 = vector.broadcast %cst_98 : f32 to vector<16x1xf32>
    %218 = arith.divf %216, %217 : vector<16x1xf32>
    %219 = vector.broadcast %211 : vector<16x1xf32> to vector<16x32xf32>
    %220 = arith.subf %207, %219 : vector<16x32xf32>
    %cst_99 = arith.constant 9.99999974E-6 : f32
    %221 = vector.broadcast %cst_99 : f32 to vector<16x1xf32>
    %222 = arith.addf %218, %221 : vector<16x1xf32>
    %223 = math.rsqrt %222 : vector<16x1xf32>
    %224 = vector.broadcast %223 : vector<16x1xf32> to vector<16x32xf32>
    %225 = arith.mulf %220, %224 : vector<16x32xf32>
    %226 = vector.broadcast %139 : vector<1x32xf32> to vector<16x32xf32>
    %227 = arith.mulf %225, %226 : vector<16x32xf32>
    %228 = vector.broadcast %140 : vector<1x32xf32> to vector<16x32xf32>
    %229 = arith.addf %227, %228 : vector<16x32xf32>
    %c2_100 = arith.constant 2 : index
    %c0_101 = arith.constant 0 : index
    %c0_102 = arith.constant 0 : index
    %c0_103 = arith.constant 0 : index
    %230 = vector.load %arg5[%c2_100, %c0_101, %c0_102, %c0_103] : memref<6x4x32x32xbf16, #tpu.memory_space<vmem>>, vector<1x1x32x32xbf16>
    %231 = vector.shape_cast %230 : vector<1x1x32x32xbf16> to vector<32x32xbf16>
    %c2_104 = arith.constant 2 : index
    %c1_105 = arith.constant 1 : index
    %c0_106 = arith.constant 0 : index
    %c0_107 = arith.constant 0 : index
    %232 = vector.load %arg5[%c2_104, %c1_105, %c0_106, %c0_107] : memref<6x4x32x32xbf16, #tpu.memory_space<vmem>>, vector<1x1x32x32xbf16>
    %233 = vector.shape_cast %232 : vector<1x1x32x32xbf16> to vector<32x32xbf16>
    %c2_108 = arith.constant 2 : index
    %c2_109 = arith.constant 2 : index
    %c0_110 = arith.constant 0 : index
    %c0_111 = arith.constant 0 : index
    %234 = vector.load %arg5[%c2_108, %c2_109, %c0_110, %c0_111] : memref<6x4x32x32xbf16, #tpu.memory_space<vmem>>, vector<1x1x32x32xbf16>
    %235 = vector.shape_cast %234 : vector<1x1x32x32xbf16> to vector<32x32xbf16>
    %c2_112 = arith.constant 2 : index
    %c3_113 = arith.constant 3 : index
    %c0_114 = arith.constant 0 : index
    %c0_115 = arith.constant 0 : index
    %236 = vector.load %arg5[%c2_112, %c3_113, %c0_114, %c0_115] : memref<6x4x32x32xbf16, #tpu.memory_space<vmem>>, vector<1x1x32x32xbf16>
    %237 = vector.shape_cast %236 : vector<1x1x32x32xbf16> to vector<32x32xbf16>
    %c2_116 = arith.constant 2 : index
    %c0_117 = arith.constant 0 : index
    %c0_118 = arith.constant 0 : index
    %238 = vector.load %arg6[%c2_116, %c0_117, %c0_118] : memref<6x32x256xbf16, #tpu.memory_space<vmem>>, vector<1x32x256xbf16>
    %239 = vector.shape_cast %238 : vector<1x32x256xbf16> to vector<32x256xbf16>
    %c2_119 = arith.constant 2 : index
    %c0_120 = arith.constant 0 : index
    %c0_121 = arith.constant 0 : index
    %240 = vector.load %arg7[%c2_119, %c0_120, %c0_121] : memref<6x256x32xbf16, #tpu.memory_space<vmem>>, vector<1x256x32xbf16>
    %241 = vector.shape_cast %240 : vector<1x256x32xbf16> to vector<256x32xbf16>
    %c2_122 = arith.constant 2 : index
    %c0_123 = arith.constant 0 : index
    %c0_124 = arith.constant 0 : index
    %242 = vector.load %arg8[%c2_122, %c0_123, %c0_124] : memref<6x9x32xf32, #tpu.memory_space<vmem>>, vector<1x9x32xf32>
    %243 = vector.shape_cast %242 : vector<1x9x32xf32> to vector<9x32xf32>
    %244 = vector.extract_strided_slice %243 {offsets = [0, 0], sizes = [1, 32], strides = [1, 1]} : vector<9x32xf32> to vector<1x32xf32>
    %245 = vector.extract_strided_slice %243 {offsets = [1, 0], sizes = [1, 32], strides = [1, 1]} : vector<9x32xf32> to vector<1x32xf32>
    %246 = vector.extract_strided_slice %243 {offsets = [2, 0], sizes = [1, 32], strides = [1, 1]} : vector<9x32xf32> to vector<1x32xf32>
    %247 = vector.extract_strided_slice %243 {offsets = [3, 0], sizes = [1, 32], strides = [1, 1]} : vector<9x32xf32> to vector<1x32xf32>
    %248 = vector.extract_strided_slice %243 {offsets = [4, 0], sizes = [1, 32], strides = [1, 1]} : vector<9x32xf32> to vector<1x32xf32>
    %249 = vector.extract_strided_slice %243 {offsets = [5, 0], sizes = [1, 32], strides = [1, 1]} : vector<9x32xf32> to vector<1x32xf32>
    %250 = vector.extract_strided_slice %243 {offsets = [6, 0], sizes = [1, 32], strides = [1, 1]} : vector<9x32xf32> to vector<1x32xf32>
    %251 = vector.extract_strided_slice %243 {offsets = [7, 0], sizes = [1, 32], strides = [1, 1]} : vector<9x32xf32> to vector<1x32xf32>
    %252 = vector.extract_strided_slice %243 {offsets = [8, 0], sizes = [1, 32], strides = [1, 1]} : vector<9x32xf32> to vector<1x32xf32>
    %c2_125 = arith.constant 2 : index
    %c0_126 = arith.constant 0 : index
    %253 = vector.load %arg9[%c2_125, %c0_126] : memref<6x256xf32, #tpu.memory_space<vmem>>, vector<1x256xf32>
    %254 = arith.truncf %229 : vector<16x32xf32> to vector<16x32xbf16>
    %cst_127 = arith.constant dense<0.000000e+00> : vector<16x32xf32>
    %255 = tpu.matmul %254, %231, %cst_127 {dimension_numbers = #tpu.dot_dimension_numbers<[1], [0], [0], [1], [0, 0, 1, 1], [], []>} : vector<16x32xbf16>, vector<32x32xbf16>, vector<16x32xf32> -> vector<16x32xf32>
    %256 = vector.broadcast %244 : vector<1x32xf32> to vector<16x32xf32>
    %257 = arith.addf %255, %256 : vector<16x32xf32>
    %cst_128 = arith.constant dense<0.000000e+00> : vector<16x32xf32>
    %258 = tpu.matmul %254, %233, %cst_128 {dimension_numbers = #tpu.dot_dimension_numbers<[1], [0], [0], [1], [0, 0, 1, 1], [], []>} : vector<16x32xbf16>, vector<32x32xbf16>, vector<16x32xf32> -> vector<16x32xf32>
    %259 = vector.broadcast %245 : vector<1x32xf32> to vector<16x32xf32>
    %260 = arith.addf %258, %259 : vector<16x32xf32>
    %cst_129 = arith.constant dense<0.000000e+00> : vector<16x32xf32>
    %261 = tpu.matmul %254, %235, %cst_129 {dimension_numbers = #tpu.dot_dimension_numbers<[1], [0], [0], [1], [0, 0, 1, 1], [], []>} : vector<16x32xbf16>, vector<32x32xbf16>, vector<16x32xf32> -> vector<16x32xf32>
    %262 = vector.broadcast %246 : vector<1x32xf32> to vector<16x32xf32>
    %263 = arith.addf %261, %262 : vector<16x32xf32>
    %264 = arith.truncf %257 : vector<16x32xf32> to vector<16x32xbf16>
    %265 = arith.truncf %260 : vector<16x32xf32> to vector<16x32xbf16>
    %cst_130 = arith.constant dense<0.000000e+00> : vector<16x16xf32>
    %266 = tpu.matmul %264, %265, %cst_130 {dimension_numbers = #tpu.dot_dimension_numbers<[1], [1], [0], [0], [0, 0, 1, 0], [], []>} : vector<16x32xbf16>, vector<16x32xbf16>, vector<16x16xf32> -> vector<16x16xf32>
    %cst_131 = arith.constant 0.176776692 : f32
    %267 = vector.broadcast %cst_131 : f32 to vector<16x16xf32>
    %268 = arith.mulf %266, %267 : vector<16x16xf32>
    %cst_132 = arith.constant dense<0xFF800000> : vector<16xf32>
    %269 = vector.multi_reduction <maximumf>, %268, %cst_132 [1] : vector<16x16xf32> to vector<16xf32>
    %270 = vector.shape_cast %269 : vector<16xf32> to vector<16x1xf32>
    %271 = vector.broadcast %270 : vector<16x1xf32> to vector<16x16xf32>
    %272 = arith.subf %268, %271 : vector<16x16xf32>
    %273 = math.exp %272 : vector<16x16xf32>
    %cst_133 = arith.constant dense<0.000000e+00> : vector<16xf32>
    %274 = vector.multi_reduction <add>, %273, %cst_133 [1] : vector<16x16xf32> to vector<16xf32>
    %275 = vector.shape_cast %274 : vector<16xf32> to vector<16x1xf32>
    %276 = tpu.reciprocal %275 {approx = true} : vector<16x1xf32> -> vector<16x1xf32>
    %277 = vector.broadcast %276 : vector<16x1xf32> to vector<16x16xf32>
    %278 = arith.mulf %273, %277 : vector<16x16xf32>
    %279 = arith.truncf %278 : vector<16x16xf32> to vector<16x16xbf16>
    %280 = arith.truncf %263 : vector<16x32xf32> to vector<16x32xbf16>
    %cst_134 = arith.constant dense<0.000000e+00> : vector<16x32xf32>
    %281 = tpu.matmul %279, %280, %cst_134 {dimension_numbers = #tpu.dot_dimension_numbers<[1], [0], [0], [1], [0, 0, 1, 1], [], []>} : vector<16x16xbf16>, vector<16x32xbf16>, vector<16x32xf32> -> vector<16x32xf32>
    %282 = arith.truncf %281 : vector<16x32xf32> to vector<16x32xbf16>
    %cst_135 = arith.constant dense<0.000000e+00> : vector<16x32xf32>
    %283 = tpu.matmul %282, %237, %cst_135 {dimension_numbers = #tpu.dot_dimension_numbers<[1], [0], [0], [1], [0, 0, 1, 1], [], []>} : vector<16x32xbf16>, vector<32x32xbf16>, vector<16x32xf32> -> vector<16x32xf32>
    %284 = vector.broadcast %247 : vector<1x32xf32> to vector<16x32xf32>
    %285 = arith.addf %283, %284 : vector<16x32xf32>
    %286 = arith.addf %229, %285 : vector<16x32xf32>
    %cst_136 = arith.constant dense<0.000000e+00> : vector<16xf32>
    %287 = vector.multi_reduction <add>, %286, %cst_136 [1] : vector<16x32xf32> to vector<16xf32>
    %288 = vector.shape_cast %287 : vector<16xf32> to vector<16x1xf32>
    %cst_137 = arith.constant 3.200000e+01 : f32
    %289 = vector.broadcast %cst_137 : f32 to vector<16x1xf32>
    %290 = arith.divf %288, %289 : vector<16x1xf32>
    %291 = vector.broadcast %290 : vector<16x1xf32> to vector<16x32xf32>
    %292 = arith.subf %286, %291 : vector<16x32xf32>
    %293 = arith.mulf %292, %292 : vector<16x32xf32>
    %cst_138 = arith.constant dense<0.000000e+00> : vector<16xf32>
    %294 = vector.multi_reduction <add>, %293, %cst_138 [1] : vector<16x32xf32> to vector<16xf32>
    %295 = vector.shape_cast %294 : vector<16xf32> to vector<16x1xf32>
    %cst_139 = arith.constant 3.200000e+01 : f32
    %296 = vector.broadcast %cst_139 : f32 to vector<16x1xf32>
    %297 = arith.divf %295, %296 : vector<16x1xf32>
    %298 = vector.broadcast %290 : vector<16x1xf32> to vector<16x32xf32>
    %299 = arith.subf %286, %298 : vector<16x32xf32>
    %cst_140 = arith.constant 9.99999974E-6 : f32
    %300 = vector.broadcast %cst_140 : f32 to vector<16x1xf32>
    %301 = arith.addf %297, %300 : vector<16x1xf32>
    %302 = math.rsqrt %301 : vector<16x1xf32>
    %303 = vector.broadcast %302 : vector<16x1xf32> to vector<16x32xf32>
    %304 = arith.mulf %299, %303 : vector<16x32xf32>
    %305 = vector.broadcast %248 : vector<1x32xf32> to vector<16x32xf32>
    %306 = arith.mulf %304, %305 : vector<16x32xf32>
    %307 = vector.broadcast %249 : vector<1x32xf32> to vector<16x32xf32>
    %308 = arith.addf %306, %307 : vector<16x32xf32>
    %309 = arith.truncf %308 : vector<16x32xf32> to vector<16x32xbf16>
    %cst_141 = arith.constant dense<0.000000e+00> : vector<16x256xf32>
    %310 = tpu.matmul %309, %239, %cst_141 {dimension_numbers = #tpu.dot_dimension_numbers<[1], [0], [0], [1], [0, 0, 1, 1], [], []>} : vector<16x32xbf16>, vector<32x256xbf16>, vector<16x256xf32> -> vector<16x256xf32>
    %311 = vector.broadcast %253 : vector<1x256xf32> to vector<16x256xf32>
    %312 = arith.addf %310, %311 : vector<16x256xf32>
    %cst_142 = arith.constant 0.000000e+00 : f32
    %313 = vector.broadcast %cst_142 : f32 to vector<16x256xf32>
    %314 = arith.maximumf %312, %313 : vector<16x256xf32>
    %315 = arith.truncf %314 : vector<16x256xf32> to vector<16x256xbf16>
    %cst_143 = arith.constant dense<0.000000e+00> : vector<16x32xf32>
    %316 = tpu.matmul %315, %241, %cst_143 {dimension_numbers = #tpu.dot_dimension_numbers<[1], [0], [0], [1], [0, 0, 1, 1], [], []>} : vector<16x256xbf16>, vector<256x32xbf16>, vector<16x32xf32> -> vector<16x32xf32>
    %317 = vector.broadcast %250 : vector<1x32xf32> to vector<16x32xf32>
    %318 = arith.addf %316, %317 : vector<16x32xf32>
    %319 = arith.addf %308, %318 : vector<16x32xf32>
    %cst_144 = arith.constant dense<0.000000e+00> : vector<16xf32>
    %320 = vector.multi_reduction <add>, %319, %cst_144 [1] : vector<16x32xf32> to vector<16xf32>
    %321 = vector.shape_cast %320 : vector<16xf32> to vector<16x1xf32>
    %cst_145 = arith.constant 3.200000e+01 : f32
    %322 = vector.broadcast %cst_145 : f32 to vector<16x1xf32>
    %323 = arith.divf %321, %322 : vector<16x1xf32>
    %324 = vector.broadcast %323 : vector<16x1xf32> to vector<16x32xf32>
    %325 = arith.subf %319, %324 : vector<16x32xf32>
    %326 = arith.mulf %325, %325 : vector<16x32xf32>
    %cst_146 = arith.constant dense<0.000000e+00> : vector<16xf32>
    %327 = vector.multi_reduction <add>, %326, %cst_146 [1] : vector<16x32xf32> to vector<16xf32>
    %328 = vector.shape_cast %327 : vector<16xf32> to vector<16x1xf32>
    %cst_147 = arith.constant 3.200000e+01 : f32
    %329 = vector.broadcast %cst_147 : f32 to vector<16x1xf32>
    %330 = arith.divf %328, %329 : vector<16x1xf32>
    %331 = vector.broadcast %323 : vector<16x1xf32> to vector<16x32xf32>
    %332 = arith.subf %319, %331 : vector<16x32xf32>
    %cst_148 = arith.constant 9.99999974E-6 : f32
    %333 = vector.broadcast %cst_148 : f32 to vector<16x1xf32>
    %334 = arith.addf %330, %333 : vector<16x1xf32>
    %335 = math.rsqrt %334 : vector<16x1xf32>
    %336 = vector.broadcast %335 : vector<16x1xf32> to vector<16x32xf32>
    %337 = arith.mulf %332, %336 : vector<16x32xf32>
    %338 = vector.broadcast %251 : vector<1x32xf32> to vector<16x32xf32>
    %339 = arith.mulf %337, %338 : vector<16x32xf32>
    %340 = vector.broadcast %252 : vector<1x32xf32> to vector<16x32xf32>
    %341 = arith.addf %339, %340 : vector<16x32xf32>
    %342 = arith.truncf %341 : vector<16x32xf32> to vector<16x32xbf16>
    %c0_149 = arith.constant 0 : index
    %c0_150 = arith.constant 0 : index
    %c0_151 = arith.constant 0 : index
    %343 = vector.load %arg10[%c0_149, %c0_150, %c0_151] : memref<2x32x32xbf16, #tpu.memory_space<vmem>>, vector<1x32x32xbf16>
    %344 = vector.shape_cast %343 : vector<1x32x32xbf16> to vector<32x32xbf16>
    %cst_152 = arith.constant dense<0.000000e+00> : vector<16x32xf32>
    %345 = tpu.matmul %342, %344, %cst_152 {dimension_numbers = #tpu.dot_dimension_numbers<[1], [0], [0], [1], [0, 0, 1, 1], [], []>} : vector<16x32xbf16>, vector<32x32xbf16>, vector<16x32xf32> -> vector<16x32xf32>
    %c0_153 = arith.constant 0 : index
    %c0_154 = arith.constant 0 : index
    %346 = vector.load %arg0[%c0_153, %c0_154] : memref<16x16xbf16, #tpu.memory_space<vmem>>, vector<16x16xbf16>
    %347 = arith.truncf %345 : vector<16x32xf32> to vector<16x32xbf16>
    %cst_155 = arith.constant dense<0.000000e+00> : vector<16x32xf32>
    %348 = tpu.matmul %346, %347, %cst_155 {dimension_numbers = #tpu.dot_dimension_numbers<[1], [0], [0], [1], [0, 0, 1, 1], [], []>} : vector<16x16xbf16>, vector<16x32xbf16>, vector<16x32xf32> -> vector<16x32xf32>
    %c0_156 = arith.constant 0 : index
    %c0_157 = arith.constant 0 : index
    %349 = vector.load %arg11[%c0_156, %c0_157] : memref<2x32xf32, #tpu.memory_space<vmem>>, vector<1x32xf32>
    %350 = vector.broadcast %349 : vector<1x32xf32> to vector<16x32xf32>
    %351 = arith.addf %348, %350 : vector<16x32xf32>
    %cst_158 = arith.constant 0.000000e+00 : f32
    %352 = vector.broadcast %cst_158 : f32 to vector<16x32xf32>
    %353 = arith.maximumf %351, %352 : vector<16x32xf32>
    %354 = arith.addf %341, %353 : vector<16x32xf32>
    %c3_159 = arith.constant 3 : index
    %c0_160 = arith.constant 0 : index
    %c0_161 = arith.constant 0 : index
    %c0_162 = arith.constant 0 : index
    %355 = vector.load %arg5[%c3_159, %c0_160, %c0_161, %c0_162] : memref<6x4x32x32xbf16, #tpu.memory_space<vmem>>, vector<1x1x32x32xbf16>
    %356 = vector.shape_cast %355 : vector<1x1x32x32xbf16> to vector<32x32xbf16>
    %c3_163 = arith.constant 3 : index
    %c1_164 = arith.constant 1 : index
    %c0_165 = arith.constant 0 : index
    %c0_166 = arith.constant 0 : index
    %357 = vector.load %arg5[%c3_163, %c1_164, %c0_165, %c0_166] : memref<6x4x32x32xbf16, #tpu.memory_space<vmem>>, vector<1x1x32x32xbf16>
    %358 = vector.shape_cast %357 : vector<1x1x32x32xbf16> to vector<32x32xbf16>
    %c3_167 = arith.constant 3 : index
    %c2_168 = arith.constant 2 : index
    %c0_169 = arith.constant 0 : index
    %c0_170 = arith.constant 0 : index
    %359 = vector.load %arg5[%c3_167, %c2_168, %c0_169, %c0_170] : memref<6x4x32x32xbf16, #tpu.memory_space<vmem>>, vector<1x1x32x32xbf16>
    %360 = vector.shape_cast %359 : vector<1x1x32x32xbf16> to vector<32x32xbf16>
    %c3_171 = arith.constant 3 : index
    %c3_172 = arith.constant 3 : index
    %c0_173 = arith.constant 0 : index
    %c0_174 = arith.constant 0 : index
    %361 = vector.load %arg5[%c3_171, %c3_172, %c0_173, %c0_174] : memref<6x4x32x32xbf16, #tpu.memory_space<vmem>>, vector<1x1x32x32xbf16>
    %362 = vector.shape_cast %361 : vector<1x1x32x32xbf16> to vector<32x32xbf16>
    %c3_175 = arith.constant 3 : index
    %c0_176 = arith.constant 0 : index
    %c0_177 = arith.constant 0 : index
    %363 = vector.load %arg6[%c3_175, %c0_176, %c0_177] : memref<6x32x256xbf16, #tpu.memory_space<vmem>>, vector<1x32x256xbf16>
    %364 = vector.shape_cast %363 : vector<1x32x256xbf16> to vector<32x256xbf16>
    %c3_178 = arith.constant 3 : index
    %c0_179 = arith.constant 0 : index
    %c0_180 = arith.constant 0 : index
    %365 = vector.load %arg7[%c3_178, %c0_179, %c0_180] : memref<6x256x32xbf16, #tpu.memory_space<vmem>>, vector<1x256x32xbf16>
    %366 = vector.shape_cast %365 : vector<1x256x32xbf16> to vector<256x32xbf16>
    %c3_181 = arith.constant 3 : index
    %c0_182 = arith.constant 0 : index
    %c0_183 = arith.constant 0 : index
    %367 = vector.load %arg8[%c3_181, %c0_182, %c0_183] : memref<6x9x32xf32, #tpu.memory_space<vmem>>, vector<1x9x32xf32>
    %368 = vector.shape_cast %367 : vector<1x9x32xf32> to vector<9x32xf32>
    %369 = vector.extract_strided_slice %368 {offsets = [0, 0], sizes = [1, 32], strides = [1, 1]} : vector<9x32xf32> to vector<1x32xf32>
    %370 = vector.extract_strided_slice %368 {offsets = [1, 0], sizes = [1, 32], strides = [1, 1]} : vector<9x32xf32> to vector<1x32xf32>
    %371 = vector.extract_strided_slice %368 {offsets = [2, 0], sizes = [1, 32], strides = [1, 1]} : vector<9x32xf32> to vector<1x32xf32>
    %372 = vector.extract_strided_slice %368 {offsets = [3, 0], sizes = [1, 32], strides = [1, 1]} : vector<9x32xf32> to vector<1x32xf32>
    %373 = vector.extract_strided_slice %368 {offsets = [4, 0], sizes = [1, 32], strides = [1, 1]} : vector<9x32xf32> to vector<1x32xf32>
    %374 = vector.extract_strided_slice %368 {offsets = [5, 0], sizes = [1, 32], strides = [1, 1]} : vector<9x32xf32> to vector<1x32xf32>
    %375 = vector.extract_strided_slice %368 {offsets = [6, 0], sizes = [1, 32], strides = [1, 1]} : vector<9x32xf32> to vector<1x32xf32>
    %376 = vector.extract_strided_slice %368 {offsets = [7, 0], sizes = [1, 32], strides = [1, 1]} : vector<9x32xf32> to vector<1x32xf32>
    %377 = vector.extract_strided_slice %368 {offsets = [8, 0], sizes = [1, 32], strides = [1, 1]} : vector<9x32xf32> to vector<1x32xf32>
    %c3_184 = arith.constant 3 : index
    %c0_185 = arith.constant 0 : index
    %378 = vector.load %arg9[%c3_184, %c0_185] : memref<6x256xf32, #tpu.memory_space<vmem>>, vector<1x256xf32>
    %379 = arith.truncf %354 : vector<16x32xf32> to vector<16x32xbf16>
    %cst_186 = arith.constant dense<0.000000e+00> : vector<16x32xf32>
    %380 = tpu.matmul %379, %356, %cst_186 {dimension_numbers = #tpu.dot_dimension_numbers<[1], [0], [0], [1], [0, 0, 1, 1], [], []>} : vector<16x32xbf16>, vector<32x32xbf16>, vector<16x32xf32> -> vector<16x32xf32>
    %381 = vector.broadcast %369 : vector<1x32xf32> to vector<16x32xf32>
    %382 = arith.addf %380, %381 : vector<16x32xf32>
    %cst_187 = arith.constant dense<0.000000e+00> : vector<16x32xf32>
    %383 = tpu.matmul %379, %358, %cst_187 {dimension_numbers = #tpu.dot_dimension_numbers<[1], [0], [0], [1], [0, 0, 1, 1], [], []>} : vector<16x32xbf16>, vector<32x32xbf16>, vector<16x32xf32> -> vector<16x32xf32>
    %384 = vector.broadcast %370 : vector<1x32xf32> to vector<16x32xf32>
    %385 = arith.addf %383, %384 : vector<16x32xf32>
    %cst_188 = arith.constant dense<0.000000e+00> : vector<16x32xf32>
    %386 = tpu.matmul %379, %360, %cst_188 {dimension_numbers = #tpu.dot_dimension_numbers<[1], [0], [0], [1], [0, 0, 1, 1], [], []>} : vector<16x32xbf16>, vector<32x32xbf16>, vector<16x32xf32> -> vector<16x32xf32>
    %387 = vector.broadcast %371 : vector<1x32xf32> to vector<16x32xf32>
    %388 = arith.addf %386, %387 : vector<16x32xf32>
    %389 = arith.truncf %382 : vector<16x32xf32> to vector<16x32xbf16>
    %390 = arith.truncf %385 : vector<16x32xf32> to vector<16x32xbf16>
    %cst_189 = arith.constant dense<0.000000e+00> : vector<16x16xf32>
    %391 = tpu.matmul %389, %390, %cst_189 {dimension_numbers = #tpu.dot_dimension_numbers<[1], [1], [0], [0], [0, 0, 1, 0], [], []>} : vector<16x32xbf16>, vector<16x32xbf16>, vector<16x16xf32> -> vector<16x16xf32>
    %cst_190 = arith.constant 0.176776692 : f32
    %392 = vector.broadcast %cst_190 : f32 to vector<16x16xf32>
    %393 = arith.mulf %391, %392 : vector<16x16xf32>
    %cst_191 = arith.constant dense<0xFF800000> : vector<16xf32>
    %394 = vector.multi_reduction <maximumf>, %393, %cst_191 [1] : vector<16x16xf32> to vector<16xf32>
    %395 = vector.shape_cast %394 : vector<16xf32> to vector<16x1xf32>
    %396 = vector.broadcast %395 : vector<16x1xf32> to vector<16x16xf32>
    %397 = arith.subf %393, %396 : vector<16x16xf32>
    %398 = math.exp %397 : vector<16x16xf32>
    %cst_192 = arith.constant dense<0.000000e+00> : vector<16xf32>
    %399 = vector.multi_reduction <add>, %398, %cst_192 [1] : vector<16x16xf32> to vector<16xf32>
    %400 = vector.shape_cast %399 : vector<16xf32> to vector<16x1xf32>
    %401 = tpu.reciprocal %400 {approx = true} : vector<16x1xf32> -> vector<16x1xf32>
    %402 = vector.broadcast %401 : vector<16x1xf32> to vector<16x16xf32>
    %403 = arith.mulf %398, %402 : vector<16x16xf32>
    %404 = arith.truncf %403 : vector<16x16xf32> to vector<16x16xbf16>
    %405 = arith.truncf %388 : vector<16x32xf32> to vector<16x32xbf16>
    %cst_193 = arith.constant dense<0.000000e+00> : vector<16x32xf32>
    %406 = tpu.matmul %404, %405, %cst_193 {dimension_numbers = #tpu.dot_dimension_numbers<[1], [0], [0], [1], [0, 0, 1, 1], [], []>} : vector<16x16xbf16>, vector<16x32xbf16>, vector<16x32xf32> -> vector<16x32xf32>
    %407 = arith.truncf %406 : vector<16x32xf32> to vector<16x32xbf16>
    %cst_194 = arith.constant dense<0.000000e+00> : vector<16x32xf32>
    %408 = tpu.matmul %407, %362, %cst_194 {dimension_numbers = #tpu.dot_dimension_numbers<[1], [0], [0], [1], [0, 0, 1, 1], [], []>} : vector<16x32xbf16>, vector<32x32xbf16>, vector<16x32xf32> -> vector<16x32xf32>
    %409 = vector.broadcast %372 : vector<1x32xf32> to vector<16x32xf32>
    %410 = arith.addf %408, %409 : vector<16x32xf32>
    %411 = arith.addf %354, %410 : vector<16x32xf32>
    %cst_195 = arith.constant dense<0.000000e+00> : vector<16xf32>
    %412 = vector.multi_reduction <add>, %411, %cst_195 [1] : vector<16x32xf32> to vector<16xf32>
    %413 = vector.shape_cast %412 : vector<16xf32> to vector<16x1xf32>
    %cst_196 = arith.constant 3.200000e+01 : f32
    %414 = vector.broadcast %cst_196 : f32 to vector<16x1xf32>
    %415 = arith.divf %413, %414 : vector<16x1xf32>
    %416 = vector.broadcast %415 : vector<16x1xf32> to vector<16x32xf32>
    %417 = arith.subf %411, %416 : vector<16x32xf32>
    %418 = arith.mulf %417, %417 : vector<16x32xf32>
    %cst_197 = arith.constant dense<0.000000e+00> : vector<16xf32>
    %419 = vector.multi_reduction <add>, %418, %cst_197 [1] : vector<16x32xf32> to vector<16xf32>
    %420 = vector.shape_cast %419 : vector<16xf32> to vector<16x1xf32>
    %cst_198 = arith.constant 3.200000e+01 : f32
    %421 = vector.broadcast %cst_198 : f32 to vector<16x1xf32>
    %422 = arith.divf %420, %421 : vector<16x1xf32>
    %423 = vector.broadcast %415 : vector<16x1xf32> to vector<16x32xf32>
    %424 = arith.subf %411, %423 : vector<16x32xf32>
    %cst_199 = arith.constant 9.99999974E-6 : f32
    %425 = vector.broadcast %cst_199 : f32 to vector<16x1xf32>
    %426 = arith.addf %422, %425 : vector<16x1xf32>
    %427 = math.rsqrt %426 : vector<16x1xf32>
    %428 = vector.broadcast %427 : vector<16x1xf32> to vector<16x32xf32>
    %429 = arith.mulf %424, %428 : vector<16x32xf32>
    %430 = vector.broadcast %373 : vector<1x32xf32> to vector<16x32xf32>
    %431 = arith.mulf %429, %430 : vector<16x32xf32>
    %432 = vector.broadcast %374 : vector<1x32xf32> to vector<16x32xf32>
    %433 = arith.addf %431, %432 : vector<16x32xf32>
    %434 = arith.truncf %433 : vector<16x32xf32> to vector<16x32xbf16>
    %cst_200 = arith.constant dense<0.000000e+00> : vector<16x256xf32>
    %435 = tpu.matmul %434, %364, %cst_200 {dimension_numbers = #tpu.dot_dimension_numbers<[1], [0], [0], [1], [0, 0, 1, 1], [], []>} : vector<16x32xbf16>, vector<32x256xbf16>, vector<16x256xf32> -> vector<16x256xf32>
    %436 = vector.broadcast %378 : vector<1x256xf32> to vector<16x256xf32>
    %437 = arith.addf %435, %436 : vector<16x256xf32>
    %cst_201 = arith.constant 0.000000e+00 : f32
    %438 = vector.broadcast %cst_201 : f32 to vector<16x256xf32>
    %439 = arith.maximumf %437, %438 : vector<16x256xf32>
    %440 = arith.truncf %439 : vector<16x256xf32> to vector<16x256xbf16>
    %cst_202 = arith.constant dense<0.000000e+00> : vector<16x32xf32>
    %441 = tpu.matmul %440, %366, %cst_202 {dimension_numbers = #tpu.dot_dimension_numbers<[1], [0], [0], [1], [0, 0, 1, 1], [], []>} : vector<16x256xbf16>, vector<256x32xbf16>, vector<16x32xf32> -> vector<16x32xf32>
    %442 = vector.broadcast %375 : vector<1x32xf32> to vector<16x32xf32>
    %443 = arith.addf %441, %442 : vector<16x32xf32>
    %444 = arith.addf %433, %443 : vector<16x32xf32>
    %cst_203 = arith.constant dense<0.000000e+00> : vector<16xf32>
    %445 = vector.multi_reduction <add>, %444, %cst_203 [1] : vector<16x32xf32> to vector<16xf32>
    %446 = vector.shape_cast %445 : vector<16xf32> to vector<16x1xf32>
    %cst_204 = arith.constant 3.200000e+01 : f32
    %447 = vector.broadcast %cst_204 : f32 to vector<16x1xf32>
    %448 = arith.divf %446, %447 : vector<16x1xf32>
    %449 = vector.broadcast %448 : vector<16x1xf32> to vector<16x32xf32>
    %450 = arith.subf %444, %449 : vector<16x32xf32>
    %451 = arith.mulf %450, %450 : vector<16x32xf32>
    %cst_205 = arith.constant dense<0.000000e+00> : vector<16xf32>
    %452 = vector.multi_reduction <add>, %451, %cst_205 [1] : vector<16x32xf32> to vector<16xf32>
    %453 = vector.shape_cast %452 : vector<16xf32> to vector<16x1xf32>
    %cst_206 = arith.constant 3.200000e+01 : f32
    %454 = vector.broadcast %cst_206 : f32 to vector<16x1xf32>
    %455 = arith.divf %453, %454 : vector<16x1xf32>
    %456 = vector.broadcast %448 : vector<16x1xf32> to vector<16x32xf32>
    %457 = arith.subf %444, %456 : vector<16x32xf32>
    %cst_207 = arith.constant 9.99999974E-6 : f32
    %458 = vector.broadcast %cst_207 : f32 to vector<16x1xf32>
    %459 = arith.addf %455, %458 : vector<16x1xf32>
    %460 = math.rsqrt %459 : vector<16x1xf32>
    %461 = vector.broadcast %460 : vector<16x1xf32> to vector<16x32xf32>
    %462 = arith.mulf %457, %461 : vector<16x32xf32>
    %463 = vector.broadcast %376 : vector<1x32xf32> to vector<16x32xf32>
    %464 = arith.mulf %462, %463 : vector<16x32xf32>
    %465 = vector.broadcast %377 : vector<1x32xf32> to vector<16x32xf32>
    %466 = arith.addf %464, %465 : vector<16x32xf32>
    %c4 = arith.constant 4 : index
    %c0_208 = arith.constant 0 : index
    %c0_209 = arith.constant 0 : index
    %c0_210 = arith.constant 0 : index
    %467 = vector.load %arg5[%c4, %c0_208, %c0_209, %c0_210] : memref<6x4x32x32xbf16, #tpu.memory_space<vmem>>, vector<1x1x32x32xbf16>
    %468 = vector.shape_cast %467 : vector<1x1x32x32xbf16> to vector<32x32xbf16>
    %c4_211 = arith.constant 4 : index
    %c1_212 = arith.constant 1 : index
    %c0_213 = arith.constant 0 : index
    %c0_214 = arith.constant 0 : index
    %469 = vector.load %arg5[%c4_211, %c1_212, %c0_213, %c0_214] : memref<6x4x32x32xbf16, #tpu.memory_space<vmem>>, vector<1x1x32x32xbf16>
    %470 = vector.shape_cast %469 : vector<1x1x32x32xbf16> to vector<32x32xbf16>
    %c4_215 = arith.constant 4 : index
    %c2_216 = arith.constant 2 : index
    %c0_217 = arith.constant 0 : index
    %c0_218 = arith.constant 0 : index
    %471 = vector.load %arg5[%c4_215, %c2_216, %c0_217, %c0_218] : memref<6x4x32x32xbf16, #tpu.memory_space<vmem>>, vector<1x1x32x32xbf16>
    %472 = vector.shape_cast %471 : vector<1x1x32x32xbf16> to vector<32x32xbf16>
    %c4_219 = arith.constant 4 : index
    %c3_220 = arith.constant 3 : index
    %c0_221 = arith.constant 0 : index
    %c0_222 = arith.constant 0 : index
    %473 = vector.load %arg5[%c4_219, %c3_220, %c0_221, %c0_222] : memref<6x4x32x32xbf16, #tpu.memory_space<vmem>>, vector<1x1x32x32xbf16>
    %474 = vector.shape_cast %473 : vector<1x1x32x32xbf16> to vector<32x32xbf16>
    %c4_223 = arith.constant 4 : index
    %c0_224 = arith.constant 0 : index
    %c0_225 = arith.constant 0 : index
    %475 = vector.load %arg6[%c4_223, %c0_224, %c0_225] : memref<6x32x256xbf16, #tpu.memory_space<vmem>>, vector<1x32x256xbf16>
    %476 = vector.shape_cast %475 : vector<1x32x256xbf16> to vector<32x256xbf16>
    %c4_226 = arith.constant 4 : index
    %c0_227 = arith.constant 0 : index
    %c0_228 = arith.constant 0 : index
    %477 = vector.load %arg7[%c4_226, %c0_227, %c0_228] : memref<6x256x32xbf16, #tpu.memory_space<vmem>>, vector<1x256x32xbf16>
    %478 = vector.shape_cast %477 : vector<1x256x32xbf16> to vector<256x32xbf16>
    %c4_229 = arith.constant 4 : index
    %c0_230 = arith.constant 0 : index
    %c0_231 = arith.constant 0 : index
    %479 = vector.load %arg8[%c4_229, %c0_230, %c0_231] : memref<6x9x32xf32, #tpu.memory_space<vmem>>, vector<1x9x32xf32>
    %480 = vector.shape_cast %479 : vector<1x9x32xf32> to vector<9x32xf32>
    %481 = vector.extract_strided_slice %480 {offsets = [0, 0], sizes = [1, 32], strides = [1, 1]} : vector<9x32xf32> to vector<1x32xf32>
    %482 = vector.extract_strided_slice %480 {offsets = [1, 0], sizes = [1, 32], strides = [1, 1]} : vector<9x32xf32> to vector<1x32xf32>
    %483 = vector.extract_strided_slice %480 {offsets = [2, 0], sizes = [1, 32], strides = [1, 1]} : vector<9x32xf32> to vector<1x32xf32>
    %484 = vector.extract_strided_slice %480 {offsets = [3, 0], sizes = [1, 32], strides = [1, 1]} : vector<9x32xf32> to vector<1x32xf32>
    %485 = vector.extract_strided_slice %480 {offsets = [4, 0], sizes = [1, 32], strides = [1, 1]} : vector<9x32xf32> to vector<1x32xf32>
    %486 = vector.extract_strided_slice %480 {offsets = [5, 0], sizes = [1, 32], strides = [1, 1]} : vector<9x32xf32> to vector<1x32xf32>
    %487 = vector.extract_strided_slice %480 {offsets = [6, 0], sizes = [1, 32], strides = [1, 1]} : vector<9x32xf32> to vector<1x32xf32>
    %488 = vector.extract_strided_slice %480 {offsets = [7, 0], sizes = [1, 32], strides = [1, 1]} : vector<9x32xf32> to vector<1x32xf32>
    %489 = vector.extract_strided_slice %480 {offsets = [8, 0], sizes = [1, 32], strides = [1, 1]} : vector<9x32xf32> to vector<1x32xf32>
    %c4_232 = arith.constant 4 : index
    %c0_233 = arith.constant 0 : index
    %490 = vector.load %arg9[%c4_232, %c0_233] : memref<6x256xf32, #tpu.memory_space<vmem>>, vector<1x256xf32>
    %491 = arith.truncf %466 : vector<16x32xf32> to vector<16x32xbf16>
    %cst_234 = arith.constant dense<0.000000e+00> : vector<16x32xf32>
    %492 = tpu.matmul %491, %468, %cst_234 {dimension_numbers = #tpu.dot_dimension_numbers<[1], [0], [0], [1], [0, 0, 1, 1], [], []>} : vector<16x32xbf16>, vector<32x32xbf16>, vector<16x32xf32> -> vector<16x32xf32>
    %493 = vector.broadcast %481 : vector<1x32xf32> to vector<16x32xf32>
    %494 = arith.addf %492, %493 : vector<16x32xf32>
    %cst_235 = arith.constant dense<0.000000e+00> : vector<16x32xf32>
    %495 = tpu.matmul %491, %470, %cst_235 {dimension_numbers = #tpu.dot_dimension_numbers<[1], [0], [0], [1], [0, 0, 1, 1], [], []>} : vector<16x32xbf16>, vector<32x32xbf16>, vector<16x32xf32> -> vector<16x32xf32>
    %496 = vector.broadcast %482 : vector<1x32xf32> to vector<16x32xf32>
    %497 = arith.addf %495, %496 : vector<16x32xf32>
    %cst_236 = arith.constant dense<0.000000e+00> : vector<16x32xf32>
    %498 = tpu.matmul %491, %472, %cst_236 {dimension_numbers = #tpu.dot_dimension_numbers<[1], [0], [0], [1], [0, 0, 1, 1], [], []>} : vector<16x32xbf16>, vector<32x32xbf16>, vector<16x32xf32> -> vector<16x32xf32>
    %499 = vector.broadcast %483 : vector<1x32xf32> to vector<16x32xf32>
    %500 = arith.addf %498, %499 : vector<16x32xf32>
    %501 = arith.truncf %494 : vector<16x32xf32> to vector<16x32xbf16>
    %502 = arith.truncf %497 : vector<16x32xf32> to vector<16x32xbf16>
    %cst_237 = arith.constant dense<0.000000e+00> : vector<16x16xf32>
    %503 = tpu.matmul %501, %502, %cst_237 {dimension_numbers = #tpu.dot_dimension_numbers<[1], [1], [0], [0], [0, 0, 1, 0], [], []>} : vector<16x32xbf16>, vector<16x32xbf16>, vector<16x16xf32> -> vector<16x16xf32>
    %cst_238 = arith.constant 0.176776692 : f32
    %504 = vector.broadcast %cst_238 : f32 to vector<16x16xf32>
    %505 = arith.mulf %503, %504 : vector<16x16xf32>
    %cst_239 = arith.constant dense<0xFF800000> : vector<16xf32>
    %506 = vector.multi_reduction <maximumf>, %505, %cst_239 [1] : vector<16x16xf32> to vector<16xf32>
    %507 = vector.shape_cast %506 : vector<16xf32> to vector<16x1xf32>
    %508 = vector.broadcast %507 : vector<16x1xf32> to vector<16x16xf32>
    %509 = arith.subf %505, %508 : vector<16x16xf32>
    %510 = math.exp %509 : vector<16x16xf32>
    %cst_240 = arith.constant dense<0.000000e+00> : vector<16xf32>
    %511 = vector.multi_reduction <add>, %510, %cst_240 [1] : vector<16x16xf32> to vector<16xf32>
    %512 = vector.shape_cast %511 : vector<16xf32> to vector<16x1xf32>
    %513 = tpu.reciprocal %512 {approx = true} : vector<16x1xf32> -> vector<16x1xf32>
    %514 = vector.broadcast %513 : vector<16x1xf32> to vector<16x16xf32>
    %515 = arith.mulf %510, %514 : vector<16x16xf32>
    %516 = arith.truncf %515 : vector<16x16xf32> to vector<16x16xbf16>
    %517 = arith.truncf %500 : vector<16x32xf32> to vector<16x32xbf16>
    %cst_241 = arith.constant dense<0.000000e+00> : vector<16x32xf32>
    %518 = tpu.matmul %516, %517, %cst_241 {dimension_numbers = #tpu.dot_dimension_numbers<[1], [0], [0], [1], [0, 0, 1, 1], [], []>} : vector<16x16xbf16>, vector<16x32xbf16>, vector<16x32xf32> -> vector<16x32xf32>
    %519 = arith.truncf %518 : vector<16x32xf32> to vector<16x32xbf16>
    %cst_242 = arith.constant dense<0.000000e+00> : vector<16x32xf32>
    %520 = tpu.matmul %519, %474, %cst_242 {dimension_numbers = #tpu.dot_dimension_numbers<[1], [0], [0], [1], [0, 0, 1, 1], [], []>} : vector<16x32xbf16>, vector<32x32xbf16>, vector<16x32xf32> -> vector<16x32xf32>
    %521 = vector.broadcast %484 : vector<1x32xf32> to vector<16x32xf32>
    %522 = arith.addf %520, %521 : vector<16x32xf32>
    %523 = arith.addf %466, %522 : vector<16x32xf32>
    %cst_243 = arith.constant dense<0.000000e+00> : vector<16xf32>
    %524 = vector.multi_reduction <add>, %523, %cst_243 [1] : vector<16x32xf32> to vector<16xf32>
    %525 = vector.shape_cast %524 : vector<16xf32> to vector<16x1xf32>
    %cst_244 = arith.constant 3.200000e+01 : f32
    %526 = vector.broadcast %cst_244 : f32 to vector<16x1xf32>
    %527 = arith.divf %525, %526 : vector<16x1xf32>
    %528 = vector.broadcast %527 : vector<16x1xf32> to vector<16x32xf32>
    %529 = arith.subf %523, %528 : vector<16x32xf32>
    %530 = arith.mulf %529, %529 : vector<16x32xf32>
    %cst_245 = arith.constant dense<0.000000e+00> : vector<16xf32>
    %531 = vector.multi_reduction <add>, %530, %cst_245 [1] : vector<16x32xf32> to vector<16xf32>
    %532 = vector.shape_cast %531 : vector<16xf32> to vector<16x1xf32>
    %cst_246 = arith.constant 3.200000e+01 : f32
    %533 = vector.broadcast %cst_246 : f32 to vector<16x1xf32>
    %534 = arith.divf %532, %533 : vector<16x1xf32>
    %535 = vector.broadcast %527 : vector<16x1xf32> to vector<16x32xf32>
    %536 = arith.subf %523, %535 : vector<16x32xf32>
    %cst_247 = arith.constant 9.99999974E-6 : f32
    %537 = vector.broadcast %cst_247 : f32 to vector<16x1xf32>
    %538 = arith.addf %534, %537 : vector<16x1xf32>
    %539 = math.rsqrt %538 : vector<16x1xf32>
    %540 = vector.broadcast %539 : vector<16x1xf32> to vector<16x32xf32>
    %541 = arith.mulf %536, %540 : vector<16x32xf32>
    %542 = vector.broadcast %485 : vector<1x32xf32> to vector<16x32xf32>
    %543 = arith.mulf %541, %542 : vector<16x32xf32>
    %544 = vector.broadcast %486 : vector<1x32xf32> to vector<16x32xf32>
    %545 = arith.addf %543, %544 : vector<16x32xf32>
    %546 = arith.truncf %545 : vector<16x32xf32> to vector<16x32xbf16>
    %cst_248 = arith.constant dense<0.000000e+00> : vector<16x256xf32>
    %547 = tpu.matmul %546, %476, %cst_248 {dimension_numbers = #tpu.dot_dimension_numbers<[1], [0], [0], [1], [0, 0, 1, 1], [], []>} : vector<16x32xbf16>, vector<32x256xbf16>, vector<16x256xf32> -> vector<16x256xf32>
    %548 = vector.broadcast %490 : vector<1x256xf32> to vector<16x256xf32>
    %549 = arith.addf %547, %548 : vector<16x256xf32>
    %cst_249 = arith.constant 0.000000e+00 : f32
    %550 = vector.broadcast %cst_249 : f32 to vector<16x256xf32>
    %551 = arith.maximumf %549, %550 : vector<16x256xf32>
    %552 = arith.truncf %551 : vector<16x256xf32> to vector<16x256xbf16>
    %cst_250 = arith.constant dense<0.000000e+00> : vector<16x32xf32>
    %553 = tpu.matmul %552, %478, %cst_250 {dimension_numbers = #tpu.dot_dimension_numbers<[1], [0], [0], [1], [0, 0, 1, 1], [], []>} : vector<16x256xbf16>, vector<256x32xbf16>, vector<16x32xf32> -> vector<16x32xf32>
    %554 = vector.broadcast %487 : vector<1x32xf32> to vector<16x32xf32>
    %555 = arith.addf %553, %554 : vector<16x32xf32>
    %556 = arith.addf %545, %555 : vector<16x32xf32>
    %cst_251 = arith.constant dense<0.000000e+00> : vector<16xf32>
    %557 = vector.multi_reduction <add>, %556, %cst_251 [1] : vector<16x32xf32> to vector<16xf32>
    %558 = vector.shape_cast %557 : vector<16xf32> to vector<16x1xf32>
    %cst_252 = arith.constant 3.200000e+01 : f32
    %559 = vector.broadcast %cst_252 : f32 to vector<16x1xf32>
    %560 = arith.divf %558, %559 : vector<16x1xf32>
    %561 = vector.broadcast %560 : vector<16x1xf32> to vector<16x32xf32>
    %562 = arith.subf %556, %561 : vector<16x32xf32>
    %563 = arith.mulf %562, %562 : vector<16x32xf32>
    %cst_253 = arith.constant dense<0.000000e+00> : vector<16xf32>
    %564 = vector.multi_reduction <add>, %563, %cst_253 [1] : vector<16x32xf32> to vector<16xf32>
    %565 = vector.shape_cast %564 : vector<16xf32> to vector<16x1xf32>
    %cst_254 = arith.constant 3.200000e+01 : f32
    %566 = vector.broadcast %cst_254 : f32 to vector<16x1xf32>
    %567 = arith.divf %565, %566 : vector<16x1xf32>
    %568 = vector.broadcast %560 : vector<16x1xf32> to vector<16x32xf32>
    %569 = arith.subf %556, %568 : vector<16x32xf32>
    %cst_255 = arith.constant 9.99999974E-6 : f32
    %570 = vector.broadcast %cst_255 : f32 to vector<16x1xf32>
    %571 = arith.addf %567, %570 : vector<16x1xf32>
    %572 = math.rsqrt %571 : vector<16x1xf32>
    %573 = vector.broadcast %572 : vector<16x1xf32> to vector<16x32xf32>
    %574 = arith.mulf %569, %573 : vector<16x32xf32>
    %575 = vector.broadcast %488 : vector<1x32xf32> to vector<16x32xf32>
    %576 = arith.mulf %574, %575 : vector<16x32xf32>
    %577 = vector.broadcast %489 : vector<1x32xf32> to vector<16x32xf32>
    %578 = arith.addf %576, %577 : vector<16x32xf32>
    %c5 = arith.constant 5 : index
    %c0_256 = arith.constant 0 : index
    %c0_257 = arith.constant 0 : index
    %c0_258 = arith.constant 0 : index
    %579 = vector.load %arg5[%c5, %c0_256, %c0_257, %c0_258] : memref<6x4x32x32xbf16, #tpu.memory_space<vmem>>, vector<1x1x32x32xbf16>
    %580 = vector.shape_cast %579 : vector<1x1x32x32xbf16> to vector<32x32xbf16>
    %c5_259 = arith.constant 5 : index
    %c1_260 = arith.constant 1 : index
    %c0_261 = arith.constant 0 : index
    %c0_262 = arith.constant 0 : index
    %581 = vector.load %arg5[%c5_259, %c1_260, %c0_261, %c0_262] : memref<6x4x32x32xbf16, #tpu.memory_space<vmem>>, vector<1x1x32x32xbf16>
    %582 = vector.shape_cast %581 : vector<1x1x32x32xbf16> to vector<32x32xbf16>
    %c5_263 = arith.constant 5 : index
    %c2_264 = arith.constant 2 : index
    %c0_265 = arith.constant 0 : index
    %c0_266 = arith.constant 0 : index
    %583 = vector.load %arg5[%c5_263, %c2_264, %c0_265, %c0_266] : memref<6x4x32x32xbf16, #tpu.memory_space<vmem>>, vector<1x1x32x32xbf16>
    %584 = vector.shape_cast %583 : vector<1x1x32x32xbf16> to vector<32x32xbf16>
    %c5_267 = arith.constant 5 : index
    %c3_268 = arith.constant 3 : index
    %c0_269 = arith.constant 0 : index
    %c0_270 = arith.constant 0 : index
    %585 = vector.load %arg5[%c5_267, %c3_268, %c0_269, %c0_270] : memref<6x4x32x32xbf16, #tpu.memory_space<vmem>>, vector<1x1x32x32xbf16>
    %586 = vector.shape_cast %585 : vector<1x1x32x32xbf16> to vector<32x32xbf16>
    %c5_271 = arith.constant 5 : index
    %c0_272 = arith.constant 0 : index
    %c0_273 = arith.constant 0 : index
    %587 = vector.load %arg6[%c5_271, %c0_272, %c0_273] : memref<6x32x256xbf16, #tpu.memory_space<vmem>>, vector<1x32x256xbf16>
    %588 = vector.shape_cast %587 : vector<1x32x256xbf16> to vector<32x256xbf16>
    %c5_274 = arith.constant 5 : index
    %c0_275 = arith.constant 0 : index
    %c0_276 = arith.constant 0 : index
    %589 = vector.load %arg7[%c5_274, %c0_275, %c0_276] : memref<6x256x32xbf16, #tpu.memory_space<vmem>>, vector<1x256x32xbf16>
    %590 = vector.shape_cast %589 : vector<1x256x32xbf16> to vector<256x32xbf16>
    %c5_277 = arith.constant 5 : index
    %c0_278 = arith.constant 0 : index
    %c0_279 = arith.constant 0 : index
    %591 = vector.load %arg8[%c5_277, %c0_278, %c0_279] : memref<6x9x32xf32, #tpu.memory_space<vmem>>, vector<1x9x32xf32>
    %592 = vector.shape_cast %591 : vector<1x9x32xf32> to vector<9x32xf32>
    %593 = vector.extract_strided_slice %592 {offsets = [0, 0], sizes = [1, 32], strides = [1, 1]} : vector<9x32xf32> to vector<1x32xf32>
    %594 = vector.extract_strided_slice %592 {offsets = [1, 0], sizes = [1, 32], strides = [1, 1]} : vector<9x32xf32> to vector<1x32xf32>
    %595 = vector.extract_strided_slice %592 {offsets = [2, 0], sizes = [1, 32], strides = [1, 1]} : vector<9x32xf32> to vector<1x32xf32>
    %596 = vector.extract_strided_slice %592 {offsets = [3, 0], sizes = [1, 32], strides = [1, 1]} : vector<9x32xf32> to vector<1x32xf32>
    %597 = vector.extract_strided_slice %592 {offsets = [4, 0], sizes = [1, 32], strides = [1, 1]} : vector<9x32xf32> to vector<1x32xf32>
    %598 = vector.extract_strided_slice %592 {offsets = [5, 0], sizes = [1, 32], strides = [1, 1]} : vector<9x32xf32> to vector<1x32xf32>
    %599 = vector.extract_strided_slice %592 {offsets = [6, 0], sizes = [1, 32], strides = [1, 1]} : vector<9x32xf32> to vector<1x32xf32>
    %600 = vector.extract_strided_slice %592 {offsets = [7, 0], sizes = [1, 32], strides = [1, 1]} : vector<9x32xf32> to vector<1x32xf32>
    %601 = vector.extract_strided_slice %592 {offsets = [8, 0], sizes = [1, 32], strides = [1, 1]} : vector<9x32xf32> to vector<1x32xf32>
    %c5_280 = arith.constant 5 : index
    %c0_281 = arith.constant 0 : index
    %602 = vector.load %arg9[%c5_280, %c0_281] : memref<6x256xf32, #tpu.memory_space<vmem>>, vector<1x256xf32>
    %603 = arith.truncf %578 : vector<16x32xf32> to vector<16x32xbf16>
    %cst_282 = arith.constant dense<0.000000e+00> : vector<16x32xf32>
    %604 = tpu.matmul %603, %580, %cst_282 {dimension_numbers = #tpu.dot_dimension_numbers<[1], [0], [0], [1], [0, 0, 1, 1], [], []>} : vector<16x32xbf16>, vector<32x32xbf16>, vector<16x32xf32> -> vector<16x32xf32>
    %605 = vector.broadcast %593 : vector<1x32xf32> to vector<16x32xf32>
    %606 = arith.addf %604, %605 : vector<16x32xf32>
    %cst_283 = arith.constant dense<0.000000e+00> : vector<16x32xf32>
    %607 = tpu.matmul %603, %582, %cst_283 {dimension_numbers = #tpu.dot_dimension_numbers<[1], [0], [0], [1], [0, 0, 1, 1], [], []>} : vector<16x32xbf16>, vector<32x32xbf16>, vector<16x32xf32> -> vector<16x32xf32>
    %608 = vector.broadcast %594 : vector<1x32xf32> to vector<16x32xf32>
    %609 = arith.addf %607, %608 : vector<16x32xf32>
    %cst_284 = arith.constant dense<0.000000e+00> : vector<16x32xf32>
    %610 = tpu.matmul %603, %584, %cst_284 {dimension_numbers = #tpu.dot_dimension_numbers<[1], [0], [0], [1], [0, 0, 1, 1], [], []>} : vector<16x32xbf16>, vector<32x32xbf16>, vector<16x32xf32> -> vector<16x32xf32>
    %611 = vector.broadcast %595 : vector<1x32xf32> to vector<16x32xf32>
    %612 = arith.addf %610, %611 : vector<16x32xf32>
    %613 = arith.truncf %606 : vector<16x32xf32> to vector<16x32xbf16>
    %614 = arith.truncf %609 : vector<16x32xf32> to vector<16x32xbf16>
    %cst_285 = arith.constant dense<0.000000e+00> : vector<16x16xf32>
    %615 = tpu.matmul %613, %614, %cst_285 {dimension_numbers = #tpu.dot_dimension_numbers<[1], [1], [0], [0], [0, 0, 1, 0], [], []>} : vector<16x32xbf16>, vector<16x32xbf16>, vector<16x16xf32> -> vector<16x16xf32>
    %cst_286 = arith.constant 0.176776692 : f32
    %616 = vector.broadcast %cst_286 : f32 to vector<16x16xf32>
    %617 = arith.mulf %615, %616 : vector<16x16xf32>
    %cst_287 = arith.constant dense<0xFF800000> : vector<16xf32>
    %618 = vector.multi_reduction <maximumf>, %617, %cst_287 [1] : vector<16x16xf32> to vector<16xf32>
    %619 = vector.shape_cast %618 : vector<16xf32> to vector<16x1xf32>
    %620 = vector.broadcast %619 : vector<16x1xf32> to vector<16x16xf32>
    %621 = arith.subf %617, %620 : vector<16x16xf32>
    %622 = math.exp %621 : vector<16x16xf32>
    %cst_288 = arith.constant dense<0.000000e+00> : vector<16xf32>
    %623 = vector.multi_reduction <add>, %622, %cst_288 [1] : vector<16x16xf32> to vector<16xf32>
    %624 = vector.shape_cast %623 : vector<16xf32> to vector<16x1xf32>
    %625 = tpu.reciprocal %624 {approx = true} : vector<16x1xf32> -> vector<16x1xf32>
    %626 = vector.broadcast %625 : vector<16x1xf32> to vector<16x16xf32>
    %627 = arith.mulf %622, %626 : vector<16x16xf32>
    %628 = arith.truncf %627 : vector<16x16xf32> to vector<16x16xbf16>
    %629 = arith.truncf %612 : vector<16x32xf32> to vector<16x32xbf16>
    %cst_289 = arith.constant dense<0.000000e+00> : vector<16x32xf32>
    %630 = tpu.matmul %628, %629, %cst_289 {dimension_numbers = #tpu.dot_dimension_numbers<[1], [0], [0], [1], [0, 0, 1, 1], [], []>} : vector<16x16xbf16>, vector<16x32xbf16>, vector<16x32xf32> -> vector<16x32xf32>
    %631 = arith.truncf %630 : vector<16x32xf32> to vector<16x32xbf16>
    %cst_290 = arith.constant dense<0.000000e+00> : vector<16x32xf32>
    %632 = tpu.matmul %631, %586, %cst_290 {dimension_numbers = #tpu.dot_dimension_numbers<[1], [0], [0], [1], [0, 0, 1, 1], [], []>} : vector<16x32xbf16>, vector<32x32xbf16>, vector<16x32xf32> -> vector<16x32xf32>
    %633 = vector.broadcast %596 : vector<1x32xf32> to vector<16x32xf32>
    %634 = arith.addf %632, %633 : vector<16x32xf32>
    %635 = arith.addf %578, %634 : vector<16x32xf32>
    %cst_291 = arith.constant dense<0.000000e+00> : vector<16xf32>
    %636 = vector.multi_reduction <add>, %635, %cst_291 [1] : vector<16x32xf32> to vector<16xf32>
    %637 = vector.shape_cast %636 : vector<16xf32> to vector<16x1xf32>
    %cst_292 = arith.constant 3.200000e+01 : f32
    %638 = vector.broadcast %cst_292 : f32 to vector<16x1xf32>
    %639 = arith.divf %637, %638 : vector<16x1xf32>
    %640 = vector.broadcast %639 : vector<16x1xf32> to vector<16x32xf32>
    %641 = arith.subf %635, %640 : vector<16x32xf32>
    %642 = arith.mulf %641, %641 : vector<16x32xf32>
    %cst_293 = arith.constant dense<0.000000e+00> : vector<16xf32>
    %643 = vector.multi_reduction <add>, %642, %cst_293 [1] : vector<16x32xf32> to vector<16xf32>
    %644 = vector.shape_cast %643 : vector<16xf32> to vector<16x1xf32>
    %cst_294 = arith.constant 3.200000e+01 : f32
    %645 = vector.broadcast %cst_294 : f32 to vector<16x1xf32>
    %646 = arith.divf %644, %645 : vector<16x1xf32>
    %647 = vector.broadcast %639 : vector<16x1xf32> to vector<16x32xf32>
    %648 = arith.subf %635, %647 : vector<16x32xf32>
    %cst_295 = arith.constant 9.99999974E-6 : f32
    %649 = vector.broadcast %cst_295 : f32 to vector<16x1xf32>
    %650 = arith.addf %646, %649 : vector<16x1xf32>
    %651 = math.rsqrt %650 : vector<16x1xf32>
    %652 = vector.broadcast %651 : vector<16x1xf32> to vector<16x32xf32>
    %653 = arith.mulf %648, %652 : vector<16x32xf32>
    %654 = vector.broadcast %597 : vector<1x32xf32> to vector<16x32xf32>
    %655 = arith.mulf %653, %654 : vector<16x32xf32>
    %656 = vector.broadcast %598 : vector<1x32xf32> to vector<16x32xf32>
    %657 = arith.addf %655, %656 : vector<16x32xf32>
    %658 = arith.truncf %657 : vector<16x32xf32> to vector<16x32xbf16>
    %cst_296 = arith.constant dense<0.000000e+00> : vector<16x256xf32>
    %659 = tpu.matmul %658, %588, %cst_296 {dimension_numbers = #tpu.dot_dimension_numbers<[1], [0], [0], [1], [0, 0, 1, 1], [], []>} : vector<16x32xbf16>, vector<32x256xbf16>, vector<16x256xf32> -> vector<16x256xf32>
    %660 = vector.broadcast %602 : vector<1x256xf32> to vector<16x256xf32>
    %661 = arith.addf %659, %660 : vector<16x256xf32>
    %cst_297 = arith.constant 0.000000e+00 : f32
    %662 = vector.broadcast %cst_297 : f32 to vector<16x256xf32>
    %663 = arith.maximumf %661, %662 : vector<16x256xf32>
    %664 = arith.truncf %663 : vector<16x256xf32> to vector<16x256xbf16>
    %cst_298 = arith.constant dense<0.000000e+00> : vector<16x32xf32>
    %665 = tpu.matmul %664, %590, %cst_298 {dimension_numbers = #tpu.dot_dimension_numbers<[1], [0], [0], [1], [0, 0, 1, 1], [], []>} : vector<16x256xbf16>, vector<256x32xbf16>, vector<16x32xf32> -> vector<16x32xf32>
    %666 = vector.broadcast %599 : vector<1x32xf32> to vector<16x32xf32>
    %667 = arith.addf %665, %666 : vector<16x32xf32>
    %668 = arith.addf %657, %667 : vector<16x32xf32>
    %cst_299 = arith.constant dense<0.000000e+00> : vector<16xf32>
    %669 = vector.multi_reduction <add>, %668, %cst_299 [1] : vector<16x32xf32> to vector<16xf32>
    %670 = vector.shape_cast %669 : vector<16xf32> to vector<16x1xf32>
    %cst_300 = arith.constant 3.200000e+01 : f32
    %671 = vector.broadcast %cst_300 : f32 to vector<16x1xf32>
    %672 = arith.divf %670, %671 : vector<16x1xf32>
    %673 = vector.broadcast %672 : vector<16x1xf32> to vector<16x32xf32>
    %674 = arith.subf %668, %673 : vector<16x32xf32>
    %675 = arith.mulf %674, %674 : vector<16x32xf32>
    %cst_301 = arith.constant dense<0.000000e+00> : vector<16xf32>
    %676 = vector.multi_reduction <add>, %675, %cst_301 [1] : vector<16x32xf32> to vector<16xf32>
    %677 = vector.shape_cast %676 : vector<16xf32> to vector<16x1xf32>
    %cst_302 = arith.constant 3.200000e+01 : f32
    %678 = vector.broadcast %cst_302 : f32 to vector<16x1xf32>
    %679 = arith.divf %677, %678 : vector<16x1xf32>
    %680 = vector.broadcast %672 : vector<16x1xf32> to vector<16x32xf32>
    %681 = arith.subf %668, %680 : vector<16x32xf32>
    %cst_303 = arith.constant 9.99999974E-6 : f32
    %682 = vector.broadcast %cst_303 : f32 to vector<16x1xf32>
    %683 = arith.addf %679, %682 : vector<16x1xf32>
    %684 = math.rsqrt %683 : vector<16x1xf32>
    %685 = vector.broadcast %684 : vector<16x1xf32> to vector<16x32xf32>
    %686 = arith.mulf %681, %685 : vector<16x32xf32>
    %687 = vector.broadcast %600 : vector<1x32xf32> to vector<16x32xf32>
    %688 = arith.mulf %686, %687 : vector<16x32xf32>
    %689 = vector.broadcast %601 : vector<1x32xf32> to vector<16x32xf32>
    %690 = arith.addf %688, %689 : vector<16x32xf32>
    %691 = arith.truncf %690 : vector<16x32xf32> to vector<16x32xbf16>
    %c1_304 = arith.constant 1 : index
    %c0_305 = arith.constant 0 : index
    %c0_306 = arith.constant 0 : index
    %692 = vector.load %arg10[%c1_304, %c0_305, %c0_306] : memref<2x32x32xbf16, #tpu.memory_space<vmem>>, vector<1x32x32xbf16>
    %693 = vector.shape_cast %692 : vector<1x32x32xbf16> to vector<32x32xbf16>
    %cst_307 = arith.constant dense<0.000000e+00> : vector<16x32xf32>
    %694 = tpu.matmul %691, %693, %cst_307 {dimension_numbers = #tpu.dot_dimension_numbers<[1], [0], [0], [1], [0, 0, 1, 1], [], []>} : vector<16x32xbf16>, vector<32x32xbf16>, vector<16x32xf32> -> vector<16x32xf32>
    %c0_308 = arith.constant 0 : index
    %c0_309 = arith.constant 0 : index
    %695 = vector.load %arg0[%c0_308, %c0_309] : memref<16x16xbf16, #tpu.memory_space<vmem>>, vector<16x16xbf16>
    %696 = arith.truncf %694 : vector<16x32xf32> to vector<16x32xbf16>
    %cst_310 = arith.constant dense<0.000000e+00> : vector<16x32xf32>
    %697 = tpu.matmul %695, %696, %cst_310 {dimension_numbers = #tpu.dot_dimension_numbers<[1], [0], [0], [1], [0, 0, 1, 1], [], []>} : vector<16x16xbf16>, vector<16x32xbf16>, vector<16x32xf32> -> vector<16x32xf32>
    %c1_311 = arith.constant 1 : index
    %c0_312 = arith.constant 0 : index
    %698 = vector.load %arg11[%c1_311, %c0_312] : memref<2x32xf32, #tpu.memory_space<vmem>>, vector<1x32xf32>
    %699 = vector.broadcast %698 : vector<1x32xf32> to vector<16x32xf32>
    %700 = arith.addf %697, %699 : vector<16x32xf32>
    %cst_313 = arith.constant 0.000000e+00 : f32
    %701 = vector.broadcast %cst_313 : f32 to vector<16x32xf32>
    %702 = arith.maximumf %700, %701 : vector<16x32xf32>
    %703 = arith.addf %690, %702 : vector<16x32xf32>
    %c0_314 = arith.constant 0 : index
    %c0_315 = arith.constant 0 : index
    %704 = vector.load %arg1[%c0_314, %c0_315] : memref<2x16xbf16, #tpu.memory_space<vmem>>, vector<2x16xbf16>
    %705 = arith.truncf %703 : vector<16x32xf32> to vector<16x32xbf16>
    %cst_316 = arith.constant dense<0.000000e+00> : vector<2x32xf32>
    %706 = tpu.matmul %704, %705, %cst_316 {dimension_numbers = #tpu.dot_dimension_numbers<[1], [0], [0], [1], [0, 0, 1, 1], [], []>} : vector<2x16xbf16>, vector<16x32xbf16>, vector<2x32xf32> -> vector<2x32xf32>
    %707 = arith.truncf %706 : vector<2x32xf32> to vector<2x32xbf16>
    %c0_317 = arith.constant 0 : index
    %c0_318 = arith.constant 0 : index
    %708 = vector.load %arg12[%c0_317, %c0_318] : memref<32x6xbf16, #tpu.memory_space<vmem>>, vector<32x6xbf16>
    %cst_319 = arith.constant dense<0.000000e+00> : vector<2x6xf32>
    %709 = tpu.matmul %707, %708, %cst_319 {dimension_numbers = #tpu.dot_dimension_numbers<[1], [0], [0], [1], [0, 0, 1, 1], [], []>} : vector<2x32xbf16>, vector<32x6xbf16>, vector<2x6xf32> -> vector<2x6xf32>
    %c0_320 = arith.constant 0 : index
    %c0_321 = arith.constant 0 : index
    %710 = vector.load %arg13[%c0_320, %c0_321] : memref<1x6xf32, #tpu.memory_space<vmem>>, vector<1x6xf32>
    %711 = vector.broadcast %710 : vector<1x6xf32> to vector<2x6xf32>
    %712 = arith.addf %709, %711 : vector<2x6xf32>
    %c0_322 = arith.constant 0 : index
    %c0_323 = arith.constant 0 : index
    %713 = vector.load %arg14[%c0_322, %c0_323] : memref<2x6xf32, #tpu.memory_space<vmem>>, vector<2x6xf32>
    tpu.vector_store %arg14[%c0_322, %c0_323], %712 {strides = array<i32>} : memref<2x6xf32, #tpu.memory_space<vmem>>, vector<2x6xf32>,
    return
  }
}

</mosaic_0001>

<bundles_post_ra>
// kernel: tpu_custom_call.1
= control target key start
LH: loop header
LB: loop body
LE: loop exit
PB: predicated region body
PF: predicated region fallthrough
CT: control target
= control target key end

     0   :  { %vm68_vm0 = vcmask 1043456   ;;  %v6206_v1 = vmov 0.0   ;;  %vm6207_vm1 = vmmov 0   ;;  %vm64_vm2 = vcmask 64512   ;;  %s7373_s0 = inlined_call_operand.vmem [shape: bf16[16,16], index: 0, kind: input, shape index: {}]   ;;  %s7374_s1 = inlined_call_operand.vmem [shape: bf16[2,16], index: 1, kind: input, shape index: {}]   ;;  %s7375_s2 = inlined_call_operand.vmem [shape: bf16[16,8], index: 2, kind: input, shape index: {}]   ;;  %s7376_s3 = inlined_call_operand.vmem [shape: bf16[8,32], index: 3, kind: input, shape index: {}]   ;;  %s7377_s4 = inlined_call_operand.vmem [shape: f32[1,32], index: 4, kind: input, shape index: {}]   ;;  %s7378_s5 = inlined_call_operand.vmem [shape: bf16[6,4,32,32], index: 5, kind: input, shape index: {}]   ;;  %s7379_s6 = inlined_call_operand.vmem [shape: bf16[6,32,256], index: 6, kind: input, shape index: {}]   ;;  %s7380_s7 = inlined_call_operand.vmem [shape: bf16[6,256,32], index: 7, kind: input, shape index: {}]   ;;  %s7381_s8 = inlined_call_operand.vmem [shape: f32[6,9,32], index: 8, kind: input, shape index: {}]   ;;  %s7382_s9 = inlined_call_operand.vmem [shape: f32[6,256], index: 9, kind: input, shape index: {}]   ;;  %s7383_s10 = inlined_call_operand.vmem [shape: bf16[2,32,32], index: 10, kind: input, shape index: {}]   ;;  %s7384_s11 = inlined_call_operand.vmem [shape: f32[2,32], index: 11, kind: input, shape index: {}]   ;;  %s7385_s12 = inlined_call_operand.vmem [shape: bf16[32,6], index: 12, kind: input, shape index: {}]   ;;  %s7386_s13 = inlined_call_operand.vmem [shape: f32[1,6], index: 13, kind: input, shape index: {}]   ;;  %s7387_s14 = inlined_call_operand.hbm [shape: f32[2,6], index: 14, kind: output, shape index: {}]  }
   0x1   :  { %v51_v0 = vld [vmem:[%s7376_s3] sm:$0xf]  ;;  %5583 = vmatprep.subr.bf16.mxu0 %v6206_v1  ;;  %5585 = vmatprep.mubr.msk.bf16.mxu0 %vm6207_vm1, %v6206_v1  ;;  %v5900_v4 = vld [vmem:[%s7378_s5 + $0x8] sm:$0xff]   ;;  %v5901_v5 = vld [vmem:[%s7378_s5 + $0x18] sm:$0xff]  }
   0x2   :  { %v70_v2 = vsel %vm68_vm0, %v51_v0, 0  ;;  %v5899_v3 = vld [vmem:[%s7375_s2] sm:$0xff]   ;;  %5589 = vmatprep.subr.bf16.mxu1 %v6206_v1  ;;  %5593 = vmatprep.mubr.msk.bf16.mxu1 %vm6207_vm1, %v6206_v1  ;;  %v5903_v7 = vld [vmem:[%s7378_s5 + $0x10] sm:$0xff]  }
   0x3   :  { %5584 = vmatpush3.bf16.msra.mxu0 %v70_v2  ;;  %5590 = vmatpush3.bf16.msra.mxu1 %v5900_v4  ;;  %v5902_v6 = vld [vmem:[%s7378_s5] sm:$0xff]  }
   0x4   :  { %5597 = vmatprep.subr.bf16.mxu0 %v6206_v1  ;;  %5591 = vmatprep.subr.bf16.mxu1 %v6206_v1 }
   0x6   :  { %5586 = vmatmul.mubr.msk.bf16.vlgmr.msra.gmra.mxu0 %vm64_vm2, %v5899_v3 }
   0x7   :  { %5601 = vmatprep.mubr.msk.bf16.mxu0 %vm6207_vm1, %v6206_v1  ;;  %5598 = vmatpush3.bf16.msra.mxu0 %v5901_v5 }
   0x8   :  { %5599 = vmatprep.subr.bf16.mxu0 %v6206_v1  ;;  %5592 = vmatpush3.bf16.msra.mxu1 %v5902_v6 }
   0x9   :  { %5605 = vmatprep.subr.bf16.mxu1 %v6206_v1 }
   0xb   :  { %5600 = vmatpush3.bf16.msra.mxu0 %v5903_v7 }
   0xc   :  { %5613 = vmatprep.subr.bf16.mxu0 %v6206_v1 }
   0xd   :  { %19 = vsyncpa [#allocation3], 0  ;;  %v4812_v9 = vld [vmem:[%s7377_s4] ss:$0 sm:$0xff]  ;;  %vm188_vm3 = vcmask 261120   ;;  %v5904_v15 = vld [vmem:[%s7378_s5 + $0x28] sm:$0xff]   ;;  %v172_v18 = vlaneseq }
   0xe   :  { %v5905_v17 = vld [vmem:[%s7378_s5 + $0x20] sm:$0xff]   ;;  %vm398_vm4 = vcmask 130048   ;;  %s6209_s21 = smov [#allocation2]   ;;  %vm4796_vm5 = vcmask 41984  }
   0xf   :  { %v6342_v19 = vshrl.u32 %v172_v18, 7  ;;  %v6350_v21 = vld [vmem:[%s7381_s8] sm:$0xff]  ;;  %s4804_s22 = sshll.u32 %s6209_s21, 4  ;;  %s4805_s22 = int_to_ptr.vmem [resolvable:$true] %s4804_s22 }
  0x10   :  { %p6189_p1 = scmp.lt.s32.totalorder %s4805_s22, %s4805_s22 }
  0x11   :  { %v6345_v20 = vsub.s32 1, %v6342_v19  ;;  %v6355_v29 = vsub.s32 0, %v6342_v19  ;;  %v6358_v32 = vsub.s32 2, %v6342_v19 }
  0x13   :  { %v236_v24 = vrot.slane %v6350_v21, %v6345_v20  ;;  %v175_v37 = vrot.slane %v6350_v21, %v6355_v29  ;;  %v293_v38 = vrot.slane %v6350_v21, %v6358_v32 }
  0xc6   :  { %v106_v8 = vpop.f32.mrf.mxu0 }
  0xc7   :  { %v6319_v12 = vadd.f32 %v4812_v9, %v106_v8 }
  0xc8   :  { %v5587_v10 = vpop.f32.mrf.mxu0 }
  0xca   :  { %v109_v11 = vpop.f32.mrf.mxu0 }
  0xcb   :  { %v6321_v13 = vadd.f32 %v4812_v9, %v109_v11  ;;  %v5906_v11 = vld [vmem:[%s7378_s5 + $0x38] sm:$0xff]  }
  0xcc   :  { %v5588_v14 = vpop.f32.mrf.mxu0 }
  0xcd   :  { %v171_v16 = vpack.c.bf16 %v6321_v13, %v6319_v12  ;;  %v5907_v14 = vld [vmem:[%s7378_s5 + $0x30] sm:$0xff]  }
  0xcf   :  { %5594 = vmatmul.mubr.msk.bf16.vlgmr.msra.gmra.mxu1 %vm188_vm3, %v171_v16  ;;  %5602 = vmatmul.mubr.msk.bf16.vlgmr.msra.gmra.mxu0 %vm188_vm3, %v171_v16 }
  0xd0   :  { %5606 = vmatpush3.bf16.msra.mxu1 %v5904_v15  ;;  %5609 = vmatprep.mubr.msk.bf16.mxu1 %vm6207_vm1, %v6206_v1 }
  0xd1   :  { %5607 = vmatprep.subr.bf16.mxu1 %v6206_v1  ;;  %5615 = vmatprep.mubr.msk.bf16.mxu0 %vm6207_vm1, %v6206_v1 }
  0xd4   :  { %5608 = vmatpush3.bf16.msra.mxu1 %v5905_v17 }
  0xd5   :  { %5619 = vmatprep.subr.bf16.mxu1 %v6206_v1 }
  0xd7   :  { %5610 = vmatmul.mubr.msk.bf16.vlgmr.msra.gmra.mxu1 %vm188_vm3, %v171_v16 }
  0xd8   :  { %5621 = vmatprep.mubr.msk.bf16.mxu1 %vm6207_vm1, %v6206_v1 }
 0x18f   :  { %v226_v22 = vpop.f32.mrf.mxu1  ;;  %v283_v23 = vpop.f32.mrf.mxu0 }
 0x190   :  { %v284_v30 = vadd.f32 %v283_v23, %v236_v24  ;;  %v227_v43 = vadd.f32 %v226_v22, %v175_v37  ;;  %v6383_v23 = vsub.s32 3, %v6342_v19 }
 0x191   :  { %v5595_v25 = vpop.f32.mrf.mxu1  ;;  %v5603_v26 = vpop.f32.mrf.mxu0 }
 0x193   :  { %v229_v27 = vpop.f32.mrf.mxu1  ;;  %v286_v28 = vpop.f32.mrf.mxu0 }
 0x194   :  { %v287_v31 = vadd.f32 %v286_v28, %v236_v24  ;;  %v230_v41 = vadd.f32 %v229_v27, %v175_v37  ;;  %v471_v24 = vrot.slane %v6350_v21, %v6383_v23 }
 0x195   :  { %v5596_v33 = vpop.f32.mrf.mxu1  ;;  %v5604_v34 = vpop.f32.mrf.mxu0 }
 0x196   :  { %v348_v35 = vpack.c.bf16 %v287_v31, %v284_v30  ;;  %v347_v47 = vpack.c.bf16 %v230_v41, %v227_v43 }
 0x197   :  { %v340_v36 = vpop.f32.mrf.mxu1 }
 0x198   :  { %v353_v39 = vsel %vm188_vm3, %v348_v35, 0  ;;  %v341_v44 = vadd.f32 %v340_v36, %v293_v38 }
 0x199   :  { %v5611_v40 = vpop.f32.mrf.mxu1  ;;  %5614 = vmatpush3.bf16.xpose.msra.mxu0 %v353_v39 }
 0x19a   :  { %5625 = vmatprep.subr.bf16.mxu0 %v6206_v1 }
 0x19b   :  { %v343_v42 = vpop.f32.mrf.mxu1 }
 0x19c   :  { %v344_v45 = vadd.f32 %v343_v42, %v293_v38 }
 0x19d   :  { %v5612_v46 = vpop.f32.mrf.mxu1 }
 0x19e   :  { %v422_v48 = vpack.c.bf16 %v344_v45, %v341_v44  ;;  %v5908_v46 = vld [vmem:[%s7379_s6 + $0x10] ss:$8 sps:$4 sm:$0xff]  }
 0x1a0   :  { %5616 = vmatmul.mubr.msk.bf16.vlgmr.msra.gmra.mxu0 %vm188_vm3, %v347_v47  ;;  %5620 = vmatpush3.bf16.msra.mxu1 %v422_v48  ;;  %v5913_v47 = vld [vmem:[%s7379_s6 + $0x4] ss:$8 sps:$4 sm:$0xff]   ;;  %v5911_v48 = vld [vmem:[%s7379_s6] ss:$8 sps:$4 sm:$0xff]  }
 0x1a1   :  { %5629 = vmatprep.mubr.msk.bf16.mxu0 %vm6207_vm1, %v6206_v1  ;;  %5626 = vmatpush3.bf16.msra.mxu0 %v5906_v11 }
 0x1a2   :  { %5627 = vmatprep.subr.bf16.mxu0 %v6206_v1 }
 0x1a5   :  { %5628 = vmatpush3.bf16.msra.mxu0 %v5907_v14 }
 0x260   :  { %v389_v49 = vpop.f32.mrf.mxu0 }
 0x261   :  { %v396_v50 = vmul.f32 0.17677669, %v389_v49  ;;  %v6208_v49 = vmov 0  }
 0x262   :  { %v5617_v51 = vpop.f32.mrf.mxu0 }
 0x263   :  { %v399_v52 = vsel %vm398_vm4, %v396_v50, -inf  ;;  %v5915_v51 = vld [vmem:[%s7380_s7 + $0x38] sm:$0xff]  }
 0x264   :  { %400 = vmax.xlane.f32.xlu0 %v399_v52  ;;  %v392_v53 = vpop.f32.mrf.mxu0  ;;  %v5916_v52 = vld [vmem:[%s7380_s7 + $0x70] sm:$0xff]  }
 0x265   :  { %v397_v54 = vmul.f32 0.17677669, %v392_v53  ;;  %v5917_v53 = vld [vmem:[%s7380_s7 + $0x30] sm:$0xff]  }
 0x266   :  { %v5618_v55 = vpop.f32.mrf.mxu0 }
 0x267   :  { %v402_v56 = vsel %vm398_vm4, %v397_v54, -inf  ;;  %v5919_v55 = vld [vmem:[%s7380_s7 + $0x28] sm:$0xff]  }
 0x268   :  { %403 = vmax.xlane.f32.xlu0 %v402_v56  ;;  %v5920_v56 = vld [vmem:[%s7380_s7 + $0x60] sm:$0xff]  }
 0x2ed   :  { %v401_v57 = vpop.xlane.xlu0 %400 }
 0x2ee   :  { %v405_v58 = vsub.f32 %v396_v50, %v401_v57  ;;  %v5914_v50 = vld [vmem:[%s7380_s7 + $0x78] sm:$0xff]   ;;  %v5921_v57 = vld [vmem:[%s7380_s7 + $0x20] sm:$0xff]  }
 0x2ef   :  { %5356 = vmatprep.subr.bf16.mxu0 %v5914_v50 }
 0x2f0   :  { %v407_v59 = vmul.f32 1.442695, %v405_v58  ;;  %v5922_v58 = vld [vmem:[%s7380_s7 + $0x58] sm:$0xff]  }
 0x2f1   :  { %v404_v60 = vpop.xlane.xlu0 %403 }
 0x2f2   :  { %6087 = vpow2.f32 %v407_v59  ;;  %v406_v61 = vsub.f32 %v397_v54, %v404_v60  ;;  %v5918_v54 = vld [vmem:[%s7380_s7 + $0x68] sm:$0xff]   ;;  %v5923_v59 = vld [vmem:[%s7380_s7 + $0x18] sm:$0xff]  }
 0x2f4   :  { %v409_v62 = vmul.f32 1.442695, %v406_v61 }
 0x2f6   :  { %6089 = vpow2.f32 %v409_v62 }
 0x2ff   :  { %v6088_v63 = vpop.eup %6087 }
 0x300   :  { %v411_v0 = vsel %vm398_vm4, %v6088_v63, 0.0 }
 0x301   :  { %412 = vadd.xlane.f32.xlu1 %v411_v0 }
 0x303   :  { %v6090_v2 = vpop.eup %6089 }
 0x304   :  { %v414_v3 = vsel %vm398_vm4, %v6090_v2, 0.0 }
 0x305   :  { %415 = vadd.xlane.f32.xlu1 %v414_v3  ;;  %v6438_v3 = vsub.s32 4, %v6342_v19 }
 0x38a   :  { %v413_v4 = vpop.xlane.xlu1 %412 }
 0x38b   :  { %6091 = vrcp.f32 %v413_v4 }
 0x38e   :  { %v416_v5 = vpop.xlane.xlu1 %415 }
 0x38f   :  { %6093 = vrcp.f32 %v416_v5 }
 0x398   :  { %v6092_v6 = vpop.eup %6091 }
 0x399   :  { %v419_v8 = vmul.f32 %v6092_v6, %v6088_v63  ;;  %v560_v6 = vrot.slane %v6350_v21, %v6438_v3 }
 0x39c   :  { %v6094_v7 = vpop.eup %6093 }
 0x39d   :  { %v420_v9 = vmul.f32 %v6094_v7, %v6090_v2  ;;  %v6443_v7 = vsub.s32 5, %v6342_v19 }
 0x39f   :  { %v421_v10 = vpack.c.bf16 %v420_v9, %v419_v8  ;;  %v566_v11 = vrot.slane %v6350_v21, %v6443_v7 }
 0x3a1   :  { %5622 = vmatmul.mubr.msk.bf16.vlgmr.msra.gmra.mxu1 %vm398_vm4, %v421_v10 }
 0x3a2   :  { %636 = vmatprep.mubr.bf16.mxu1 %v6208_v49 }
 0x461   :  { %v460_v15 = vpop.f32.mrf.mxu1 }
 0x463   :  { %v5623_v16 = vpop.f32.mrf.mxu1 }
 0x465   :  { %v463_v17 = vpop.f32.mrf.mxu1 }
 0x466   :  { %v467_v18 = vpack.c.bf16 %v463_v17, %v460_v15 }
 0x467   :  { %v5624_v22 = vpop.f32.mrf.mxu1 }
 0x468   :  { %5630 = vmatmul.mubr.msk.bf16.vlgmr.msra.gmra.mxu0 %vm188_vm3, %v467_v18  ;;  %v5924_v18 = vld [vmem:[%s7380_s7 + $0x50] sm:$0xff]  }
 0x469   :  { %5357 = vmatpush3.bf16.msra.mxu0 %v5915_v51  ;;  %v5925_v22 = vld [vmem:[%s7380_s7 + $0x10] sm:$0xff]  }
 0x46a   :  { %5358 = vmatprep.subr.bf16.mxu0 %v5916_v52 }
 0x46d   :  { %5359 = vmatpush3.bf16.msra.mxu0 %v5917_v53 }
 0x46e   :  { %5360 = vmatprep.subr.bf16.mxu0 %v5918_v54 }
 0x471   :  { %5361 = vmatpush3.bf16.msra.mxu0 %v5919_v55 }
 0x472   :  { %5362 = vmatprep.subr.bf16.mxu0 %v5920_v56 }
 0x475   :  { %5363 = vmatpush3.bf16.msra.mxu0 %v5921_v57 }
 0x476   :  { %5364 = vmatprep.subr.bf16.mxu0 %v5922_v58 }
 0x479   :  { %5365 = vmatpush3.bf16.msra.mxu0 %v5923_v59 }
 0x47a   :  { %5366 = vmatprep.subr.bf16.mxu0 %v5924_v18 }
 0x47d   :  { %5367 = vmatpush3.bf16.msra.mxu0 %v5925_v22  ;;  %v6494_v22 = vsub.s32 7, %v6342_v19 }
 0x528   :  { %v521_v25 = vpop.f32.mrf.mxu0 }
 0x529   :  { %v522_v26 = vadd.f32 %v521_v25, %v471_v24  ;;  %v5927_v25 = vld [vmem:[%s7380_s7 + $0x8] sm:$0xff]  }
 0x52a   :  { %v5631_v27 = vpop.f32.mrf.mxu0 }
 0x52b   :  { %v528_v28 = vadd.f32 %v522_v26, %v6319_v12  ;;  %v5928_v26 = vld [vmem:[%s7380_s7 + $0x40] sm:$0xff]  }
 0x52c   :  { %v524_v30 = vpop.f32.mrf.mxu0  ;;  %v5929_v27 = vld [vmem:[%s7380_s7] sm:$0xff]  }
 0x52d   :  { %v525_v31 = vadd.f32 %v524_v30, %v471_v24  ;;  %v530_v33 = vsel %vm188_vm3, %v528_v28, 0.0  ;;  %v5926_v24 = vld [vmem:[%s7380_s7 + $0x48] sm:$0xff]  }
 0x52e   :  { %531 = vadd.xlane.f32.xlu0 %v530_v33  ;;  %v5632_v34 = vpop.f32.mrf.mxu0  ;;  %5368 = vmatprep.subr.bf16.mxu0 %v5926_v24 }
 0x52f   :  { %v529_v35 = vadd.f32 %v525_v31, %v6321_v13  ;;  %v5910_v13 = vld [vmem:[%s7379_s6 + $0x14] ss:$8 sps:$4 sm:$0xff]   ;;  %5369 = vmatpush3.bf16.msra.mxu0 %v5927_v25 }
 0x530   :  { %616 = vmatprep.subr.bf16.mxu1 %v5910_v13  ;;  %5370 = vmatprep.subr.bf16.mxu0 %v5928_v26  ;;  %v6477_v13 = vsub.s32 6, %v6342_v19  ;;  %v825_v26 = vrot.slane %v6350_v21, %v6494_v22  ;;  %v5932_v19 = vld [vmem:[%s7378_s5 + $0x58] sm:$0xff]  }
 0x531   :  { %v533_v36 = vsel %vm188_vm3, %v529_v35, 0.0  ;;  %617 = vmatpush1.bf16.msra.mxu1 %v5908_v46 }
 0x532   :  { %534 = vadd.xlane.f32.xlu1 %v533_v36  ;;  %618 = vmatprep.subr.bf16.mxu1 %v5913_v47  ;;  %v656_v47 = vrot.slane %v6350_v21, %v6477_v13  ;;  %v5933_v21 = vld [vmem:[%s7378_s5 + $0x50] sm:$0xff]  }
 0x533   :  { %5371 = vmatpush3.bf16.msra.mxu0 %v5929_v27 }
 0x534   :  { %5663 = vmatprep.subr.bf16.mxu0 %v6206_v1 }
 0x535   :  { %619 = vmatpush1.bf16.msra.mxu1 %v5911_v48 }
 0x536   :  { %5633 = vmatprep.subr.bf16.mxu1 %v6206_v1 }
 0x5b7   :  { %v532_v37 = vpop.xlane.xlu0 %531 }
 0x5b8   :  { %v537_v38 = vmul.f32 0.03125, %v532_v37 }
 0x5ba   :  { %v539_v39 = vsub.f32 %v528_v28, %v537_v38  ;;  %v170_v28 = vld [vmem:[%s7382_s9] ss:$8 sm:$0x3] }
 0x5bb   :  { %v535_v40 = vpop.xlane.xlu1 %534  ;;  %v578_v31 = vrot.slane %v170_v28, %v6345_v20  ;;  %v574_v33 = vrot.slane %v170_v28, %v6355_v29 }
 0x5bc   :  { %v538_v41 = vmul.f32 0.03125, %v535_v40  ;;  %v541_v42 = vmul.f32 %v539_v39, %v539_v39 }
 0x5be   :  { %v540_v43 = vsub.f32 %v529_v35, %v538_v41  ;;  %v543_v12 = vsel %vm188_vm3, %v541_v42, 0.0 }
 0x5bf   :  { %544 = vadd.xlane.f32.xlu0 %v543_v12 }
 0x5c0   :  { %v542_v44 = vmul.f32 %v540_v43, %v540_v43 }
 0x5c2   :  { %v546_v45 = vsel %vm188_vm3, %v542_v44, 0.0 }
 0x5c3   :  { %547 = vadd.xlane.f32.xlu1 %v546_v45 }
 0x648   :  { %v545_v60 = vpop.xlane.xlu0 %544 }
 0x649   :  { %v549_v61 = vmul.f32 0.03125, %v545_v60 }
 0x64b   :  { %v551_v62 = vadd.f32 1e-05, %v549_v61 }
 0x64c   :  { %v548_v63 = vpop.xlane.xlu1 %547 }
 0x64d   :  { %6095 = vrsqrt.f32 %v551_v62  ;;  %v550_v0 = vmul.f32 0.03125, %v548_v63 }
 0x64f   :  { %v552_v2 = vadd.f32 1e-05, %v550_v0 }
 0x651   :  { %6097 = vrsqrt.f32 %v552_v2 }
 0x65a   :  { %v6096_v4 = vpop.eup %6095 }
 0x65b   :  { %v555_v5 = vmul.f32 %v6096_v4, %v539_v39 }
 0x65d   :  { %v561_v10 = vmul.f32 %v560_v6, %v555_v5 }
 0x65e   :  { %v6098_v8 = vpop.eup %6097 }
 0x65f   :  { %v556_v9 = vmul.f32 %v6098_v8, %v540_v43  ;;  %v567_v15 = vadd.f32 %v566_v11, %v561_v10  ;;  %v5931_v10 = vld [vmem:[%s7378_s5 + $0x40] sm:$0xff]  }
 0x661   :  { %v562_v14 = vmul.f32 %v560_v6, %v556_v9  ;;  %v5930_v9 = vld [vmem:[%s7378_s5 + $0x48] sm:$0xff]  }
 0x663   :  { %v568_v16 = vadd.f32 %v566_v11, %v562_v14 }
 0x665   :  { %v569_v17 = vpack.c.bf16 %v568_v16, %v567_v15 }
 0x667   :  { %4845 = vmatmul.mubr.msk.bf16.vlgmr.msra.gmra.mxu1 %vm188_vm3, %v569_v17 }
 0x668   :  { %5637 = vmatprep.mubr.msk.bf16.mxu1 %vm6207_vm1, %v6206_v1  ;;  %5634 = vmatpush3.bf16.msra.mxu1 %v5930_v9 }
 0x669   :  { %5635 = vmatprep.subr.bf16.mxu1 %v6206_v1 }
 0x66c   :  { %5636 = vmatpush3.bf16.msra.mxu1 %v5931_v10 }
 0x66d   :  { %5641 = vmatprep.subr.bf16.mxu1 %v6206_v1 }
 0x727   :  { %v638_v30 = vpop.f32.mrf.mxu1 }
 0x728   :  { %v639_v38 = vadd.f32 %v638_v30, %v574_v33 }
 0x729   :  { %v640_v34 = vpop.f32.mrf.mxu1 }
 0x72a   :  { %v641_v36 = vadd.f32 %v640_v34, %v578_v31  ;;  %v647_v12 = vmax.f32 %v639_v38, 0.0  ;;  %v5935_v38 = vld [vmem:[%s7378_s5 + $0x60] sm:$0xff]  }
 0x72b   :  { %v642_v35 = vpop.f32.mrf.mxu1 }
 0x72c   :  { %v643_v37 = vadd.f32 %v642_v35, %v574_v33  ;;  %v648_v42 = vmax.f32 %v641_v36, 0.0 }
 0x72d   :  { %v644_v39 = vpop.f32.mrf.mxu1 }
 0x72e   :  { %v645_v40 = vadd.f32 %v644_v39, %v578_v31  ;;  %v649_v41 = vmax.f32 %v643_v37, 0.0  ;;  %v4862_v31 = vld [vmem:[%s7381_s8 + $0x8] ss:$0 sm:$0xff] }
 0x72f   :  { %v5934_v37 = vld [vmem:[%s7378_s5 + $0x68] sm:$0xff]  }
 0x730   :  { %v650_v43 = vmax.f32 %v645_v40, 0.0  ;;  %v651_v45 = vpack.c.bf16 %v649_v41, %v647_v12 }
 0x732   :  { %v652_v44 = vpack.c.bf16 %v650_v43, %v648_v42  ;;  %v6535_v43 = vld [vmem:[%s7381_s8 + $0x10] sm:$0xff] }
 0x734   :  { %785 = vmatprep.mubr.bf16.mxu0 %v652_v44  ;;  %v961_v44 = vrot.slane %v6535_v43, %v6345_v20 }
 0x735   :  { %786 = vmatmul.mubr.bf16.vlgmr.msra.gmra.mxu0 %v651_v45 }
 0x736   :  { %5665 = vmatprep.mubr.msk.bf16.mxu0 %vm6207_vm1, %v6206_v1 }
 0x7f5   :  { %v5372_v46 = vpop.f32.mrf.mxu0 }
 0x7f7   :  { %v5373_v48 = vpop.f32.mrf.mxu0 }
 0x7f8   :  { %v5374_v50 = vadd.f32 %v5373_v48, %v5372_v46 }
 0x7f9   :  { %v5375_v51 = vpop.f32.mrf.mxu0 }
 0x7fa   :  { %v788_v52 = vadd.f32 %v5374_v50, %v656_v47 }
 0x7fb   :  { %v5376_v53 = vpop.f32.mrf.mxu0 }
 0x7fc   :  { %v5377_v54 = vadd.f32 %v5376_v53, %v5375_v51  ;;  %v794_v55 = vadd.f32 %v788_v52, %v567_v15  ;;  %v901_v53 = vrot.slane %v6535_v43, %v6355_v29 }
 0x7fe   :  { %v791_v56 = vadd.f32 %v5377_v54, %v656_v47  ;;  %v796_v57 = vsel %vm188_vm3, %v794_v55, 0.0  ;;  %v1018_v54 = vrot.slane %v6535_v43, %v6358_v32 }
 0x7ff   :  { %797 = vadd.xlane.f32.xlu0 %v796_v57 }
 0x800   :  { %v795_v58 = vadd.f32 %v791_v56, %v568_v16 }
 0x802   :  { %v799_v59 = vsel %vm188_vm3, %v795_v58, 0.0 }
 0x803   :  { %800 = vadd.xlane.f32.xlu1 %v799_v59 }
 0x888   :  { %v798_v60 = vpop.xlane.xlu0 %797 }
 0x889   :  { %v802_v61 = vmul.f32 0.03125, %v798_v60 }
 0x88b   :  { %v804_v62 = vsub.f32 %v794_v55, %v802_v61 }
 0x88c   :  { %v801_v63 = vpop.xlane.xlu1 %800 }
 0x88d   :  { %v803_v0 = vmul.f32 0.03125, %v801_v63  ;;  %v806_v2 = vmul.f32 %v804_v62, %v804_v62 }
 0x88f   :  { %v805_v4 = vsub.f32 %v795_v58, %v803_v0  ;;  %v808_v5 = vsel %vm188_vm3, %v806_v2, 0.0 }
 0x890   :  { %809 = vadd.xlane.f32.xlu0 %v808_v5 }
 0x891   :  { %v807_v6 = vmul.f32 %v805_v4, %v805_v4 }
 0x893   :  { %v811_v8 = vsel %vm188_vm3, %v807_v6, 0.0 }
 0x894   :  { %812 = vadd.xlane.f32.xlu1 %v811_v8 }
 0x919   :  { %v810_v11 = vpop.xlane.xlu0 %809 }
 0x91a   :  { %v814_v14 = vmul.f32 0.03125, %v810_v11 }
 0x91c   :  { %v816_v15 = vadd.f32 1e-05, %v814_v14 }
 0x91d   :  { %v813_v16 = vpop.xlane.xlu1 %812 }
 0x91e   :  { %6099 = vrsqrt.f32 %v816_v15  ;;  %v815_v17 = vmul.f32 0.03125, %v813_v16 }
 0x920   :  { %v817_v18 = vadd.f32 1e-05, %v815_v17 }
 0x922   :  { %6101 = vrsqrt.f32 %v817_v18 }
 0x92b   :  { %v6100_v24 = vpop.eup %6099 }
 0x92c   :  { %v820_v25 = vmul.f32 %v6100_v24, %v804_v62 }
 0x92e   :  { %v826_v30 = vmul.f32 %v825_v26, %v820_v25 }
 0x92f   :  { %v6102_v27 = vpop.eup %6101 }
 0x930   :  { %v821_v28 = vmul.f32 %v6102_v27, %v805_v4  ;;  %v6501_v34 = vadd.f32 %v4862_v31, %v826_v30 }
 0x932   :  { %v827_v33 = vmul.f32 %v825_v26, %v821_v28 }
 0x934   :  { %v6503_v35 = vadd.f32 %v4862_v31, %v827_v33 }
 0x936   :  { %v897_v36 = vpack.c.bf16 %v6503_v35, %v6501_v34 }
 0x938   :  { %5638 = vmatmul.mubr.msk.bf16.vlgmr.msra.gmra.mxu1 %vm188_vm3, %v897_v36 }
 0x939   :  { %5642 = vmatpush3.bf16.msra.mxu1 %v5932_v19  ;;  %5645 = vmatprep.mubr.msk.bf16.mxu1 %vm6207_vm1, %v6206_v1 }
 0x93a   :  { %5643 = vmatprep.subr.bf16.mxu1 %v6206_v1 }
 0x93d   :  { %5644 = vmatpush3.bf16.msra.mxu1 %v5933_v21 }
 0x93e   :  { %5649 = vmatprep.subr.bf16.mxu1 %v6206_v1 }
 0x940   :  { %5646 = vmatmul.mubr.msk.bf16.vlgmr.msra.gmra.mxu1 %vm188_vm3, %v897_v36 }
 0x941   :  { %5650 = vmatpush3.bf16.msra.mxu1 %v5934_v37  ;;  %5653 = vmatprep.mubr.msk.bf16.mxu1 %vm6207_vm1, %v6206_v1 }
 0x942   :  { %5651 = vmatprep.subr.bf16.mxu1 %v6206_v1 }
 0x945   :  { %5652 = vmatpush3.bf16.msra.mxu1 %v5935_v38  ;;  %v5936_v38 = vld [vmem:[%s7378_s5 + $0x78] sm:$0xff]  }
 0x946   :  { %5657 = vmatprep.subr.bf16.mxu1 %v6206_v1 }
 0x948   :  { %5654 = vmatmul.mubr.msk.bf16.vlgmr.msra.gmra.mxu1 %vm188_vm3, %v897_v36 }
 0x949   :  { %5659 = vmatprep.mubr.msk.bf16.mxu1 %vm6207_vm1, %v6206_v1 }
 0x9f8   :  { %v951_v39 = vpop.f32.mrf.mxu1 }
 0x9f9   :  { %v952_v59 = vadd.f32 %v951_v39, %v901_v53  ;;  %v5937_v39 = vld [vmem:[%s7378_s5 + $0x70] sm:$0xff]  }
 0x9fa   :  { %v5639_v40 = vpop.f32.mrf.mxu1 }
 0x9fc   :  { %v954_v41 = vpop.f32.mrf.mxu1 }
 0x9fd   :  { %v955_v57 = vadd.f32 %v954_v41, %v901_v53 }
 0x9fe   :  { %v5640_v42 = vpop.f32.mrf.mxu1 }
 0x9ff   :  { %v1072_v63 = vpack.c.bf16 %v955_v57, %v952_v59 }
 0xa00   :  { %v1008_v12 = vpop.f32.mrf.mxu1 }
 0xa01   :  { %v1009_v47 = vadd.f32 %v1008_v12, %v961_v44 }
 0xa02   :  { %v5647_v45 = vpop.f32.mrf.mxu1 }
 0xa03   :  { %v1195_v45 = vrot.slane %v6535_v43, %v6383_v23 }
 0xa04   :  { %v1011_v46 = vpop.f32.mrf.mxu1 }
 0xa05   :  { %v1012_v48 = vadd.f32 %v1011_v46, %v961_v44 }
 0xa06   :  { %v5648_v50 = vpop.f32.mrf.mxu1 }
 0xa07   :  { %v1073_v51 = vpack.c.bf16 %v1012_v48, %v1009_v47 }
 0xa08   :  { %v1065_v52 = vpop.f32.mrf.mxu1 }
 0xa09   :  { %v1078_v55 = vsel %vm188_vm3, %v1073_v51, 0  ;;  %v1066_v60 = vadd.f32 %v1065_v52, %v1018_v54 }
 0xa0a   :  { %v5655_v56 = vpop.f32.mrf.mxu1  ;;  %5658 = vmatpush3.bf16.xpose.msra.mxu1 %v1078_v55 }
 0xa0b   :  { %5669 = vmatprep.subr.bf16.mxu1 %v6206_v1 }
 0xa0c   :  { %v1068_v58 = vpop.f32.mrf.mxu1 }
 0xa0d   :  { %v1069_v61 = vadd.f32 %v1068_v58, %v1018_v54 }
 0xa0e   :  { %v5656_v62 = vpop.f32.mrf.mxu1 }
 0xa0f   :  { %v1146_v0 = vpack.c.bf16 %v1069_v61, %v1066_v60 }
 0xa11   :  { %5660 = vmatmul.mubr.msk.bf16.vlgmr.msra.gmra.mxu1 %vm188_vm3, %v1072_v63  ;;  %5664 = vmatpush3.bf16.msra.mxu0 %v1146_v0 }
 0xa12   :  { %5673 = vmatprep.mubr.msk.bf16.mxu1 %vm6207_vm1, %v6206_v1  ;;  %5670 = vmatpush3.bf16.msra.mxu1 %v5936_v38 }
 0xa13   :  { %5671 = vmatprep.subr.bf16.mxu1 %v6206_v1 }
 0xa16   :  { %5672 = vmatpush3.bf16.msra.mxu1 %v5937_v39  ;;  %v1289_v39 = vrot.slane %v6535_v43, %v6443_v7 }
 0xad1   :  { %v1114_v2 = vpop.f32.mrf.mxu1 }
 0xad2   :  { %v1121_v4 = vmul.f32 0.17677669, %v1114_v2 }
 0xad3   :  { %v5661_v5 = vpop.f32.mrf.mxu1 }
 0xad4   :  { %v1123_v6 = vsel %vm398_vm4, %v1121_v4, -inf  ;;  %v5943_v5 = vld [vmem:[%s7379_s6 + $0x24] ss:$8 sps:$4 sm:$0xff]  }
 0xad5   :  { %1124 = vmax.xlane.f32.xlu0 %v1123_v6  ;;  %v1117_v8 = vpop.f32.mrf.mxu1  ;;  %v5941_v6 = vld [vmem:[%s7379_s6 + $0x20] ss:$8 sps:$4 sm:$0xff]  }
 0xad6   :  { %v1122_v9 = vmul.f32 0.17677669, %v1117_v8  ;;  %v5944_v8 = vld [vmem:[%s7380_s7 + $0xf8] sm:$0xff]  }
 0xad7   :  { %v5662_v10 = vpop.f32.mrf.mxu1  ;;  %5394 = vmatprep.subr.bf16.mxu1 %v5944_v8 }
 0xad8   :  { %v1126_v11 = vsel %vm398_vm4, %v1122_v9, -inf  ;;  %v5946_v10 = vld [vmem:[%s7380_s7 + $0xf0] sm:$0xff]  }
 0xad9   :  { %1127 = vmax.xlane.f32.xlu1 %v1126_v11  ;;  %v5947_v11 = vld [vmem:[%s7380_s7 + $0xb0] sm:$0xff]  }
 0xb5e   :  { %v1125_v14 = vpop.xlane.xlu0 %1124 }
 0xb5f   :  { %v1129_v15 = vsub.f32 %v1121_v4, %v1125_v14  ;;  %v5938_v4 = vld [vmem:[%s7379_s6 + $0x30] ss:$8 sps:$4 sm:$0xff]   ;;  %v5948_v14 = vld [vmem:[%s7380_s7 + $0xe8] sm:$0xff]  }
 0xb61   :  { %v1131_v16 = vmul.f32 1.442695, %v1129_v15  ;;  %v5949_v15 = vld [vmem:[%s7380_s7 + $0xa8] sm:$0xff]  }
 0xb62   :  { %v1128_v17 = vpop.xlane.xlu1 %1127 }
 0xb63   :  { %6103 = vpow2.f32 %v1131_v16  ;;  %v1130_v18 = vsub.f32 %v1122_v9, %v1128_v17  ;;  %v5945_v9 = vld [vmem:[%s7380_s7 + $0xb8] sm:$0xff]   ;;  %v5950_v16 = vld [vmem:[%s7380_s7 + $0xe0] sm:$0xff]  }
 0xb64   :  { %v5951_v17 = vld [vmem:[%s7380_s7 + $0xa0] sm:$0xff]  }
 0xb65   :  { %v1133_v24 = vmul.f32 1.442695, %v1130_v18  ;;  %v5952_v18 = vld [vmem:[%s7380_s7 + $0xd8] sm:$0xff]  }
 0xb67   :  { %6105 = vpow2.f32 %v1133_v24  ;;  %v5953_v24 = vld [vmem:[%s7380_s7 + $0x98] sm:$0xff]  }
 0xb70   :  { %v6104_v25 = vpop.eup %6103 }
 0xb71   :  { %v1135_v26 = vsel %vm398_vm4, %v6104_v25, 0.0 }
 0xb72   :  { %1136 = vadd.xlane.f32.xlu0 %v1135_v26 }
 0xb74   :  { %v6106_v27 = vpop.eup %6105 }
 0xb75   :  { %v1138_v28 = vsel %vm398_vm4, %v6106_v27, 0.0 }
 0xb76   :  { %1139 = vadd.xlane.f32.xlu1 %v1138_v28 }
 0xbfb   :  { %v1137_v30 = vpop.xlane.xlu0 %1136 }
 0xbfc   :  { %6107 = vrcp.f32 %v1137_v30 }
 0xbff   :  { %v1140_v31 = vpop.xlane.xlu1 %1139 }
 0xc00   :  { %6109 = vrcp.f32 %v1140_v31 }
 0xc09   :  { %v6108_v33 = vpop.eup %6107 }
 0xc0a   :  { %v1143_v36 = vmul.f32 %v6108_v33, %v6104_v25 }
 0xc0d   :  { %v6110_v19 = vpop.eup %6109 }
 0xc0e   :  { %v1144_v21 = vmul.f32 %v6110_v19, %v6106_v27 }
 0xc10   :  { %v1145_v37 = vpack.c.bf16 %v1144_v21, %v1143_v36  ;;  %v1283_v36 = vrot.slane %v6535_v43, %v6438_v3 }
 0xc12   :  { %5666 = vmatmul.mubr.msk.bf16.vlgmr.msra.gmra.mxu0 %vm398_vm4, %v1145_v37 }
 0xc13   :  { %1359 = vmatprep.mubr.bf16.mxu0 %v6208_v49 }
 0xcd2   :  { %v1184_v40 = vpop.f32.mrf.mxu0 }
 0xcd4   :  { %v5667_v41 = vpop.f32.mrf.mxu0 }
 0xcd6   :  { %v1187_v42 = vpop.f32.mrf.mxu0 }
 0xcd7   :  { %v1191_v12 = vpack.c.bf16 %v1187_v42, %v1184_v40 }
 0xcd8   :  { %v5668_v44 = vpop.f32.mrf.mxu0 }
 0xcd9   :  { %5674 = vmatmul.mubr.msk.bf16.vlgmr.msra.gmra.mxu1 %vm188_vm3, %v1191_v12  ;;  %v5954_v44 = vld [vmem:[%s7380_s7 + $0xd0] sm:$0xff]  }
 0xcda   :  { %5395 = vmatpush3.bf16.msra.mxu1 %v5945_v9 }
 0xcdb   :  { %5396 = vmatprep.subr.bf16.mxu1 %v5946_v10 }
 0xcde   :  { %5397 = vmatpush3.bf16.msra.mxu1 %v5947_v11 }
 0xcdf   :  { %5398 = vmatprep.subr.bf16.mxu1 %v5948_v14 }
 0xce2   :  { %5399 = vmatpush3.bf16.msra.mxu1 %v5949_v15 }
 0xce3   :  { %5400 = vmatprep.subr.bf16.mxu1 %v5950_v16 }
 0xce6   :  { %5401 = vmatpush3.bf16.msra.mxu1 %v5951_v17 }
 0xce7   :  { %5402 = vmatprep.subr.bf16.mxu1 %v5952_v18 }
 0xcea   :  { %5403 = vmatpush3.bf16.msra.mxu1 %v5953_v24 }
 0xceb   :  { %5404 = vmatprep.subr.bf16.mxu1 %v5954_v44 }
 0xd99   :  { %v1245_v46 = vpop.f32.mrf.mxu1 }
 0xd9a   :  { %v1246_v47 = vadd.f32 %v1245_v46, %v1195_v45  ;;  %v5956_v46 = vld [vmem:[%s7380_s7 + $0xc8] sm:$0xff]  }
 0xd9b   :  { %v5675_v48 = vpop.f32.mrf.mxu1 }
 0xd9c   :  { %v1252_v50 = vadd.f32 %v1246_v47, %v6501_v34  ;;  %v5957_v47 = vld [vmem:[%s7380_s7 + $0x88] sm:$0xff]   ;;  %v5958_v48 = vld [vmem:[%s7380_s7 + $0xc0] sm:$0xff]  }
 0xd9d   :  { %v1248_v51 = vpop.f32.mrf.mxu1 }
 0xd9e   :  { %v1249_v52 = vadd.f32 %v1248_v51, %v1195_v45  ;;  %v1254_v53 = vsel %vm188_vm3, %v1252_v50, 0.0  ;;  %v5955_v45 = vld [vmem:[%s7380_s7 + $0x90] sm:$0xff]   ;;  %v4917_v51 = vld [vmem:[%s7382_s9 + $0x1] ss:$8 sm:$0x3] }
 0xd9f   :  { %1255 = vadd.xlane.f32.xlu0 %v1254_v53  ;;  %v5676_v54 = vpop.f32.mrf.mxu1  ;;  %5405 = vmatpush3.bf16.msra.mxu1 %v5955_v45  ;;  %v1301_v53 = vrot.slane %v4917_v51, %v6345_v20 }
 0xda0   :  { %v1253_v55 = vadd.f32 %v1249_v52, %v6503_v35  ;;  %v5940_v35 = vld [vmem:[%s7379_s6 + $0x34] ss:$8 sps:$4 sm:$0xff]   ;;  %5406 = vmatprep.subr.bf16.mxu1 %v5956_v46  ;;  %v1297_v54 = vrot.slane %v4917_v51, %v6355_v29 }
 0xda1   :  { %1339 = vmatprep.subr.bf16.mxu0 %v5940_v35 }
 0xda2   :  { %v1257_v56 = vsel %vm188_vm3, %v1253_v55, 0.0  ;;  %1340 = vmatpush1.bf16.msra.mxu0 %v5938_v4 }
 0xda3   :  { %1258 = vadd.xlane.f32.xlu1 %v1257_v56  ;;  %1341 = vmatprep.subr.bf16.mxu0 %v5943_v5  ;;  %v1379_v5 = vrot.slane %v6535_v43, %v6477_v13 }
 0xda4   :  { %5407 = vmatpush3.bf16.msra.mxu1 %v5957_v47  ;;  %v1548_v47 = vrot.slane %v6535_v43, %v6494_v22  ;;  %v5963_v43 = vld [vmem:[%s7378_s5 + $0x90] sm:$0xff]  }
 0xda5   :  { %5408 = vmatprep.subr.bf16.mxu1 %v5958_v48 }
 0xda6   :  { %1342 = vmatpush1.bf16.msra.mxu0 %v5941_v6 }
 0xda7   :  { %5677 = vmatprep.subr.bf16.mxu0 %v6206_v1 }
 0xe28   :  { %v1256_v57 = vpop.xlane.xlu0 %1255 }
 0xe29   :  { %v1260_v58 = vmul.f32 0.03125, %v1256_v57 }
 0xe2b   :  { %v1262_v59 = vsub.f32 %v1252_v50, %v1260_v58  ;;  %v5959_v50 = vld [vmem:[%s7380_s7 + $0x80] sm:$0xff]  }
 0xe2c   :  { %v1259_v60 = vpop.xlane.xlu1 %1258  ;;  %5409 = vmatpush3.bf16.msra.mxu1 %v5959_v50 }
 0xe2d   :  { %v1261_v61 = vmul.f32 0.03125, %v1259_v60  ;;  %v1264_v62 = vmul.f32 %v1262_v59, %v1262_v59  ;;  %5707 = vmatprep.subr.bf16.mxu1 %v6206_v1 }
 0xe2f   :  { %v1263_v63 = vsub.f32 %v1253_v55, %v1261_v61  ;;  %v1266_v34 = vsel %vm188_vm3, %v1264_v62, 0.0 }
 0xe30   :  { %1267 = vadd.xlane.f32.xlu0 %v1266_v34 }
 0xe31   :  { %v1265_v0 = vmul.f32 %v1263_v63, %v1263_v63 }
 0xe33   :  { %v1269_v2 = vsel %vm188_vm3, %v1265_v0, 0.0 }
 0xe34   :  { %1270 = vadd.xlane.f32.xlu1 %v1269_v2 }
 0xeb9   :  { %v1268_v25 = vpop.xlane.xlu0 %1267 }
 0xeba   :  { %v1272_v26 = vmul.f32 0.03125, %v1268_v25 }
 0xebc   :  { %v1274_v27 = vadd.f32 1e-05, %v1272_v26 }
 0xebd   :  { %v1271_v28 = vpop.xlane.xlu1 %1270 }
 0xebe   :  { %6111 = vrsqrt.f32 %v1274_v27  ;;  %v1273_v30 = vmul.f32 0.03125, %v1271_v28 }
 0xec0   :  { %v1275_v31 = vadd.f32 1e-05, %v1273_v30 }
 0xec2   :  { %6113 = vrsqrt.f32 %v1275_v31 }
 0xecb   :  { %v6112_v33 = vpop.eup %6111 }
 0xecc   :  { %v1278_v19 = vmul.f32 %v6112_v33, %v1262_v59 }
 0xece   :  { %v1284_v38 = vmul.f32 %v1283_v36, %v1278_v19 }
 0xecf   :  { %v6114_v21 = vpop.eup %6113 }
 0xed0   :  { %v1279_v37 = vmul.f32 %v6114_v21, %v1263_v63  ;;  %v1290_v41 = vadd.f32 %v1289_v39, %v1284_v38  ;;  %v5961_v38 = vld [vmem:[%s7378_s5 + $0x80] sm:$0xff]  }
 0xed2   :  { %v1285_v40 = vmul.f32 %v1283_v36, %v1279_v37  ;;  %v5960_v37 = vld [vmem:[%s7378_s5 + $0x88] sm:$0xff]  }
 0xed4   :  { %v1291_v42 = vadd.f32 %v1289_v39, %v1285_v40 }
 0xed6   :  { %v1292_v12 = vpack.c.bf16 %v1291_v42, %v1290_v41 }
 0xed8   :  { %4936 = vmatmul.mubr.msk.bf16.vlgmr.msra.gmra.mxu0 %vm188_vm3, %v1292_v12 }
 0xed9   :  { %5681 = vmatprep.mubr.msk.bf16.mxu0 %vm6207_vm1, %v6206_v1  ;;  %5678 = vmatpush3.bf16.msra.mxu0 %v5960_v37 }
 0xeda   :  { %5679 = vmatprep.subr.bf16.mxu0 %v6206_v1 }
 0xedd   :  { %5680 = vmatpush3.bf16.msra.mxu0 %v5961_v38 }
 0xede   :  { %5685 = vmatprep.subr.bf16.mxu0 %v6206_v1 }
 0xf98   :  { %v1361_v52 = vpop.f32.mrf.mxu0 }
 0xf99   :  { %v1362_v59 = vadd.f32 %v1361_v52, %v1297_v54  ;;  %v4953_v52 = vld [vmem:[%s7381_s8 + $0x18] ss:$0 sm:$0xff] }
 0xf9a   :  { %v1363_v55 = vpop.f32.mrf.mxu0 }
 0xf9b   :  { %v1364_v57 = vadd.f32 %v1363_v55, %v1301_v53  ;;  %v1370_v0 = vmax.f32 %v1362_v59, 0.0  ;;  %v5965_v59 = vld [vmem:[%s7378_s5 + $0xa0] sm:$0xff]  }
 0xf9c   :  { %v1365_v56 = vpop.f32.mrf.mxu0 }
 0xf9d   :  { %v1366_v58 = vadd.f32 %v1365_v56, %v1297_v54  ;;  %v1371_v63 = vmax.f32 %v1364_v57, 0.0  ;;  %v5962_v56 = vld [vmem:[%s7378_s5 + $0x98] sm:$0xff]  }
 0xf9e   :  { %v1367_v60 = vpop.f32.mrf.mxu0 }
 0xf9f   :  { %v1368_v61 = vadd.f32 %v1367_v60, %v1301_v53  ;;  %v1372_v62 = vmax.f32 %v1366_v58, 0.0  ;;  %v5964_v58 = vld [vmem:[%s7378_s5 + $0xa8] sm:$0xff]  }
 0xfa1   :  { %v1373_v34 = vmax.f32 %v1368_v61, 0.0  ;;  %v1374_v35 = vpack.c.bf16 %v1372_v62, %v1370_v0 }
 0xfa3   :  { %v1375_v2 = vpack.c.bf16 %v1373_v34, %v1371_v63  ;;  %v6699_v34 = vld [vmem:[%s7381_s8 + $0x20] sm:$0xff] }
 0xfa5   :  { %1508 = vmatprep.mubr.bf16.mxu1 %v1375_v2  ;;  %v1684_v2 = vrot.slane %v6699_v34, %v6345_v20 }
 0xfa6   :  { %1509 = vmatmul.mubr.bf16.vlgmr.msra.gmra.mxu1 %v1374_v35 }
 0xfa7   :  { %5709 = vmatprep.mubr.msk.bf16.mxu1 %vm6207_vm1, %v6206_v1 }
0x1066   :  { %v5410_v4 = vpop.f32.mrf.mxu1 }
0x1068   :  { %v5411_v6 = vpop.f32.mrf.mxu1 }
0x1069   :  { %v5412_v8 = vadd.f32 %v5411_v6, %v5410_v4 }
0x106a   :  { %v5413_v9 = vpop.f32.mrf.mxu1 }
0x106b   :  { %v1511_v10 = vadd.f32 %v5412_v8, %v1379_v5 }
0x106c   :  { %v5414_v11 = vpop.f32.mrf.mxu1 }
0x106d   :  { %v5415_v14 = vadd.f32 %v5414_v11, %v5413_v9  ;;  %v1517_v15 = vadd.f32 %v1511_v10, %v1290_v41  ;;  %v1624_v11 = vrot.slane %v6699_v34, %v6355_v29 }
0x106f   :  { %v1514_v16 = vadd.f32 %v5415_v14, %v1379_v5  ;;  %v1519_v17 = vsel %vm188_vm3, %v1517_v15, 0.0  ;;  %v1741_v14 = vrot.slane %v6699_v34, %v6358_v32 }
0x1070   :  { %1520 = vadd.xlane.f32.xlu0 %v1519_v17 }
0x1071   :  { %v1518_v18 = vadd.f32 %v1514_v16, %v1291_v42 }
0x1073   :  { %v1522_v24 = vsel %vm188_vm3, %v1518_v18, 0.0 }
0x1074   :  { %1523 = vadd.xlane.f32.xlu1 %v1522_v24 }
0x10f9   :  { %v1521_v25 = vpop.xlane.xlu0 %1520 }
0x10fa   :  { %v1525_v26 = vmul.f32 0.03125, %v1521_v25 }
0x10fc   :  { %v1527_v27 = vsub.f32 %v1517_v15, %v1525_v26 }
0x10fd   :  { %v1524_v28 = vpop.xlane.xlu1 %1523 }
0x10fe   :  { %v1526_v30 = vmul.f32 0.03125, %v1524_v28  ;;  %v1529_v31 = vmul.f32 %v1527_v27, %v1527_v27 }
0x1100   :  { %v1528_v33 = vsub.f32 %v1518_v18, %v1526_v30  ;;  %v1531_v19 = vsel %vm188_vm3, %v1529_v31, 0.0 }
0x1101   :  { %1532 = vadd.xlane.f32.xlu0 %v1531_v19 }
0x1102   :  { %v1530_v36 = vmul.f32 %v1528_v33, %v1528_v33 }
0x1104   :  { %v1534_v21 = vsel %vm188_vm3, %v1530_v36, 0.0 }
0x1105   :  { %1535 = vadd.xlane.f32.xlu1 %v1534_v21 }
0x118a   :  { %v1533_v39 = vpop.xlane.xlu0 %1532 }
0x118b   :  { %v1537_v40 = vmul.f32 0.03125, %v1533_v39 }
0x118d   :  { %v1539_v41 = vadd.f32 1e-05, %v1537_v40 }
0x118e   :  { %v1536_v42 = vpop.xlane.xlu1 %1535 }
0x118f   :  { %6115 = vrsqrt.f32 %v1539_v41  ;;  %v1538_v12 = vmul.f32 0.03125, %v1536_v42 }
0x1191   :  { %v1540_v44 = vadd.f32 1e-05, %v1538_v12 }
0x1193   :  { %6117 = vrsqrt.f32 %v1540_v44 }
0x119c   :  { %v6116_v45 = vpop.eup %6115 }
0x119d   :  { %v1543_v46 = vmul.f32 %v6116_v45, %v1527_v27 }
0x119f   :  { %v1549_v51 = vmul.f32 %v1548_v47, %v1543_v46 }
0x11a0   :  { %v6118_v48 = vpop.eup %6117 }
0x11a1   :  { %v1544_v50 = vmul.f32 %v6118_v48, %v1528_v33  ;;  %v6665_v54 = vadd.f32 %v4953_v52, %v1549_v51 }
0x11a3   :  { %v1550_v53 = vmul.f32 %v1548_v47, %v1544_v50 }
0x11a5   :  { %v6667_v55 = vadd.f32 %v4953_v52, %v1550_v53 }
0x11a7   :  { %v1620_v57 = vpack.c.bf16 %v6667_v55, %v6665_v54 }
0x11a9   :  { %5682 = vmatmul.mubr.msk.bf16.vlgmr.msra.gmra.mxu0 %vm188_vm3, %v1620_v57 }
0x11aa   :  { %5686 = vmatpush3.bf16.msra.mxu0 %v5962_v56  ;;  %5689 = vmatprep.mubr.msk.bf16.mxu0 %vm6207_vm1, %v6206_v1 }
0x11ab   :  { %5687 = vmatprep.subr.bf16.mxu0 %v6206_v1 }
0x11ae   :  { %5688 = vmatpush3.bf16.msra.mxu0 %v5963_v43 }
0x11af   :  { %5693 = vmatprep.subr.bf16.mxu0 %v6206_v1 }
0x11b1   :  { %5690 = vmatmul.mubr.msk.bf16.vlgmr.msra.gmra.mxu0 %vm188_vm3, %v1620_v57 }
0x11b2   :  { %5694 = vmatpush3.bf16.msra.mxu0 %v5964_v58  ;;  %5697 = vmatprep.mubr.msk.bf16.mxu0 %vm6207_vm1, %v6206_v1 }
0x11b3   :  { %5695 = vmatprep.subr.bf16.mxu0 %v6206_v1 }
0x11b6   :  { %5696 = vmatpush3.bf16.msra.mxu0 %v5965_v59  ;;  %v5966_v59 = vld [vmem:[%s7378_s5 + $0xb8] sm:$0xff]  }
0x11b7   :  { %5701 = vmatprep.subr.bf16.mxu0 %v6206_v1 }
0x11b9   :  { %5698 = vmatmul.mubr.msk.bf16.vlgmr.msra.gmra.mxu0 %vm188_vm3, %v1620_v57 }
0x11ba   :  { %5703 = vmatprep.mubr.msk.bf16.mxu0 %vm6207_vm1, %v6206_v1 }
0x1269   :  { %v1674_v60 = vpop.f32.mrf.mxu0 }
0x126a   :  { %v1675_v24 = vadd.f32 %v1674_v60, %v1624_v11  ;;  %v5967_v60 = vld [vmem:[%s7378_s5 + $0xb0] sm:$0xff]  }
0x126b   :  { %v5683_v61 = vpop.f32.mrf.mxu0 }
0x126d   :  { %v1677_v62 = vpop.f32.mrf.mxu0 }
0x126e   :  { %v1678_v17 = vadd.f32 %v1677_v62, %v1624_v11 }
0x126f   :  { %v5684_v63 = vpop.f32.mrf.mxu0 }
0x1270   :  { %v1795_v28 = vpack.c.bf16 %v1678_v17, %v1675_v24 }
0x1271   :  { %v1731_v0 = vpop.f32.mrf.mxu0 }
0x1272   :  { %v1732_v5 = vadd.f32 %v1731_v0, %v1684_v2 }
0x1273   :  { %v5691_v35 = vpop.f32.mrf.mxu0 }
0x1274   :  { %v1918_v35 = vrot.slane %v6699_v34, %v6383_v23 }
0x1275   :  { %v1734_v4 = vpop.f32.mrf.mxu0 }
0x1276   :  { %v1735_v6 = vadd.f32 %v1734_v4, %v1684_v2 }
0x1277   :  { %v5692_v8 = vpop.f32.mrf.mxu0 }
0x1278   :  { %v1796_v9 = vpack.c.bf16 %v1735_v6, %v1732_v5 }
0x1279   :  { %v1788_v10 = vpop.f32.mrf.mxu0 }
0x127a   :  { %v1801_v15 = vsel %vm188_vm3, %v1796_v9, 0  ;;  %v1789_v25 = vadd.f32 %v1788_v10, %v1741_v14 }
0x127b   :  { %v5699_v16 = vpop.f32.mrf.mxu0  ;;  %5702 = vmatpush3.bf16.xpose.msra.mxu0 %v1801_v15 }
0x127c   :  { %5713 = vmatprep.subr.bf16.mxu0 %v6206_v1 }
0x127d   :  { %v1791_v18 = vpop.f32.mrf.mxu0 }
0x127e   :  { %v1792_v26 = vadd.f32 %v1791_v18, %v1741_v14 }
0x127f   :  { %v5700_v27 = vpop.f32.mrf.mxu0 }
0x1280   :  { %v1869_v30 = vpack.c.bf16 %v1792_v26, %v1789_v25 }
0x1282   :  { %5704 = vmatmul.mubr.msk.bf16.vlgmr.msra.gmra.mxu0 %vm188_vm3, %v1795_v28  ;;  %5708 = vmatpush3.bf16.msra.mxu1 %v1869_v30 }
0x1283   :  { %5717 = vmatprep.mubr.msk.bf16.mxu0 %vm6207_vm1, %v6206_v1  ;;  %5714 = vmatpush3.bf16.msra.mxu0 %v5966_v59 }
0x1284   :  { %5715 = vmatprep.subr.bf16.mxu0 %v6206_v1 }
0x1287   :  { %5716 = vmatpush3.bf16.msra.mxu0 %v5967_v60  ;;  %v2012_v60 = vrot.slane %v6699_v34, %v6443_v7 }
0x1342   :  { %v1837_v31 = vpop.f32.mrf.mxu0 }
0x1343   :  { %v1844_v33 = vmul.f32 0.17677669, %v1837_v31 }
0x1344   :  { %v5705_v19 = vpop.f32.mrf.mxu0 }
0x1345   :  { %v1846_v36 = vsel %vm398_vm4, %v1844_v33, -inf  ;;  %v5973_v19 = vld [vmem:[%s7379_s6 + $0x44] ss:$8 sps:$4 sm:$0xff]  }
0x1346   :  { %1847 = vmax.xlane.f32.xlu0 %v1846_v36  ;;  %v1840_v21 = vpop.f32.mrf.mxu0  ;;  %v5971_v36 = vld [vmem:[%s7379_s6 + $0x40] ss:$8 sps:$4 sm:$0xff]  }
0x1347   :  { %v1845_v37 = vmul.f32 0.17677669, %v1840_v21  ;;  %v5974_v21 = vld [vmem:[%s7380_s7 + $0x178] sm:$0xff]  }
0x1348   :  { %v5706_v38 = vpop.f32.mrf.mxu0  ;;  %5432 = vmatprep.subr.bf16.mxu0 %v5974_v21 }
0x1349   :  { %v1849_v39 = vsel %vm398_vm4, %v1845_v37, -inf  ;;  %v5976_v38 = vld [vmem:[%s7380_s7 + $0x170] sm:$0xff]  }
0x134a   :  { %1850 = vmax.xlane.f32.xlu1 %v1849_v39  ;;  %v5977_v39 = vld [vmem:[%s7380_s7 + $0x130] sm:$0xff]  }
0x13cf   :  { %v1848_v40 = vpop.xlane.xlu0 %1847 }
0x13d0   :  { %v1852_v41 = vsub.f32 %v1844_v33, %v1848_v40  ;;  %v5968_v33 = vld [vmem:[%s7379_s6 + $0x50] ss:$8 sps:$4 sm:$0xff]   ;;  %v5978_v40 = vld [vmem:[%s7380_s7 + $0x168] sm:$0xff]  }
0x13d2   :  { %v1854_v42 = vmul.f32 1.442695, %v1852_v41  ;;  %v5979_v41 = vld [vmem:[%s7380_s7 + $0x128] sm:$0xff]  }
0x13d3   :  { %v1851_v12 = vpop.xlane.xlu1 %1850 }
0x13d4   :  { %6119 = vpow2.f32 %v1854_v42  ;;  %v1853_v44 = vsub.f32 %v1845_v37, %v1851_v12  ;;  %v5975_v37 = vld [vmem:[%s7380_s7 + $0x138] sm:$0xff]   ;;  %v5980_v42 = vld [vmem:[%s7380_s7 + $0x160] sm:$0xff]  }
0x13d5   :  { %v5981_v12 = vld [vmem:[%s7380_s7 + $0x120] sm:$0xff]  }
0x13d6   :  { %v1856_v45 = vmul.f32 1.442695, %v1853_v44  ;;  %v5982_v44 = vld [vmem:[%s7380_s7 + $0x158] sm:$0xff]  }
0x13d8   :  { %6121 = vpow2.f32 %v1856_v45  ;;  %v5983_v45 = vld [vmem:[%s7380_s7 + $0x118] sm:$0xff]  }
0x13e1   :  { %v6120_v46 = vpop.eup %6119 }
0x13e2   :  { %v1858_v47 = vsel %vm398_vm4, %v6120_v46, 0.0 }
0x13e3   :  { %1859 = vadd.xlane.f32.xlu0 %v1858_v47 }
0x13e5   :  { %v6122_v48 = vpop.eup %6121 }
0x13e6   :  { %v1861_v50 = vsel %vm398_vm4, %v6122_v48, 0.0 }
0x13e7   :  { %1862 = vadd.xlane.f32.xlu1 %v1861_v50 }
0x146c   :  { %v1860_v51 = vpop.xlane.xlu0 %1859 }
0x146d   :  { %6123 = vrcp.f32 %v1860_v51 }
0x1470   :  { %v1863_v52 = vpop.xlane.xlu1 %1862 }
0x1471   :  { %6125 = vrcp.f32 %v1863_v52 }
0x147a   :  { %v6124_v53 = vpop.eup %6123 }
0x147b   :  { %v1866_v57 = vmul.f32 %v6124_v53, %v6120_v46 }
0x147e   :  { %v6126_v56 = vpop.eup %6125 }
0x147f   :  { %v1867_v43 = vmul.f32 %v6126_v56, %v6122_v48 }
0x1481   :  { %v1868_v58 = vpack.c.bf16 %v1867_v43, %v1866_v57  ;;  %v2006_v57 = vrot.slane %v6699_v34, %v6438_v3 }
0x1483   :  { %5710 = vmatmul.mubr.msk.bf16.vlgmr.msra.gmra.mxu1 %vm398_vm4, %v1868_v58 }
0x1484   :  { %2082 = vmatprep.mubr.bf16.mxu1 %v6208_v49 }
0x1543   :  { %v1907_v61 = vpop.f32.mrf.mxu1 }
0x1545   :  { %v5711_v62 = vpop.f32.mrf.mxu1 }
0x1547   :  { %v1910_v63 = vpop.f32.mrf.mxu1 }
0x1548   :  { %v1914_v0 = vpack.c.bf16 %v1910_v63, %v1907_v61 }
0x1549   :  { %v5712_v2 = vpop.f32.mrf.mxu1 }
0x154a   :  { %5718 = vmatmul.mubr.msk.bf16.vlgmr.msra.gmra.mxu0 %vm188_vm3, %v1914_v0  ;;  %v5984_v2 = vld [vmem:[%s7380_s7 + $0x150] sm:$0xff]  }
0x154b   :  { %5433 = vmatpush3.bf16.msra.mxu0 %v5975_v37 }
0x154c   :  { %5434 = vmatprep.subr.bf16.mxu0 %v5976_v38 }
0x154f   :  { %5435 = vmatpush3.bf16.msra.mxu0 %v5977_v39 }
0x1550   :  { %5436 = vmatprep.subr.bf16.mxu0 %v5978_v40 }
0x1553   :  { %5437 = vmatpush3.bf16.msra.mxu0 %v5979_v41 }
0x1554   :  { %5438 = vmatprep.subr.bf16.mxu0 %v5980_v42 }
0x1557   :  { %5439 = vmatpush3.bf16.msra.mxu0 %v5981_v12 }
0x1558   :  { %5440 = vmatprep.subr.bf16.mxu0 %v5982_v44 }
0x155b   :  { %5441 = vmatpush3.bf16.msra.mxu0 %v5983_v45 }
0x155c   :  { %5442 = vmatprep.subr.bf16.mxu0 %v5984_v2 }
0x160a   :  { %v1968_v4 = vpop.f32.mrf.mxu0 }
0x160b   :  { %v1969_v5 = vadd.f32 %v1968_v4, %v1918_v35  ;;  %v5986_v4 = vld [vmem:[%s7380_s7 + $0x148] sm:$0xff]  }
0x160c   :  { %v5719_v6 = vpop.f32.mrf.mxu0 }
0x160d   :  { %v1975_v8 = vadd.f32 %v1969_v5, %v6665_v54  ;;  %v5987_v5 = vld [vmem:[%s7380_s7 + $0x108] sm:$0xff]   ;;  %v5988_v6 = vld [vmem:[%s7380_s7 + $0x140] sm:$0xff]  }
0x160e   :  { %v1971_v9 = vpop.f32.mrf.mxu0 }
0x160f   :  { %v1972_v10 = vadd.f32 %v1971_v9, %v1918_v35  ;;  %v1977_v11 = vsel %vm188_vm3, %v1975_v8, 0.0  ;;  %v5985_v35 = vld [vmem:[%s7380_s7 + $0x110] sm:$0xff]   ;;  %v5008_v9 = vld [vmem:[%s7382_s9 + $0x2] ss:$8 sm:$0x3] }
0x1610   :  { %1978 = vadd.xlane.f32.xlu0 %v1977_v11  ;;  %v5720_v14 = vpop.f32.mrf.mxu0  ;;  %5443 = vmatpush3.bf16.msra.mxu0 %v5985_v35  ;;  %v2024_v11 = vrot.slane %v5008_v9, %v6345_v20 }
0x1611   :  { %v1976_v15 = vadd.f32 %v1972_v10, %v6667_v55  ;;  %v5970_v55 = vld [vmem:[%s7379_s6 + $0x54] ss:$8 sps:$4 sm:$0xff]   ;;  %5444 = vmatprep.subr.bf16.mxu0 %v5986_v4  ;;  %v2020_v14 = vrot.slane %v5008_v9, %v6355_v29 }
0x1612   :  { %2062 = vmatprep.subr.bf16.mxu1 %v5970_v55 }
0x1613   :  { %v1980_v16 = vsel %vm188_vm3, %v1976_v15, 0.0  ;;  %2063 = vmatpush1.bf16.msra.mxu1 %v5968_v33 }
0x1614   :  { %1981 = vadd.xlane.f32.xlu1 %v1980_v16  ;;  %2064 = vmatprep.subr.bf16.mxu1 %v5973_v19  ;;  %v2102_v19 = vrot.slane %v6699_v34, %v6477_v13 }
0x1615   :  { %5445 = vmatpush3.bf16.msra.mxu0 %v5987_v5  ;;  %v2271_v5 = vrot.slane %v6699_v34, %v6494_v22 }
0x1616   :  { %5446 = vmatprep.subr.bf16.mxu0 %v5988_v6 }
0x1617   :  { %2065 = vmatpush1.bf16.msra.mxu1 %v5971_v36 }
0x1618   :  { %5721 = vmatprep.subr.bf16.mxu1 %v6206_v1 }
0x1699   :  { %v1979_v17 = vpop.xlane.xlu0 %1978 }
0x169a   :  { %v1983_v18 = vmul.f32 0.03125, %v1979_v17 }
0x169c   :  { %v1985_v24 = vsub.f32 %v1975_v8, %v1983_v18  ;;  %v5989_v8 = vld [vmem:[%s7380_s7 + $0x100] sm:$0xff]  }
0x169d   :  { %v1982_v25 = vpop.xlane.xlu1 %1981  ;;  %5447 = vmatpush3.bf16.msra.mxu0 %v5989_v8 }
0x169e   :  { %v1984_v26 = vmul.f32 0.03125, %v1982_v25  ;;  %v1987_v27 = vmul.f32 %v1985_v24, %v1985_v24  ;;  %5751 = vmatprep.subr.bf16.mxu0 %v6206_v1 }
0x16a0   :  { %v1986_v28 = vsub.f32 %v1976_v15, %v1984_v26  ;;  %v1989_v54 = vsel %vm188_vm3, %v1987_v27, 0.0 }
0x16a1   :  { %1990 = vadd.xlane.f32.xlu0 %v1989_v54 }
0x16a2   :  { %v1988_v30 = vmul.f32 %v1986_v28, %v1986_v28 }
0x16a4   :  { %v1992_v31 = vsel %vm188_vm3, %v1988_v30, 0.0 }
0x16a5   :  { %1993 = vadd.xlane.f32.xlu1 %v1992_v31 }
0x172a   :  { %v1991_v46 = vpop.xlane.xlu0 %1990 }
0x172b   :  { %v1995_v47 = vmul.f32 0.03125, %v1991_v46 }
0x172d   :  { %v1997_v48 = vadd.f32 1e-05, %v1995_v47 }
0x172e   :  { %v1994_v50 = vpop.xlane.xlu1 %1993 }
0x172f   :  { %6127 = vrsqrt.f32 %v1997_v48  ;;  %v1996_v51 = vmul.f32 0.03125, %v1994_v50 }
0x1731   :  { %v1998_v52 = vadd.f32 1e-05, %v1996_v51 }
0x1733   :  { %6129 = vrsqrt.f32 %v1998_v52 }
0x173c   :  { %v6128_v53 = vpop.eup %6127 }
0x173d   :  { %v2001_v56 = vmul.f32 %v6128_v53, %v1985_v24 }
0x173f   :  { %v2007_v59 = vmul.f32 %v2006_v57, %v2001_v56 }
0x1740   :  { %v6130_v43 = vpop.eup %6129 }
0x1741   :  { %v2002_v58 = vmul.f32 %v6130_v43, %v1986_v28  ;;  %v2013_v62 = vadd.f32 %v2012_v60, %v2007_v59  ;;  %v5991_v59 = vld [vmem:[%s7383_s10] sm:$0xff]  }
0x1743   :  { %v2008_v61 = vmul.f32 %v2006_v57, %v2002_v58  ;;  %v5990_v58 = vld [vmem:[%s7383_s10 + $0x8] sm:$0xff]  }
0x1745   :  { %v2014_v63 = vadd.f32 %v2012_v60, %v2008_v61 }
0x1747   :  { %v2015_v0 = vpack.c.bf16 %v2014_v63, %v2013_v62 }
0x1749   :  { %5027 = vmatmul.mubr.msk.bf16.vlgmr.msra.gmra.mxu1 %vm188_vm3, %v2015_v0 }
0x174a   :  { %5725 = vmatprep.mubr.msk.bf16.mxu1 %vm6207_vm1, %v6206_v1  ;;  %5722 = vmatpush3.bf16.msra.mxu1 %v5990_v58 }
0x174b   :  { %5723 = vmatprep.subr.bf16.mxu1 %v6206_v1 }
0x174e   :  { %5724 = vmatpush3.bf16.msra.mxu1 %v5991_v59 }
0x174f   :  { %5729 = vmatprep.subr.bf16.mxu1 %v6206_v1 }
0x1809   :  { %v2084_v10 = vpop.f32.mrf.mxu1 }
0x180a   :  { %v2085_v24 = vadd.f32 %v2084_v10, %v2020_v14  ;;  %v5044_v10 = vld [vmem:[%s7381_s8 + $0x28] ss:$0 sm:$0xff] }
0x180b   :  { %v2086_v15 = vpop.f32.mrf.mxu1 }
0x180c   :  { %v2087_v17 = vadd.f32 %v2086_v15, %v2024_v11  ;;  %v2093_v30 = vmax.f32 %v2085_v24, 0.0 }
0x180d   :  { %v2088_v16 = vpop.f32.mrf.mxu1 }
0x180e   :  { %v2089_v18 = vadd.f32 %v2088_v16, %v2020_v14  ;;  %v2094_v28 = vmax.f32 %v2087_v17, 0.0 }
0x180f   :  { %v2090_v25 = vpop.f32.mrf.mxu1 }
0x1810   :  { %v2091_v26 = vadd.f32 %v2090_v25, %v2024_v11  ;;  %v2095_v27 = vmax.f32 %v2089_v18, 0.0 }
0x1812   :  { %v2096_v54 = vmax.f32 %v2091_v26, 0.0  ;;  %v2097_v55 = vpack.c.bf16 %v2095_v27, %v2093_v30  ;;  %v5992_v26 = vld [vmem:[%s7373_s0] sm:$0xff]   ;;  %v5993_v27 = vld [vmem:[%s7378_s5 + $0xc8] sm:$0xff]  }
0x1813   :  { %v5996_v30 = vld [vmem:[%s7378_s5 + $0xe0] sm:$0xff]  }
0x1814   :  { %v2098_v31 = vpack.c.bf16 %v2096_v54, %v2094_v28  ;;  %v5994_v28 = vld [vmem:[%s7378_s5 + $0xe8] sm:$0xff]   ;;  %v5995_v54 = vld [vmem:[%s7378_s5 + $0xc0] sm:$0xff]  }
0x1816   :  { %2231 = vmatprep.mubr.bf16.mxu0 %v2098_v31  ;;  %v5048_v31 = vld [vmem:[%s7384_s11] ss:$0 sm:$0xff] }
0x1817   :  { %2232 = vmatmul.mubr.bf16.vlgmr.msra.gmra.mxu0 %v2097_v55 }
0x1818   :  { %5755 = vmatprep.mubr.msk.bf16.mxu0 %vm6207_vm1, %v6206_v1  ;;  %5752 = vmatpush3.bf16.msra.mxu0 %v5994_v28 }
0x1819   :  { %5753 = vmatprep.subr.bf16.mxu0 %v6206_v1 }
0x181c   :  { %5754 = vmatpush3.bf16.msra.mxu0 %v5996_v30 }
0x181d   :  { %5765 = vmatprep.subr.bf16.mxu0 %v6206_v1 }
0x18d7   :  { %v5448_v33 = vpop.f32.mrf.mxu0 }
0x18d9   :  { %v5449_v36 = vpop.f32.mrf.mxu0 }
0x18da   :  { %v5450_v21 = vadd.f32 %v5449_v36, %v5448_v33 }
0x18db   :  { %v5451_v37 = vpop.f32.mrf.mxu0 }
0x18dc   :  { %v2234_v38 = vadd.f32 %v5450_v21, %v2102_v19 }
0x18dd   :  { %v5452_v39 = vpop.f32.mrf.mxu0 }
0x18de   :  { %v5453_v40 = vadd.f32 %v5452_v39, %v5451_v37  ;;  %v2240_v41 = vadd.f32 %v2234_v38, %v2013_v62 }
0x18e0   :  { %v2237_v42 = vadd.f32 %v5453_v40, %v2102_v19  ;;  %v2242_v12 = vsel %vm188_vm3, %v2240_v41, 0.0 }
0x18e1   :  { %2243 = vadd.xlane.f32.xlu0 %v2242_v12 }
0x18e2   :  { %v2241_v44 = vadd.f32 %v2237_v42, %v2014_v63  ;;  %v5997_v42 = vld [vmem:[%s7378_s5 + $0xd8] sm:$0xff]  }
0x18e4   :  { %v2245_v45 = vsel %vm188_vm3, %v2241_v44, 0.0 }
0x18e5   :  { %2246 = vadd.xlane.f32.xlu1 %v2245_v45  ;;  %v6884_v45 = vld [vmem:[%s7381_s8 + $0x30] sm:$0xff] }
0x196a   :  { %v2244_v46 = vpop.xlane.xlu0 %2243 }
0x196b   :  { %v2248_v47 = vmul.f32 0.03125, %v2244_v46 }
0x196d   :  { %v2250_v48 = vsub.f32 %v2240_v41, %v2248_v47 }
0x196e   :  { %v2247_v50 = vpop.xlane.xlu1 %2246 }
0x196f   :  { %v2249_v51 = vmul.f32 0.03125, %v2247_v50  ;;  %v2252_v52 = vmul.f32 %v2250_v48, %v2250_v48 }
0x1971   :  { %v2251_v53 = vsub.f32 %v2241_v44, %v2249_v51  ;;  %v2254_v56 = vsel %vm188_vm3, %v2252_v52, 0.0  ;;  %v5998_v44 = vld [vmem:[%s7378_s5 + $0xd0] sm:$0xff]  }
0x1972   :  { %2255 = vadd.xlane.f32.xlu0 %v2254_v56 }
0x1973   :  { %v2253_v57 = vmul.f32 %v2251_v53, %v2251_v53 }
0x1975   :  { %v2257_v43 = vsel %vm188_vm3, %v2253_v57, 0.0 }
0x1976   :  { %2258 = vadd.xlane.f32.xlu1 %v2257_v43 }
0x19fb   :  { %v2256_v60 = vpop.xlane.xlu0 %2255 }
0x19fc   :  { %v2260_v61 = vmul.f32 0.03125, %v2256_v60 }
0x19fe   :  { %v2262_v62 = vadd.f32 1e-05, %v2260_v61  ;;  %v2529_v61 = vrot.slane %v6884_v45, %v6345_v20 }
0x19ff   :  { %v2259_v63 = vpop.xlane.xlu1 %2258 }
0x1a00   :  { %6131 = vrsqrt.f32 %v2262_v62  ;;  %v2261_v0 = vmul.f32 0.03125, %v2259_v63 }
0x1a02   :  { %v2263_v2 = vadd.f32 1e-05, %v2261_v0 }
0x1a04   :  { %6133 = vrsqrt.f32 %v2263_v2 }
0x1a0d   :  { %v6132_v35 = vpop.eup %6131 }
0x1a0e   :  { %v2266_v4 = vmul.f32 %v6132_v35, %v2250_v48  ;;  %v2586_v48 = vrot.slane %v6884_v45, %v6358_v32 }
0x1a10   :  { %v2272_v9 = vmul.f32 %v2271_v5, %v2266_v4 }
0x1a11   :  { %v6134_v6 = vpop.eup %6133 }
0x1a12   :  { %v2267_v8 = vmul.f32 %v6134_v6, %v2251_v53  ;;  %v2278_v14 = vadd.f32 %v5044_v10, %v2272_v9 }
0x1a14   :  { %v2273_v11 = vmul.f32 %v2271_v5, %v2267_v8  ;;  %v2469_v5 = vrot.slane %v6884_v45, %v6355_v29 }
0x1a16   :  { %v2279_v15 = vadd.f32 %v5044_v10, %v2273_v11 }
0x1a18   :  { %v2280_v16 = vpack.c.bf16 %v2279_v15, %v2278_v14 }
0x1a1a   :  { %5726 = vmatmul.mubr.msk.bf16.vlgmr.msra.gmra.mxu1 %vm188_vm3, %v2280_v16 }
0x1a1b   :  { %5731 = vmatprep.mubr.msk.bf16.mxu1 %vm6207_vm1, %v6206_v1 }
0x1ada   :  { %v2334_v17 = vpop.f32.mrf.mxu1 }
0x1adc   :  { %v5727_v18 = vpop.f32.mrf.mxu1 }
0x1ade   :  { %v2337_v24 = vpop.f32.mrf.mxu1 }
0x1adf   :  { %v2343_v34 = vpack.c.bf16 %v2337_v24, %v2334_v17 }
0x1ae0   :  { %v5728_v25 = vpop.f32.mrf.mxu1 }
0x1ae1   :  { %5730 = vmatpush3.bf16.msra.mxu1 %v2343_v34 }
0x1ae2   :  { %5735 = vmatprep.subr.bf16.mxu1 %v6206_v1 }
0x1ae4   :  { %5732 = vmatmul.mubr.msk.bf16.vlgmr.msra.gmra.mxu1 %vm398_vm4, %v5992_v26 }
0x1ae5   :  { %5739 = vmatprep.mubr.msk.bf16.mxu1 %vm6207_vm1, %v6206_v1  ;;  %5736 = vmatpush3.bf16.msra.mxu1 %v5993_v27 }
0x1ae6   :  { %5737 = vmatprep.subr.bf16.mxu1 %v6206_v1 }
0x1ae9   :  { %5738 = vmatpush3.bf16.msra.mxu1 %v5995_v54 }
0x1aea   :  { %5743 = vmatprep.subr.bf16.mxu1 %v6206_v1 }
0x1ba4   :  { %v2391_v55 = vpop.f32.mrf.mxu1 }
0x1ba5   :  { %v2392_v33 = vadd.f32 %v5048_v31, %v2391_v55 }
0x1ba6   :  { %v5733_v19 = vpop.f32.mrf.mxu1 }
0x1ba7   :  { %v2398_v21 = vmax.f32 %v2392_v33, 0.0 }
0x1ba8   :  { %v2394_v36 = vpop.f32.mrf.mxu1 }
0x1ba9   :  { %v2395_v37 = vadd.f32 %v5048_v31, %v2394_v36  ;;  %v6858_v40 = vadd.f32 %v2398_v21, %v2278_v14 }
0x1baa   :  { %v5734_v38 = vpop.f32.mrf.mxu1 }
0x1bab   :  { %v2399_v39 = vmax.f32 %v2395_v37, 0.0 }
0x1bad   :  { %v6860_v41 = vadd.f32 %v2399_v39, %v2279_v15 }
0x1baf   :  { %v2465_v12 = vpack.c.bf16 %v6860_v41, %v6858_v40 }
0x1bb1   :  { %5740 = vmatmul.mubr.msk.bf16.vlgmr.msra.gmra.mxu1 %vm188_vm3, %v2465_v12  ;;  %5756 = vmatmul.mubr.msk.bf16.vlgmr.msra.gmra.mxu0 %vm188_vm3, %v2465_v12 }
0x1bb2   :  { %5744 = vmatpush3.bf16.msra.mxu1 %v5997_v42  ;;  %5747 = vmatprep.mubr.msk.bf16.mxu1 %vm6207_vm1, %v6206_v1 }
0x1bb3   :  { %5745 = vmatprep.subr.bf16.mxu1 %v6206_v1  ;;  %5767 = vmatprep.mubr.msk.bf16.mxu0 %vm6207_vm1, %v6206_v1 }
0x1bb6   :  { %5746 = vmatpush3.bf16.msra.mxu1 %v5998_v44  ;;  %v5999_v44 = vld [vmem:[%s7378_s5 + $0xf8] sm:$0xff]  }
0x1bb7   :  { %5759 = vmatprep.subr.bf16.mxu1 %v6206_v1 }
0x1bb9   :  { %5748 = vmatmul.mubr.msk.bf16.vlgmr.msra.gmra.mxu1 %vm188_vm3, %v2465_v12 }
0x1bba   :  { %5761 = vmatprep.mubr.msk.bf16.mxu1 %vm6207_vm1, %v6206_v1 }
0x1c71   :  { %v2519_v46 = vpop.f32.mrf.mxu1  ;;  %v2633_v47 = vpop.f32.mrf.mxu0 }
0x1c72   :  { %v2634_v56 = vadd.f32 %v2633_v47, %v2586_v48  ;;  %v2520_v9 = vadd.f32 %v2519_v46, %v2469_v5  ;;  %v6000_v46 = vld [vmem:[%s7378_s5 + $0xf0] sm:$0xff]  }
0x1c73   :  { %v5741_v50 = vpop.f32.mrf.mxu1  ;;  %v5757_v51 = vpop.f32.mrf.mxu0 }
0x1c75   :  { %v2522_v52 = vpop.f32.mrf.mxu1  ;;  %v2636_v53 = vpop.f32.mrf.mxu0 }
0x1c76   :  { %v2637_v57 = vadd.f32 %v2636_v53, %v2586_v48  ;;  %v2523_v8 = vadd.f32 %v2522_v52, %v2469_v5  ;;  %v2763_v53 = vrot.slane %v6884_v45, %v6383_v23 }
0x1c77   :  { %v5742_v43 = vpop.f32.mrf.mxu1  ;;  %v5758_v58 = vpop.f32.mrf.mxu0 }
0x1c78   :  { %v2714_v59 = vpack.c.bf16 %v2637_v57, %v2634_v56  ;;  %v2640_v10 = vpack.c.bf16 %v2523_v8, %v2520_v9 }
0x1c79   :  { %v2576_v60 = vpop.f32.mrf.mxu1 }
0x1c7a   :  { %5766 = vmatpush3.bf16.msra.mxu0 %v2714_v59  ;;  %v2577_v0 = vadd.f32 %v2576_v60, %v2529_v61 }
0x1c7b   :  { %v5749_v62 = vpop.f32.mrf.mxu1 }
0x1c7d   :  { %v2579_v63 = vpop.f32.mrf.mxu1 }
0x1c7e   :  { %v2580_v2 = vadd.f32 %v2579_v63, %v2529_v61 }
0x1c7f   :  { %v5750_v35 = vpop.f32.mrf.mxu1 }
0x1c80   :  { %v2641_v4 = vpack.c.bf16 %v2580_v2, %v2577_v0 }
0x1c82   :  { %v2646_v6 = vsel %vm188_vm3, %v2641_v4, 0 }
0x1c83   :  { %5760 = vmatpush3.bf16.xpose.msra.mxu1 %v2646_v6 }
0x1c84   :  { %5771 = vmatprep.subr.bf16.mxu1 %v6206_v1 }
0x1c8a   :  { %5762 = vmatmul.mubr.msk.bf16.vlgmr.msra.gmra.mxu1 %vm188_vm3, %v2640_v10 }
0x1c8b   :  { %5775 = vmatprep.mubr.msk.bf16.mxu1 %vm6207_vm1, %v6206_v1  ;;  %5772 = vmatpush3.bf16.msra.mxu1 %v5999_v44 }
0x1c8c   :  { %5773 = vmatprep.subr.bf16.mxu1 %v6206_v1 }
0x1c8f   :  { %5774 = vmatpush3.bf16.msra.mxu1 %v6000_v46  ;;  %v2857_v46 = vrot.slane %v6884_v45, %v6443_v7 }
0x1d4a   :  { %v2682_v11 = vpop.f32.mrf.mxu1 }
0x1d4b   :  { %v2689_v14 = vmul.f32 0.17677669, %v2682_v11 }
0x1d4c   :  { %v5763_v15 = vpop.f32.mrf.mxu1 }
0x1d4d   :  { %v2691_v16 = vsel %vm398_vm4, %v2689_v14, -inf  ;;  %v6006_v15 = vld [vmem:[%s7379_s6 + $0x64] ss:$8 sps:$4 sm:$0xff]  }
0x1d4e   :  { %2692 = vmax.xlane.f32.xlu0 %v2691_v16  ;;  %v2685_v17 = vpop.f32.mrf.mxu1  ;;  %v6004_v16 = vld [vmem:[%s7379_s6 + $0x60] ss:$8 sps:$4 sm:$0xff]  }
0x1d4f   :  { %v2690_v18 = vmul.f32 0.17677669, %v2685_v17  ;;  %v6007_v17 = vld [vmem:[%s7380_s7 + $0x1f8] sm:$0xff]  }
0x1d50   :  { %v5764_v24 = vpop.f32.mrf.mxu1  ;;  %5475 = vmatprep.subr.bf16.mxu1 %v6007_v17 }
0x1d51   :  { %v2694_v34 = vsel %vm398_vm4, %v2690_v18, -inf  ;;  %v6009_v24 = vld [vmem:[%s7380_s7 + $0x1f0] sm:$0xff]  }
0x1d52   :  { %2695 = vmax.xlane.f32.xlu1 %v2694_v34  ;;  %v6010_v34 = vld [vmem:[%s7380_s7 + $0x1b0] sm:$0xff]  }
0x1dd7   :  { %v2693_v25 = vpop.xlane.xlu0 %2692 }
0x1dd8   :  { %v2697_v26 = vsub.f32 %v2689_v14, %v2693_v25  ;;  %v6001_v14 = vld [vmem:[%s7379_s6 + $0x70] ss:$8 sps:$4 sm:$0xff]   ;;  %v6011_v25 = vld [vmem:[%s7380_s7 + $0x1e8] sm:$0xff]  }
0x1dda   :  { %v2699_v27 = vmul.f32 1.442695, %v2697_v26  ;;  %v6012_v26 = vld [vmem:[%s7380_s7 + $0x1a8] sm:$0xff]  }
0x1ddb   :  { %v2696_v28 = vpop.xlane.xlu1 %2695 }
0x1ddc   :  { %6135 = vpow2.f32 %v2699_v27  ;;  %v2698_v54 = vsub.f32 %v2690_v18, %v2696_v28  ;;  %v6008_v18 = vld [vmem:[%s7380_s7 + $0x1b8] sm:$0xff]   ;;  %v6013_v27 = vld [vmem:[%s7380_s7 + $0x1e0] sm:$0xff]  }
0x1ddd   :  { %v6014_v28 = vld [vmem:[%s7380_s7 + $0x1a0] sm:$0xff]  }
0x1dde   :  { %v2701_v30 = vmul.f32 1.442695, %v2698_v54  ;;  %v6015_v54 = vld [vmem:[%s7380_s7 + $0x1d8] sm:$0xff]  }
0x1de0   :  { %6137 = vpow2.f32 %v2701_v30  ;;  %v6016_v30 = vld [vmem:[%s7380_s7 + $0x198] sm:$0xff]  }
0x1de9   :  { %v6136_v31 = vpop.eup %6135 }
0x1dea   :  { %v2703_v55 = vsel %vm398_vm4, %v6136_v31, 0.0 }
0x1deb   :  { %2704 = vadd.xlane.f32.xlu0 %v2703_v55 }
0x1ded   :  { %v6138_v33 = vpop.eup %6137 }
0x1dee   :  { %v2706_v19 = vsel %vm398_vm4, %v6138_v33, 0.0 }
0x1def   :  { %2707 = vadd.xlane.f32.xlu1 %v2706_v19 }
0x1e74   :  { %v2705_v36 = vpop.xlane.xlu0 %2704 }
0x1e75   :  { %6139 = vrcp.f32 %v2705_v36 }
0x1e78   :  { %v2708_v21 = vpop.xlane.xlu1 %2707 }
0x1e79   :  { %6141 = vrcp.f32 %v2708_v21 }
0x1e82   :  { %v6140_v37 = vpop.eup %6139 }
0x1e83   :  { %v2711_v39 = vmul.f32 %v6140_v37, %v6136_v31 }
0x1e86   :  { %v6142_v38 = vpop.eup %6141 }
0x1e87   :  { %v2712_v42 = vmul.f32 %v6142_v38, %v6138_v33 }
0x1e89   :  { %v2713_v12 = vpack.c.bf16 %v2712_v42, %v2711_v39  ;;  %v2851_v39 = vrot.slane %v6884_v45, %v6438_v3 }
0x1e8b   :  { %5768 = vmatmul.mubr.msk.bf16.vlgmr.msra.gmra.mxu0 %vm398_vm4, %v2713_v12 }
0x1e8c   :  { %2927 = vmatprep.mubr.bf16.mxu0 %v6208_v49 }
0x1f4b   :  { %v2752_v47 = vpop.f32.mrf.mxu0 }
0x1f4d   :  { %v5769_v48 = vpop.f32.mrf.mxu0 }
0x1f4f   :  { %v2755_v50 = vpop.f32.mrf.mxu0 }
0x1f50   :  { %v2759_v51 = vpack.c.bf16 %v2755_v50, %v2752_v47 }
0x1f51   :  { %v5770_v52 = vpop.f32.mrf.mxu0 }
0x1f52   :  { %5776 = vmatmul.mubr.msk.bf16.vlgmr.msra.gmra.mxu1 %vm188_vm3, %v2759_v51  ;;  %v6017_v52 = vld [vmem:[%s7380_s7 + $0x1d0] sm:$0xff]  }
0x1f53   :  { %5476 = vmatpush3.bf16.msra.mxu1 %v6008_v18 }
0x1f54   :  { %5477 = vmatprep.subr.bf16.mxu1 %v6009_v24 }
0x1f57   :  { %5478 = vmatpush3.bf16.msra.mxu1 %v6010_v34 }
0x1f58   :  { %5479 = vmatprep.subr.bf16.mxu1 %v6011_v25 }
0x1f5b   :  { %5480 = vmatpush3.bf16.msra.mxu1 %v6012_v26 }
0x1f5c   :  { %5481 = vmatprep.subr.bf16.mxu1 %v6013_v27 }
0x1f5f   :  { %5482 = vmatpush3.bf16.msra.mxu1 %v6014_v28 }
0x1f60   :  { %5483 = vmatprep.subr.bf16.mxu1 %v6015_v54 }
0x1f63   :  { %5484 = vmatpush3.bf16.msra.mxu1 %v6016_v30 }
0x1f64   :  { %5485 = vmatprep.subr.bf16.mxu1 %v6017_v52 }
0x2012   :  { %v2813_v56 = vpop.f32.mrf.mxu1 }
0x2013   :  { %v2814_v57 = vadd.f32 %v2813_v56, %v2763_v53  ;;  %v6019_v56 = vld [vmem:[%s7380_s7 + $0x1c8] sm:$0xff]  }
0x2014   :  { %v5777_v43 = vpop.f32.mrf.mxu1 }
0x2015   :  { %v2820_v58 = vadd.f32 %v2814_v57, %v6858_v40  ;;  %v6020_v57 = vld [vmem:[%s7380_s7 + $0x188] sm:$0xff]   ;;  %v6021_v43 = vld [vmem:[%s7380_s7 + $0x1c0] sm:$0xff]  }
0x2016   :  { %v2816_v59 = vpop.f32.mrf.mxu1 }
0x2017   :  { %v2817_v60 = vadd.f32 %v2816_v59, %v2763_v53  ;;  %v2822_v61 = vsel %vm188_vm3, %v2820_v58, 0.0  ;;  %v6018_v53 = vld [vmem:[%s7380_s7 + $0x190] sm:$0xff]   ;;  %v5105_v59 = vld [vmem:[%s7382_s9 + $0x3] ss:$8 sm:$0x3] }
0x2018   :  { %2823 = vadd.xlane.f32.xlu0 %v2822_v61  ;;  %v5778_v62 = vpop.f32.mrf.mxu1  ;;  %5486 = vmatpush3.bf16.msra.mxu1 %v6018_v53  ;;  %v2869_v61 = vrot.slane %v5105_v59, %v6345_v20 }
0x2019   :  { %v2821_v63 = vadd.f32 %v2817_v60, %v6860_v41  ;;  %v6003_v41 = vld [vmem:[%s7379_s6 + $0x74] ss:$8 sps:$4 sm:$0xff]   ;;  %5487 = vmatprep.subr.bf16.mxu1 %v6019_v56  ;;  %v2865_v62 = vrot.slane %v5105_v59, %v6355_v29 }
0x201a   :  { %2907 = vmatprep.subr.bf16.mxu0 %v6003_v41 }
0x201b   :  { %v2825_v0 = vsel %vm188_vm3, %v2821_v63, 0.0  ;;  %2908 = vmatpush1.bf16.msra.mxu0 %v6001_v14 }
0x201c   :  { %2826 = vadd.xlane.f32.xlu1 %v2825_v0  ;;  %2909 = vmatprep.subr.bf16.mxu0 %v6006_v15  ;;  %v2947_v15 = vrot.slane %v6884_v45, %v6477_v13 }
0x201d   :  { %5488 = vmatpush3.bf16.msra.mxu1 %v6020_v57  ;;  %v3116_v57 = vrot.slane %v6884_v45, %v6494_v22  ;;  %v6026_v45 = vld [vmem:[%s7378_s5 + $0x110] sm:$0xff]  }
0x201e   :  { %5489 = vmatprep.subr.bf16.mxu1 %v6021_v43 }
0x201f   :  { %2910 = vmatpush1.bf16.msra.mxu0 %v6004_v16 }
0x2020   :  { %5779 = vmatprep.subr.bf16.mxu0 %v6206_v1 }
0x20a1   :  { %v2824_v2 = vpop.xlane.xlu0 %2823 }
0x20a2   :  { %v2828_v35 = vmul.f32 0.03125, %v2824_v2 }
0x20a4   :  { %v2830_v4 = vsub.f32 %v2820_v58, %v2828_v35  ;;  %v6022_v58 = vld [vmem:[%s7380_s7 + $0x180] sm:$0xff]  }
0x20a5   :  { %v2827_v5 = vpop.xlane.xlu1 %2826  ;;  %5490 = vmatpush3.bf16.msra.mxu1 %v6022_v58 }
0x20a6   :  { %v2829_v6 = vmul.f32 0.03125, %v2827_v5  ;;  %v2832_v8 = vmul.f32 %v2830_v4, %v2830_v4  ;;  %5809 = vmatprep.subr.bf16.mxu1 %v6206_v1 }
0x20a8   :  { %v2831_v9 = vsub.f32 %v2821_v63, %v2829_v6  ;;  %v2834_v40 = vsel %vm188_vm3, %v2832_v8, 0.0 }
0x20a9   :  { %2835 = vadd.xlane.f32.xlu0 %v2834_v40 }
0x20aa   :  { %v2833_v10 = vmul.f32 %v2831_v9, %v2831_v9 }
0x20ac   :  { %v2837_v11 = vsel %vm188_vm3, %v2833_v10, 0.0 }
0x20ad   :  { %2838 = vadd.xlane.f32.xlu1 %v2837_v11 }
0x2132   :  { %v2836_v31 = vpop.xlane.xlu0 %2835 }
0x2133   :  { %v2840_v55 = vmul.f32 0.03125, %v2836_v31 }
0x2135   :  { %v2842_v33 = vadd.f32 1e-05, %v2840_v55 }
0x2136   :  { %v2839_v19 = vpop.xlane.xlu1 %2838 }
0x2137   :  { %6143 = vrsqrt.f32 %v2842_v33  ;;  %v2841_v36 = vmul.f32 0.03125, %v2839_v19 }
0x2139   :  { %v2843_v21 = vadd.f32 1e-05, %v2841_v36 }
0x213b   :  { %6145 = vrsqrt.f32 %v2843_v21 }
0x2144   :  { %v6144_v37 = vpop.eup %6143 }
0x2145   :  { %v2846_v38 = vmul.f32 %v6144_v37, %v2830_v4 }
0x2147   :  { %v2852_v44 = vmul.f32 %v2851_v39, %v2846_v38 }
0x2148   :  { %v6146_v42 = vpop.eup %6145 }
0x2149   :  { %v2847_v12 = vmul.f32 %v6146_v42, %v2831_v9  ;;  %v2858_v48 = vadd.f32 %v2857_v46, %v2852_v44  ;;  %v6024_v44 = vld [vmem:[%s7378_s5 + $0x100] sm:$0xff]  }
0x214b   :  { %v2853_v47 = vmul.f32 %v2851_v39, %v2847_v12  ;;  %v6023_v12 = vld [vmem:[%s7378_s5 + $0x108] sm:$0xff]  }
0x214d   :  { %v2859_v50 = vadd.f32 %v2857_v46, %v2853_v47 }
0x214f   :  { %v2860_v51 = vpack.c.bf16 %v2859_v50, %v2858_v48 }
0x2151   :  { %5124 = vmatmul.mubr.msk.bf16.vlgmr.msra.gmra.mxu0 %vm188_vm3, %v2860_v51 }
0x2152   :  { %5783 = vmatprep.mubr.msk.bf16.mxu0 %vm6207_vm1, %v6206_v1  ;;  %5780 = vmatpush3.bf16.msra.mxu0 %v6023_v12 }
0x2153   :  { %5781 = vmatprep.subr.bf16.mxu0 %v6206_v1 }
0x2156   :  { %5782 = vmatpush3.bf16.msra.mxu0 %v6024_v44 }
0x2157   :  { %5787 = vmatprep.subr.bf16.mxu0 %v6206_v1 }
0x2211   :  { %v2929_v60 = vpop.f32.mrf.mxu0 }
0x2212   :  { %v2930_v4 = vadd.f32 %v2929_v60, %v2865_v62  ;;  %v5141_v60 = vld [vmem:[%s7381_s8 + $0x38] ss:$0 sm:$0xff] }
0x2213   :  { %v2931_v63 = vpop.f32.mrf.mxu0 }
0x2214   :  { %v2932_v2 = vadd.f32 %v2931_v63, %v2869_v61  ;;  %v2938_v10 = vmax.f32 %v2930_v4, 0.0  ;;  %v6028_v4 = vld [vmem:[%s7378_s5 + $0x120] sm:$0xff]  }
0x2215   :  { %v2933_v0 = vpop.f32.mrf.mxu0 }
0x2216   :  { %v2934_v35 = vadd.f32 %v2933_v0, %v2865_v62  ;;  %v2939_v9 = vmax.f32 %v2932_v2, 0.0  ;;  %v6025_v0 = vld [vmem:[%s7378_s5 + $0x118] sm:$0xff]  }
0x2217   :  { %v2935_v5 = vpop.f32.mrf.mxu0 }
0x2218   :  { %v2936_v6 = vadd.f32 %v2935_v5, %v2869_v61  ;;  %v2940_v8 = vmax.f32 %v2934_v35, 0.0  ;;  %v6027_v35 = vld [vmem:[%s7378_s5 + $0x128] sm:$0xff]  }
0x221a   :  { %v2941_v40 = vmax.f32 %v2936_v6, 0.0  ;;  %v2942_v41 = vpack.c.bf16 %v2940_v8, %v2938_v10 }
0x221c   :  { %v2943_v11 = vpack.c.bf16 %v2941_v40, %v2939_v9  ;;  %v7048_v40 = vld [vmem:[%s7381_s8 + $0x40] sm:$0xff] }
0x221e   :  { %3076 = vmatprep.mubr.bf16.mxu1 %v2943_v11  ;;  %v3252_v11 = vrot.slane %v7048_v40, %v6345_v20 }
0x221f   :  { %3077 = vmatmul.mubr.bf16.vlgmr.msra.gmra.mxu1 %v2942_v41 }
0x2220   :  { %5811 = vmatprep.mubr.msk.bf16.mxu1 %vm6207_vm1, %v6206_v1 }
0x22df   :  { %v5491_v14 = vpop.f32.mrf.mxu1 }
0x22e1   :  { %v5492_v16 = vpop.f32.mrf.mxu1 }
0x22e2   :  { %v5493_v17 = vadd.f32 %v5492_v16, %v5491_v14 }
0x22e3   :  { %v5494_v18 = vpop.f32.mrf.mxu1 }
0x22e4   :  { %v3079_v24 = vadd.f32 %v5493_v17, %v2947_v15 }
0x22e5   :  { %v5495_v34 = vpop.f32.mrf.mxu1 }
0x22e6   :  { %v5496_v25 = vadd.f32 %v5495_v34, %v5494_v18  ;;  %v3085_v26 = vadd.f32 %v3079_v24, %v2858_v48  ;;  %v3192_v34 = vrot.slane %v7048_v40, %v6355_v29 }
0x22e8   :  { %v3082_v27 = vadd.f32 %v5496_v25, %v2947_v15  ;;  %v3087_v28 = vsel %vm188_vm3, %v3085_v26, 0.0  ;;  %v3309_v25 = vrot.slane %v7048_v40, %v6358_v32 }
0x22e9   :  { %3088 = vadd.xlane.f32.xlu0 %v3087_v28 }
0x22ea   :  { %v3086_v54 = vadd.f32 %v3082_v27, %v2859_v50 }
0x22ec   :  { %v3090_v30 = vsel %vm188_vm3, %v3086_v54, 0.0 }
0x22ed   :  { %3091 = vadd.xlane.f32.xlu1 %v3090_v30 }
0x2372   :  { %v3089_v31 = vpop.xlane.xlu0 %3088 }
0x2373   :  { %v3093_v55 = vmul.f32 0.03125, %v3089_v31 }
0x2375   :  { %v3095_v33 = vsub.f32 %v3085_v26, %v3093_v55 }
0x2376   :  { %v3092_v19 = vpop.xlane.xlu1 %3091 }
0x2377   :  { %v3094_v36 = vmul.f32 0.03125, %v3092_v19  ;;  %v3097_v21 = vmul.f32 %v3095_v33, %v3095_v33 }
0x2379   :  { %v3096_v37 = vsub.f32 %v3086_v54, %v3094_v36  ;;  %v3099_v38 = vsel %vm188_vm3, %v3097_v21, 0.0 }
0x237a   :  { %3100 = vadd.xlane.f32.xlu0 %v3099_v38 }
0x237b   :  { %v3098_v39 = vmul.f32 %v3096_v37, %v3096_v37 }
0x237d   :  { %v3102_v42 = vsel %vm188_vm3, %v3098_v39, 0.0 }
0x237e   :  { %3103 = vadd.xlane.f32.xlu1 %v3102_v42 }
0x2403   :  { %v3101_v46 = vpop.xlane.xlu0 %3100 }
0x2404   :  { %v3105_v47 = vmul.f32 0.03125, %v3101_v46 }
0x2406   :  { %v3107_v48 = vadd.f32 1e-05, %v3105_v47 }
0x2407   :  { %v3104_v50 = vpop.xlane.xlu1 %3103 }
0x2408   :  { %6147 = vrsqrt.f32 %v3107_v48  ;;  %v3106_v51 = vmul.f32 0.03125, %v3104_v50 }
0x240a   :  { %v3108_v52 = vadd.f32 1e-05, %v3106_v51 }
0x240c   :  { %6149 = vrsqrt.f32 %v3108_v52 }
0x2415   :  { %v6148_v53 = vpop.eup %6147 }
0x2416   :  { %v3111_v56 = vmul.f32 %v6148_v53, %v3095_v33 }
0x2418   :  { %v3117_v59 = vmul.f32 %v3116_v57, %v3111_v56 }
0x2419   :  { %v6150_v43 = vpop.eup %6149 }
0x241a   :  { %v3112_v58 = vmul.f32 %v6150_v43, %v3096_v37  ;;  %v7014_v62 = vadd.f32 %v5141_v60, %v3117_v59 }
0x241c   :  { %v3118_v61 = vmul.f32 %v3116_v57, %v3112_v58 }
0x241e   :  { %v7016_v63 = vadd.f32 %v5141_v60, %v3118_v61 }
0x2420   :  { %v3188_v2 = vpack.c.bf16 %v7016_v63, %v7014_v62 }
0x2422   :  { %5784 = vmatmul.mubr.msk.bf16.vlgmr.msra.gmra.mxu0 %vm188_vm3, %v3188_v2 }
0x2423   :  { %5788 = vmatpush3.bf16.msra.mxu0 %v6025_v0  ;;  %5791 = vmatprep.mubr.msk.bf16.mxu0 %vm6207_vm1, %v6206_v1 }
0x2424   :  { %5789 = vmatprep.subr.bf16.mxu0 %v6206_v1 }
0x2427   :  { %5790 = vmatpush3.bf16.msra.mxu0 %v6026_v45 }
0x2428   :  { %5795 = vmatprep.subr.bf16.mxu0 %v6206_v1 }
0x242a   :  { %5792 = vmatmul.mubr.msk.bf16.vlgmr.msra.gmra.mxu0 %vm188_vm3, %v3188_v2 }
0x242b   :  { %5796 = vmatpush3.bf16.msra.mxu0 %v6027_v35  ;;  %5799 = vmatprep.mubr.msk.bf16.mxu0 %vm6207_vm1, %v6206_v1 }
0x242c   :  { %5797 = vmatprep.subr.bf16.mxu0 %v6206_v1 }
0x242f   :  { %5798 = vmatpush3.bf16.msra.mxu0 %v6028_v4  ;;  %v6029_v4 = vld [vmem:[%s7378_s5 + $0x138] sm:$0xff]  }
0x2430   :  { %5803 = vmatprep.subr.bf16.mxu0 %v6206_v1 }
0x2432   :  { %5800 = vmatmul.mubr.msk.bf16.vlgmr.msra.gmra.mxu0 %vm188_vm3, %v3188_v2 }
0x2433   :  { %5805 = vmatprep.mubr.msk.bf16.mxu0 %vm6207_vm1, %v6206_v1 }
0x24e2   :  { %v3242_v5 = vpop.f32.mrf.mxu0 }
0x24e3   :  { %v3243_v30 = vadd.f32 %v3242_v5, %v3192_v34  ;;  %v6030_v5 = vld [vmem:[%s7378_s5 + $0x130] sm:$0xff]  }
0x24e4   :  { %v5785_v6 = vpop.f32.mrf.mxu0 }
0x24e6   :  { %v3245_v8 = vpop.f32.mrf.mxu0 }
0x24e7   :  { %v3246_v28 = vadd.f32 %v3245_v8, %v3192_v34 }
0x24e8   :  { %v5786_v9 = vpop.f32.mrf.mxu0 }
0x24e9   :  { %v3363_v19 = vpack.c.bf16 %v3246_v28, %v3243_v30 }
0x24ea   :  { %v3299_v10 = vpop.f32.mrf.mxu0 }
0x24eb   :  { %v3300_v15 = vadd.f32 %v3299_v10, %v3252_v11 }
0x24ec   :  { %v5793_v41 = vpop.f32.mrf.mxu0 }
0x24ed   :  { %v3486_v41 = vrot.slane %v7048_v40, %v6383_v23 }
0x24ee   :  { %v3302_v14 = vpop.f32.mrf.mxu0 }
0x24ef   :  { %v3303_v16 = vadd.f32 %v3302_v14, %v3252_v11 }
0x24f0   :  { %v5794_v17 = vpop.f32.mrf.mxu0 }
0x24f1   :  { %v3364_v18 = vpack.c.bf16 %v3303_v16, %v3300_v15 }
0x24f2   :  { %v3356_v24 = vpop.f32.mrf.mxu0 }
0x24f3   :  { %v3369_v26 = vsel %vm188_vm3, %v3364_v18, 0  ;;  %v3357_v31 = vadd.f32 %v3356_v24, %v3309_v25 }
0x24f4   :  { %v5801_v27 = vpop.f32.mrf.mxu0  ;;  %5804 = vmatpush3.bf16.xpose.msra.mxu0 %v3369_v26 }
0x24f5   :  { %5815 = vmatprep.subr.bf16.mxu0 %v6206_v1 }
0x24f6   :  { %v3359_v54 = vpop.f32.mrf.mxu0 }
0x24f7   :  { %v3360_v55 = vadd.f32 %v3359_v54, %v3309_v25 }
0x24f8   :  { %v5802_v33 = vpop.f32.mrf.mxu0 }
0x24f9   :  { %v3437_v36 = vpack.c.bf16 %v3360_v55, %v3357_v31 }
0x24fb   :  { %5806 = vmatmul.mubr.msk.bf16.vlgmr.msra.gmra.mxu0 %vm188_vm3, %v3363_v19  ;;  %5810 = vmatpush3.bf16.msra.mxu1 %v3437_v36 }
0x24fc   :  { %5819 = vmatprep.mubr.msk.bf16.mxu0 %vm6207_vm1, %v6206_v1  ;;  %5816 = vmatpush3.bf16.msra.mxu0 %v6029_v4 }
0x24fd   :  { %5817 = vmatprep.subr.bf16.mxu0 %v6206_v1 }
0x2500   :  { %5818 = vmatpush3.bf16.msra.mxu0 %v6030_v5  ;;  %v3580_v5 = vrot.slane %v7048_v40, %v6443_v7 }
0x25bb   :  { %v3405_v21 = vpop.f32.mrf.mxu0 }
0x25bc   :  { %v3412_v37 = vmul.f32 0.17677669, %v3405_v21 }
0x25bd   :  { %v5807_v38 = vpop.f32.mrf.mxu0 }
0x25be   :  { %v3414_v39 = vsel %vm398_vm4, %v3412_v37, -inf  ;;  %v6036_v38 = vld [vmem:[%s7379_s6 + $0x84] ss:$8 sps:$4 sm:$0xff]  }
0x25bf   :  { %3415 = vmax.xlane.f32.xlu0 %v3414_v39  ;;  %v3408_v42 = vpop.f32.mrf.mxu0  ;;  %v6034_v39 = vld [vmem:[%s7379_s6 + $0x80] ss:$8 sps:$4 sm:$0xff]  }
0x25c0   :  { %v3413_v12 = vmul.f32 0.17677669, %v3408_v42  ;;  %v6037_v42 = vld [vmem:[%s7380_s7 + $0x278] sm:$0xff]  }
0x25c1   :  { %v5808_v44 = vpop.f32.mrf.mxu0  ;;  %5513 = vmatprep.subr.bf16.mxu0 %v6037_v42 }
0x25c2   :  { %v3417_v46 = vsel %vm398_vm4, %v3413_v12, -inf  ;;  %v6039_v44 = vld [vmem:[%s7380_s7 + $0x270] sm:$0xff]  }
0x25c3   :  { %3418 = vmax.xlane.f32.xlu1 %v3417_v46  ;;  %v6040_v46 = vld [vmem:[%s7380_s7 + $0x230] sm:$0xff]  }
0x2648   :  { %v3416_v47 = vpop.xlane.xlu0 %3415 }
0x2649   :  { %v3420_v48 = vsub.f32 %v3412_v37, %v3416_v47  ;;  %v6031_v37 = vld [vmem:[%s7379_s6 + $0x90] ss:$8 sps:$4 sm:$0xff]   ;;  %v6041_v47 = vld [vmem:[%s7380_s7 + $0x268] sm:$0xff]  }
0x264b   :  { %v3422_v50 = vmul.f32 1.442695, %v3420_v48  ;;  %v6042_v48 = vld [vmem:[%s7380_s7 + $0x228] sm:$0xff]  }
0x264c   :  { %v3419_v51 = vpop.xlane.xlu1 %3418 }
0x264d   :  { %6151 = vpow2.f32 %v3422_v50  ;;  %v3421_v52 = vsub.f32 %v3413_v12, %v3419_v51  ;;  %v6038_v12 = vld [vmem:[%s7380_s7 + $0x238] sm:$0xff]   ;;  %v6043_v50 = vld [vmem:[%s7380_s7 + $0x260] sm:$0xff]  }
0x264e   :  { %v6044_v51 = vld [vmem:[%s7380_s7 + $0x220] sm:$0xff]  }
0x264f   :  { %v3424_v53 = vmul.f32 1.442695, %v3421_v52  ;;  %v6045_v52 = vld [vmem:[%s7380_s7 + $0x258] sm:$0xff]  }
0x2651   :  { %6153 = vpow2.f32 %v3424_v53  ;;  %v6046_v53 = vld [vmem:[%s7380_s7 + $0x218] sm:$0xff]  }
0x265a   :  { %v6152_v56 = vpop.eup %6151 }
0x265b   :  { %v3426_v57 = vsel %vm398_vm4, %v6152_v56, 0.0 }
0x265c   :  { %3427 = vadd.xlane.f32.xlu0 %v3426_v57 }
0x265e   :  { %v6154_v43 = vpop.eup %6153 }
0x265f   :  { %v3429_v58 = vsel %vm398_vm4, %v6154_v43, 0.0 }
0x2660   :  { %3430 = vadd.xlane.f32.xlu1 %v3429_v58 }
0x26e5   :  { %v3428_v59 = vpop.xlane.xlu0 %3427 }
0x26e6   :  { %6155 = vrcp.f32 %v3428_v59 }
0x26e9   :  { %v3431_v60 = vpop.xlane.xlu1 %3430 }
0x26ea   :  { %6157 = vrcp.f32 %v3431_v60 }
0x26f3   :  { %v6156_v61 = vpop.eup %6155 }
0x26f4   :  { %v3434_v2 = vmul.f32 %v6156_v61, %v6152_v56 }
0x26f7   :  { %v6158_v0 = vpop.eup %6157 }
0x26f8   :  { %v3435_v45 = vmul.f32 %v6158_v0, %v6154_v43 }
0x26fa   :  { %v3436_v35 = vpack.c.bf16 %v3435_v45, %v3434_v2  ;;  %v3574_v2 = vrot.slane %v7048_v40, %v6438_v3 }
0x26fc   :  { %5812 = vmatmul.mubr.msk.bf16.vlgmr.msra.gmra.mxu1 %vm398_vm4, %v3436_v35 }
0x26fd   :  { %3650 = vmatprep.mubr.bf16.mxu1 %v6208_v49 }
0x27bc   :  { %v3475_v6 = vpop.f32.mrf.mxu1 }
0x27be   :  { %v5813_v8 = vpop.f32.mrf.mxu1 }
0x27c0   :  { %v3478_v9 = vpop.f32.mrf.mxu1 }
0x27c1   :  { %v3482_v10 = vpack.c.bf16 %v3478_v9, %v3475_v6 }
0x27c2   :  { %v5814_v11 = vpop.f32.mrf.mxu1 }
0x27c3   :  { %5820 = vmatmul.mubr.msk.bf16.vlgmr.msra.gmra.mxu0 %vm188_vm3, %v3482_v10  ;;  %v6047_v11 = vld [vmem:[%s7380_s7 + $0x250] sm:$0xff]  }
0x27c4   :  { %5514 = vmatpush3.bf16.msra.mxu0 %v6038_v12 }
0x27c5   :  { %5515 = vmatprep.subr.bf16.mxu0 %v6039_v44 }
0x27c8   :  { %5516 = vmatpush3.bf16.msra.mxu0 %v6040_v46 }
0x27c9   :  { %5517 = vmatprep.subr.bf16.mxu0 %v6041_v47 }
0x27cc   :  { %5518 = vmatpush3.bf16.msra.mxu0 %v6042_v48 }
0x27cd   :  { %5519 = vmatprep.subr.bf16.mxu0 %v6043_v50 }
0x27d0   :  { %5520 = vmatpush3.bf16.msra.mxu0 %v6044_v51 }
0x27d1   :  { %5521 = vmatprep.subr.bf16.mxu0 %v6045_v52 }
0x27d4   :  { %5522 = vmatpush3.bf16.msra.mxu0 %v6046_v53 }
0x27d5   :  { %5523 = vmatprep.subr.bf16.mxu0 %v6047_v11 }
0x2883   :  { %v3536_v14 = vpop.f32.mrf.mxu0 }
0x2884   :  { %v3537_v15 = vadd.f32 %v3536_v14, %v3486_v41  ;;  %v6049_v14 = vld [vmem:[%s7380_s7 + $0x248] sm:$0xff]  }
0x2885   :  { %v5821_v16 = vpop.f32.mrf.mxu0 }
0x2886   :  { %v3543_v17 = vadd.f32 %v3537_v15, %v7014_v62  ;;  %v6050_v15 = vld [vmem:[%s7380_s7 + $0x208] sm:$0xff]   ;;  %v6051_v16 = vld [vmem:[%s7380_s7 + $0x240] sm:$0xff]  }
0x2887   :  { %v3539_v18 = vpop.f32.mrf.mxu0 }
0x2888   :  { %v3540_v24 = vadd.f32 %v3539_v18, %v3486_v41  ;;  %v3545_v34 = vsel %vm188_vm3, %v3543_v17, 0.0  ;;  %v6048_v41 = vld [vmem:[%s7380_s7 + $0x210] sm:$0xff]   ;;  %v5196_v18 = vld [vmem:[%s7382_s9 + $0x4] ss:$8 sm:$0x3] }
0x2889   :  { %3546 = vadd.xlane.f32.xlu0 %v3545_v34  ;;  %v5822_v25 = vpop.f32.mrf.mxu0  ;;  %5524 = vmatpush3.bf16.msra.mxu0 %v6048_v41  ;;  %v3592_v34 = vrot.slane %v5196_v18, %v6345_v20 }
0x288a   :  { %v3544_v26 = vadd.f32 %v3540_v24, %v7016_v63  ;;  %v6033_v63 = vld [vmem:[%s7379_s6 + $0x94] ss:$8 sps:$4 sm:$0xff]   ;;  %5525 = vmatprep.subr.bf16.mxu0 %v6049_v14  ;;  %v3588_v25 = vrot.slane %v5196_v18, %v6355_v29 }
0x288b   :  { %3630 = vmatprep.subr.bf16.mxu1 %v6033_v63 }
0x288c   :  { %v3548_v27 = vsel %vm188_vm3, %v3544_v26, 0.0  ;;  %3631 = vmatpush1.bf16.msra.mxu1 %v6031_v37 }
0x288d   :  { %3549 = vadd.xlane.f32.xlu1 %v3548_v27  ;;  %3632 = vmatprep.subr.bf16.mxu1 %v6036_v38  ;;  %v3670_v38 = vrot.slane %v7048_v40, %v6477_v13 }
0x288e   :  { %5526 = vmatpush3.bf16.msra.mxu0 %v6050_v15  ;;  %v3839_v15 = vrot.slane %v7048_v40, %v6494_v22  ;;  %v6056_v40 = vld [vmem:[%s7378_s5 + $0x150] sm:$0xff]  }
0x288f   :  { %5527 = vmatprep.subr.bf16.mxu0 %v6051_v16 }
0x2890   :  { %3633 = vmatpush1.bf16.msra.mxu1 %v6034_v39 }
0x2891   :  { %5823 = vmatprep.subr.bf16.mxu1 %v6206_v1 }
0x2912   :  { %v3547_v28 = vpop.xlane.xlu0 %3546 }
0x2913   :  { %v3551_v54 = vmul.f32 0.03125, %v3547_v28 }
0x2915   :  { %v3553_v30 = vsub.f32 %v3543_v17, %v3551_v54  ;;  %v6052_v17 = vld [vmem:[%s7380_s7 + $0x200] sm:$0xff]  }
0x2916   :  { %v3550_v31 = vpop.xlane.xlu1 %3549  ;;  %5528 = vmatpush3.bf16.msra.mxu0 %v6052_v17 }
0x2917   :  { %v3552_v55 = vmul.f32 0.03125, %v3550_v31  ;;  %v3555_v33 = vmul.f32 %v3553_v30, %v3553_v30  ;;  %5853 = vmatprep.subr.bf16.mxu0 %v6206_v1 }
0x2919   :  { %v3554_v19 = vsub.f32 %v3544_v26, %v3552_v55  ;;  %v3557_v62 = vsel %vm188_vm3, %v3555_v33, 0.0 }
0x291a   :  { %3558 = vadd.xlane.f32.xlu0 %v3557_v62 }
0x291b   :  { %v3556_v36 = vmul.f32 %v3554_v19, %v3554_v19 }
0x291d   :  { %v3560_v21 = vsel %vm188_vm3, %v3556_v36, 0.0 }
0x291e   :  { %3561 = vadd.xlane.f32.xlu1 %v3560_v21 }
0x29a3   :  { %v3559_v56 = vpop.xlane.xlu0 %3558 }
0x29a4   :  { %v3563_v57 = vmul.f32 0.03125, %v3559_v56 }
0x29a6   :  { %v3565_v43 = vadd.f32 1e-05, %v3563_v57 }
0x29a7   :  { %v3562_v58 = vpop.xlane.xlu1 %3561 }
0x29a8   :  { %6159 = vrsqrt.f32 %v3565_v43  ;;  %v3564_v59 = vmul.f32 0.03125, %v3562_v58 }
0x29aa   :  { %v3566_v60 = vadd.f32 1e-05, %v3564_v59 }
0x29ac   :  { %6161 = vrsqrt.f32 %v3566_v60 }
0x29b5   :  { %v6160_v61 = vpop.eup %6159 }
0x29b6   :  { %v3569_v0 = vmul.f32 %v6160_v61, %v3553_v30 }
0x29b8   :  { %v3575_v4 = vmul.f32 %v3574_v2, %v3569_v0 }
0x29b9   :  { %v6162_v45 = vpop.eup %6161 }
0x29ba   :  { %v3570_v35 = vmul.f32 %v6162_v45, %v3554_v19  ;;  %v3581_v8 = vadd.f32 %v3580_v5, %v3575_v4  ;;  %v6054_v4 = vld [vmem:[%s7378_s5 + $0x140] sm:$0xff]  }
0x29bc   :  { %v3576_v6 = vmul.f32 %v3574_v2, %v3570_v35  ;;  %v6053_v35 = vld [vmem:[%s7378_s5 + $0x148] sm:$0xff]  }
0x29be   :  { %v3582_v9 = vadd.f32 %v3580_v5, %v3576_v6 }
0x29c0   :  { %v3583_v10 = vpack.c.bf16 %v3582_v9, %v3581_v8 }
0x29c2   :  { %5215 = vmatmul.mubr.msk.bf16.vlgmr.msra.gmra.mxu1 %vm188_vm3, %v3583_v10 }
0x29c3   :  { %5827 = vmatprep.mubr.msk.bf16.mxu1 %vm6207_vm1, %v6206_v1  ;;  %5824 = vmatpush3.bf16.msra.mxu1 %v6053_v35 }
0x29c4   :  { %5825 = vmatprep.subr.bf16.mxu1 %v6206_v1 }
0x29c7   :  { %5826 = vmatpush3.bf16.msra.mxu1 %v6054_v4 }
0x29c8   :  { %5831 = vmatprep.subr.bf16.mxu1 %v6206_v1 }
0x2a82   :  { %v3652_v24 = vpop.f32.mrf.mxu1 }
0x2a83   :  { %v3653_v30 = vadd.f32 %v3652_v24, %v3588_v25  ;;  %v5232_v24 = vld [vmem:[%s7381_s8 + $0x48] ss:$0 sm:$0xff] }
0x2a84   :  { %v3654_v26 = vpop.f32.mrf.mxu1 }
0x2a85   :  { %v3655_v28 = vadd.f32 %v3654_v26, %v3592_v34  ;;  %v3661_v36 = vmax.f32 %v3653_v30, 0.0  ;;  %v6058_v30 = vld [vmem:[%s7378_s5 + $0x160] sm:$0xff]  }
0x2a86   :  { %v3656_v27 = vpop.f32.mrf.mxu1 }
0x2a87   :  { %v3657_v54 = vadd.f32 %v3656_v27, %v3588_v25  ;;  %v3662_v19 = vmax.f32 %v3655_v28, 0.0  ;;  %v6055_v27 = vld [vmem:[%s7378_s5 + $0x158] sm:$0xff]  }
0x2a88   :  { %v3658_v31 = vpop.f32.mrf.mxu1 }
0x2a89   :  { %v3659_v55 = vadd.f32 %v3658_v31, %v3592_v34  ;;  %v3663_v33 = vmax.f32 %v3657_v54, 0.0  ;;  %v6057_v54 = vld [vmem:[%s7378_s5 + $0x168] sm:$0xff]  }
0x2a8b   :  { %v3664_v62 = vmax.f32 %v3659_v55, 0.0  ;;  %v3665_v63 = vpack.c.bf16 %v3663_v33, %v3661_v36 }
0x2a8d   :  { %v3666_v21 = vpack.c.bf16 %v3664_v62, %v3662_v19  ;;  %v7212_v62 = vld [vmem:[%s7381_s8 + $0x50] sm:$0xff] }
0x2a8f   :  { %3799 = vmatprep.mubr.bf16.mxu0 %v3666_v21  ;;  %v3975_v21 = vrot.slane %v7212_v62, %v6345_v20 }
0x2a90   :  { %3800 = vmatmul.mubr.bf16.vlgmr.msra.gmra.mxu0 %v3665_v63 }
0x2a91   :  { %5855 = vmatprep.mubr.msk.bf16.mxu0 %vm6207_vm1, %v6206_v1 }
0x2b50   :  { %v5529_v37 = vpop.f32.mrf.mxu0 }
0x2b52   :  { %v5530_v39 = vpop.f32.mrf.mxu0 }
0x2b53   :  { %v5531_v42 = vadd.f32 %v5530_v39, %v5529_v37 }
0x2b54   :  { %v5532_v12 = vpop.f32.mrf.mxu0 }
0x2b55   :  { %v3802_v44 = vadd.f32 %v5531_v42, %v3670_v38 }
0x2b56   :  { %v5533_v46 = vpop.f32.mrf.mxu0 }
0x2b57   :  { %v5534_v47 = vadd.f32 %v5533_v46, %v5532_v12  ;;  %v3808_v48 = vadd.f32 %v3802_v44, %v3581_v8  ;;  %v3915_v46 = vrot.slane %v7212_v62, %v6355_v29 }
0x2b59   :  { %v3805_v50 = vadd.f32 %v5534_v47, %v3670_v38  ;;  %v3810_v51 = vsel %vm188_vm3, %v3808_v48, 0.0  ;;  %v4032_v47 = vrot.slane %v7212_v62, %v6358_v32 }
0x2b5a   :  { %3811 = vadd.xlane.f32.xlu0 %v3810_v51 }
0x2b5b   :  { %v3809_v52 = vadd.f32 %v3805_v50, %v3582_v9 }
0x2b5d   :  { %v3813_v53 = vsel %vm188_vm3, %v3809_v52, 0.0 }
0x2b5e   :  { %3814 = vadd.xlane.f32.xlu1 %v3813_v53 }
0x2be3   :  { %v3812_v56 = vpop.xlane.xlu0 %3811 }
0x2be4   :  { %v3816_v57 = vmul.f32 0.03125, %v3812_v56 }
0x2be6   :  { %v3818_v43 = vsub.f32 %v3808_v48, %v3816_v57 }
0x2be7   :  { %v3815_v58 = vpop.xlane.xlu1 %3814 }
0x2be8   :  { %v3817_v59 = vmul.f32 0.03125, %v3815_v58  ;;  %v3820_v60 = vmul.f32 %v3818_v43, %v3818_v43 }
0x2bea   :  { %v3819_v61 = vsub.f32 %v3809_v52, %v3817_v59  ;;  %v3822_v0 = vsel %vm188_vm3, %v3820_v60, 0.0 }
0x2beb   :  { %3823 = vadd.xlane.f32.xlu0 %v3822_v0 }
0x2bec   :  { %v3821_v2 = vmul.f32 %v3819_v61, %v3819_v61 }
0x2bee   :  { %v3825_v45 = vsel %vm188_vm3, %v3821_v2, 0.0 }
0x2bef   :  { %3826 = vadd.xlane.f32.xlu1 %v3825_v45 }
0x2c74   :  { %v3824_v5 = vpop.xlane.xlu0 %3823 }
0x2c75   :  { %v3828_v6 = vmul.f32 0.03125, %v3824_v5 }
0x2c77   :  { %v3830_v8 = vadd.f32 1e-05, %v3828_v6 }
0x2c78   :  { %v3827_v9 = vpop.xlane.xlu1 %3826 }
0x2c79   :  { %6163 = vrsqrt.f32 %v3830_v8  ;;  %v3829_v10 = vmul.f32 0.03125, %v3827_v9 }
0x2c7b   :  { %v3831_v11 = vadd.f32 1e-05, %v3829_v10 }
0x2c7d   :  { %6165 = vrsqrt.f32 %v3831_v11 }
0x2c86   :  { %v6164_v41 = vpop.eup %6163 }
0x2c87   :  { %v3834_v14 = vmul.f32 %v6164_v41, %v3818_v43 }
0x2c89   :  { %v3840_v18 = vmul.f32 %v3839_v15, %v3834_v14 }
0x2c8a   :  { %v6166_v16 = vpop.eup %6165 }
0x2c8b   :  { %v3835_v17 = vmul.f32 %v6166_v16, %v3819_v61  ;;  %v7178_v25 = vadd.f32 %v5232_v24, %v3840_v18 }
0x2c8d   :  { %v3841_v34 = vmul.f32 %v3839_v15, %v3835_v17 }
0x2c8f   :  { %v7180_v26 = vadd.f32 %v5232_v24, %v3841_v34 }
0x2c91   :  { %v3911_v28 = vpack.c.bf16 %v7180_v26, %v7178_v25 }
0x2c93   :  { %5828 = vmatmul.mubr.msk.bf16.vlgmr.msra.gmra.mxu1 %vm188_vm3, %v3911_v28 }
0x2c94   :  { %5832 = vmatpush3.bf16.msra.mxu1 %v6055_v27  ;;  %5835 = vmatprep.mubr.msk.bf16.mxu1 %vm6207_vm1, %v6206_v1 }
0x2c95   :  { %5833 = vmatprep.subr.bf16.mxu1 %v6206_v1 }
0x2c98   :  { %5834 = vmatpush3.bf16.msra.mxu1 %v6056_v40 }
0x2c99   :  { %5839 = vmatprep.subr.bf16.mxu1 %v6206_v1 }
0x2c9b   :  { %5836 = vmatmul.mubr.msk.bf16.vlgmr.msra.gmra.mxu1 %vm188_vm3, %v3911_v28 }
0x2c9c   :  { %5840 = vmatpush3.bf16.msra.mxu1 %v6057_v54  ;;  %5843 = vmatprep.mubr.msk.bf16.mxu1 %vm6207_vm1, %v6206_v1  ;;  %v6059_v54 = vld [vmem:[%s7378_s5 + $0x178] sm:$0xff]  }
0x2c9d   :  { %5841 = vmatprep.subr.bf16.mxu1 %v6206_v1 }
0x2ca0   :  { %5842 = vmatpush3.bf16.msra.mxu1 %v6058_v30  ;;  %v6060_v30 = vld [vmem:[%s7378_s5 + $0x170] sm:$0xff]  }
0x2ca1   :  { %5847 = vmatprep.subr.bf16.mxu1 %v6206_v1 }
0x2ca3   :  { %5844 = vmatmul.mubr.msk.bf16.vlgmr.msra.gmra.mxu1 %vm188_vm3, %v3911_v28 }
0x2ca4   :  { %5849 = vmatprep.mubr.msk.bf16.mxu1 %vm6207_vm1, %v6206_v1 }
0x2d53   :  { %v3965_v31 = vpop.f32.mrf.mxu1 }
0x2d54   :  { %v3966_v53 = vadd.f32 %v3965_v31, %v3915_v46 }
0x2d55   :  { %v5829_v55 = vpop.f32.mrf.mxu1 }
0x2d57   :  { %v3968_v33 = vpop.f32.mrf.mxu1 }
0x2d58   :  { %v3969_v51 = vadd.f32 %v3968_v33, %v3915_v46 }
0x2d59   :  { %v5830_v19 = vpop.f32.mrf.mxu1 }
0x2d5a   :  { %v4086_v58 = vpack.c.bf16 %v3969_v51, %v3966_v53 }
0x2d5b   :  { %v4022_v36 = vpop.f32.mrf.mxu1 }
0x2d5c   :  { %v4023_v38 = vadd.f32 %v4022_v36, %v3975_v21 }
0x2d5d   :  { %v5837_v63 = vpop.f32.mrf.mxu1 }
0x2d5f   :  { %v4025_v37 = vpop.f32.mrf.mxu1 }
0x2d60   :  { %v4026_v39 = vadd.f32 %v4025_v37, %v3975_v21 }
0x2d61   :  { %v5838_v42 = vpop.f32.mrf.mxu1 }
0x2d62   :  { %v4087_v12 = vpack.c.bf16 %v4026_v39, %v4023_v38 }
0x2d63   :  { %v4079_v44 = vpop.f32.mrf.mxu1 }
0x2d64   :  { %v4092_v48 = vsel %vm188_vm3, %v4087_v12, 0  ;;  %v4080_v56 = vadd.f32 %v4079_v44, %v4032_v47 }
0x2d65   :  { %v5845_v50 = vpop.f32.mrf.mxu1  ;;  %5848 = vmatpush3.bf16.xpose.msra.mxu1 %v4092_v48 }
0x2d66   :  { %5859 = vmatprep.subr.bf16.mxu1 %v6206_v1 }
0x2d67   :  { %v4082_v52 = vpop.f32.mrf.mxu1 }
0x2d68   :  { %v4083_v57 = vadd.f32 %v4082_v52, %v4032_v47 }
0x2d69   :  { %v5846_v43 = vpop.f32.mrf.mxu1 }
0x2d6a   :  { %v4160_v59 = vpack.c.bf16 %v4083_v57, %v4080_v56 }
0x2d6c   :  { %5850 = vmatmul.mubr.msk.bf16.vlgmr.msra.gmra.mxu1 %vm188_vm3, %v4086_v58  ;;  %5854 = vmatpush3.bf16.msra.mxu0 %v4160_v59  ;;  %v6061_v58 = vld [vmem:[%s7379_s6 + $0xb0] ss:$8 sps:$4 sm:$0xff]   ;;  %v6066_v59 = vld [vmem:[%s7379_s6 + $0xa4] ss:$8 sps:$4 sm:$0xff]  }
0x2d6d   :  { %5863 = vmatprep.mubr.msk.bf16.mxu1 %vm6207_vm1, %v6206_v1  ;;  %5860 = vmatpush3.bf16.msra.mxu1 %v6059_v54 }
0x2d6e   :  { %5861 = vmatprep.subr.bf16.mxu1 %v6206_v1 }
0x2d71   :  { %5862 = vmatpush3.bf16.msra.mxu1 %v6060_v30 }
0x2e2c   :  { %v4128_v32 = vpop.f32.mrf.mxu1 }
0x2e2d   :  { %v4135_v60 = vmul.f32 0.17677669, %v4128_v32  ;;  %v6064_v32 = vld [vmem:[%s7379_s6 + $0xa0] ss:$8 sps:$4 sm:$0xff]  }
0x2e2e   :  { %v5851_v61 = vpop.f32.mrf.mxu1 }
0x2e2f   :  { %v4137_v0 = vsel %vm398_vm4, %v4135_v60, -inf  ;;  %v6068_v61 = vld [vmem:[%s7380_s7 + $0x2b8] sm:$0xff]  }
0x2e30   :  { %4138 = vmax.xlane.f32.xlu0 %v4137_v0  ;;  %v4131_v2 = vpop.f32.mrf.mxu1  ;;  %v6069_v0 = vld [vmem:[%s7380_s7 + $0x2f0] sm:$0xff]  }
0x2e31   :  { %v4136_v45 = vmul.f32 0.17677669, %v4131_v2  ;;  %v6070_v2 = vld [vmem:[%s7380_s7 + $0x2b0] sm:$0xff]  }
0x2e32   :  { %v5852_v35 = vpop.f32.mrf.mxu1 }
0x2e33   :  { %v4140_v4 = vsel %vm398_vm4, %v4136_v45, -inf  ;;  %v6072_v35 = vld [vmem:[%s7380_s7 + $0x2a8] sm:$0xff]  }
0x2e34   :  { %4141 = vmax.xlane.f32.xlu1 %v4140_v4  ;;  %v6073_v4 = vld [vmem:[%s7380_s7 + $0x2e0] sm:$0xff]  }
0x2eb9   :  { %v4139_v5 = vpop.xlane.xlu0 %4138 }
0x2eba   :  { %v4143_v6 = vsub.f32 %v4135_v60, %v4139_v5  ;;  %v6067_v60 = vld [vmem:[%s7380_s7 + $0x2f8] sm:$0xff]   ;;  %v6074_v5 = vld [vmem:[%s7380_s7 + $0x2a0] sm:$0xff]  }
0x2ebb   :  { %5551 = vmatprep.subr.bf16.mxu1 %v6067_v60 }
0x2ebc   :  { %v4145_v8 = vmul.f32 1.442695, %v4143_v6  ;;  %v6075_v6 = vld [vmem:[%s7380_s7 + $0x2d8] sm:$0xff]  }
0x2ebd   :  { %v4142_v9 = vpop.xlane.xlu1 %4141 }
0x2ebe   :  { %6167 = vpow2.f32 %v4145_v8  ;;  %v4144_v10 = vsub.f32 %v4136_v45, %v4142_v9  ;;  %v6071_v45 = vld [vmem:[%s7380_s7 + $0x2e8] sm:$0xff]   ;;  %v6076_v8 = vld [vmem:[%s7380_s7 + $0x298] sm:$0xff]  }
0x2ec0   :  { %v4147_v11 = vmul.f32 1.442695, %v4144_v10 }
0x2ec2   :  { %6169 = vpow2.f32 %v4147_v11 }
0x2ecb   :  { %v6168_v41 = vpop.eup %6167 }
0x2ecc   :  { %v4149_v14 = vsel %vm398_vm4, %v6168_v41, 0.0 }
0x2ecd   :  { %4150 = vadd.xlane.f32.xlu0 %v4149_v14 }
0x2ecf   :  { %v6170_v15 = vpop.eup %6169 }
0x2ed0   :  { %v4152_v16 = vsel %vm398_vm4, %v6170_v15, 0.0 }
0x2ed1   :  { %4153 = vadd.xlane.f32.xlu1 %v4152_v16 }
0x2f56   :  { %v4151_v17 = vpop.xlane.xlu0 %4150 }
0x2f57   :  { %6171 = vrcp.f32 %v4151_v17 }
0x2f5a   :  { %v4154_v18 = vpop.xlane.xlu1 %4153 }
0x2f5b   :  { %6173 = vrcp.f32 %v4154_v18  ;;  %v4297_v18 = vrot.slane %v7212_v62, %v6438_v3  ;;  %v6078_v3 = vld [vmem:[%s7380_s7 + $0x290] sm:$0xff]  }
0x2f64   :  { %v6172_v24 = vpop.eup %6171 }
0x2f65   :  { %v4157_v27 = vmul.f32 %v6172_v24, %v6168_v41 }
0x2f68   :  { %v6174_v34 = vpop.eup %6173 }
0x2f69   :  { %v4158_v28 = vmul.f32 %v6174_v34, %v6170_v15 }
0x2f6b   :  { %v4159_v40 = vpack.c.bf16 %v4158_v28, %v4157_v27  ;;  %v4303_v28 = vrot.slane %v7212_v62, %v6443_v7  ;;  %v6079_v7 = vld [vmem:[%s7380_s7 + $0x2c8] sm:$0xff]  }
0x2f6d   :  { %5856 = vmatmul.mubr.msk.bf16.vlgmr.msra.gmra.mxu0 %vm398_vm4, %v4159_v40 }
0x2f6e   :  { %4373 = vmatprep.mubr.bf16.mxu0 %v6208_v49  ;;  %v4209_v49 = vrot.slane %v7212_v62, %v6383_v23 }
0x302d   :  { %v4198_v31 = vpop.f32.mrf.mxu0 }
0x302f   :  { %v5857_v55 = vpop.f32.mrf.mxu0 }
0x3030   :  { %v6077_v55 = vld [vmem:[%s7380_s7 + $0x2d0] sm:$0xff]  }
0x3031   :  { %v4201_v33 = vpop.f32.mrf.mxu0 }
0x3032   :  { %v4205_v19 = vpack.c.bf16 %v4201_v33, %v4198_v31  ;;  %v6080_v33 = vld [vmem:[%s7380_s7 + $0x288] sm:$0xff]  }
0x3033   :  { %v5858_v36 = vpop.f32.mrf.mxu0 }
0x3034   :  { %5864 = vmatmul.mubr.msk.bf16.vlgmr.msra.gmra.mxu1 %vm188_vm3, %v4205_v19  ;;  %v6081_v19 = vld [vmem:[%s7380_s7 + $0x2c0] sm:$0xff]  }
0x3035   :  { %5552 = vmatpush3.bf16.msra.mxu1 %v6068_v61  ;;  %v6082_v36 = vld [vmem:[%s7380_s7 + $0x280] sm:$0xff]  }
0x3036   :  { %5553 = vmatprep.subr.bf16.mxu1 %v6069_v0 }
0x3039   :  { %5554 = vmatpush3.bf16.msra.mxu1 %v6070_v2 }
0x303a   :  { %5555 = vmatprep.subr.bf16.mxu1 %v6071_v45 }
0x303d   :  { %5556 = vmatpush3.bf16.msra.mxu1 %v6072_v35 }
0x303e   :  { %5557 = vmatprep.subr.bf16.mxu1 %v6073_v4 }
0x3041   :  { %5558 = vmatpush3.bf16.msra.mxu1 %v6074_v5 }
0x3042   :  { %5559 = vmatprep.subr.bf16.mxu1 %v6075_v6 }
0x3045   :  { %5560 = vmatpush3.bf16.msra.mxu1 %v6076_v8 }
0x3046   :  { %5561 = vmatprep.subr.bf16.mxu1 %v6077_v55 }
0x3049   :  { %5562 = vmatpush3.bf16.msra.mxu1 %v6078_v3 }
0x304a   :  { %5563 = vmatprep.subr.bf16.mxu1 %v6079_v7 }
0x304d   :  { %5564 = vmatpush3.bf16.msra.mxu1 %v6080_v33 }
0x304e   :  { %5565 = vmatprep.subr.bf16.mxu1 %v6081_v19 }
0x3051   :  { %5566 = vmatpush3.bf16.msra.mxu1 %v6082_v36 }
0x30f4   :  { %v4259_v21 = vpop.f32.mrf.mxu1 }
0x30f5   :  { %v4260_v63 = vadd.f32 %v4259_v21, %v4209_v49 }
0x30f6   :  { %v5865_v37 = vpop.f32.mrf.mxu1 }
0x30f7   :  { %v4266_v38 = vadd.f32 %v4260_v63, %v7178_v25 }
0x30f8   :  { %v4262_v39 = vpop.f32.mrf.mxu1 }
0x30f9   :  { %v4263_v42 = vadd.f32 %v4262_v39, %v4209_v49  ;;  %v4268_v12 = vsel %vm188_vm3, %v4266_v38, 0.0  ;;  %v5287_v49 = vld [vmem:[%s7382_s9 + $0x5] ss:$8 sm:$0x3] }
0x30fa   :  { %4269 = vadd.xlane.f32.xlu0 %v4268_v12  ;;  %v5866_v44 = vpop.f32.mrf.mxu1  ;;  %v4315_v63 = vrot.slane %v5287_v49, %v6345_v20  ;;  %v4311_v37 = vrot.slane %v5287_v49, %v6355_v29  ;;  %v4393_v20 = vrot.slane %v7212_v62, %v6477_v13 }
0x30fb   :  { %v4267_v46 = vadd.f32 %v4263_v42, %v7180_v26  ;;  %v6063_v26 = vld [vmem:[%s7379_s6 + $0xb4] ss:$8 sps:$4 sm:$0xff]  }
0x30fc   :  { %4353 = vmatprep.subr.bf16.mxu0 %v6063_v26 }
0x30fd   :  { %v4271_v47 = vsel %vm188_vm3, %v4267_v46, 0.0  ;;  %4354 = vmatpush1.bf16.msra.mxu0 %v6061_v58 }
0x30fe   :  { %4272 = vadd.xlane.f32.xlu1 %v4271_v47  ;;  %4355 = vmatprep.subr.bf16.mxu0 %v6066_v59 }
0x3101   :  { %4356 = vmatpush1.bf16.msra.mxu0 %v6064_v32 }
0x3102   :  { %5867 = vmatprep.subr.bf16.mxu0 %v6206_v1 }
0x3183   :  { %v4270_v48 = vpop.xlane.xlu0 %4269 }
0x3184   :  { %v4274_v50 = vmul.f32 0.03125, %v4270_v48 }
0x3186   :  { %v4276_v51 = vsub.f32 %v4266_v38, %v4274_v50 }
0x3187   :  { %v4273_v23 = vpop.xlane.xlu1 %4272 }
0x3188   :  { %v4275_v52 = vmul.f32 0.03125, %v4273_v23  ;;  %v4278_v53 = vmul.f32 %v4276_v51, %v4276_v51 }
0x318a   :  { %v4277_v56 = vsub.f32 %v4267_v46, %v4275_v52  ;;  %v4280_v25 = vsel %vm188_vm3, %v4278_v53, 0.0 }
0x318b   :  { %4281 = vadd.xlane.f32.xlu0 %v4280_v25 }
0x318c   :  { %v4279_v57 = vmul.f32 %v4277_v56, %v4277_v56 }
0x318e   :  { %v4283_v43 = vsel %vm188_vm3, %v4279_v57, 0.0 }
0x318f   :  { %4284 = vadd.xlane.f32.xlu1 %v4283_v43 }
0x3214   :  { %v4282_v9 = vpop.xlane.xlu0 %4281 }
0x3215   :  { %v4286_v10 = vmul.f32 0.03125, %v4282_v9 }
0x3217   :  { %v4288_v11 = vadd.f32 1e-05, %v4286_v10 }
0x3218   :  { %v4285_v41 = vpop.xlane.xlu1 %4284 }
0x3219   :  { %6175 = vrsqrt.f32 %v4288_v11  ;;  %v4287_v14 = vmul.f32 0.03125, %v4285_v41  ;;  %v6083_v11 = vld [vmem:[%s7383_s10 + $0x18] sm:$0xff]   ;;  %v6084_v41 = vld [vmem:[%s7383_s10 + $0x10] sm:$0xff]  }
0x321b   :  { %v4289_v15 = vadd.f32 1e-05, %v4287_v14 }
0x321d   :  { %6177 = vrsqrt.f32 %v4289_v15 }
0x3226   :  { %v6176_v16 = vpop.eup %6175 }
0x3227   :  { %v4292_v17 = vmul.f32 %v6176_v16, %v4276_v51 }
0x3229   :  { %v4298_v27 = vmul.f32 %v4297_v18, %v4292_v17 }
0x322a   :  { %v6178_v24 = vpop.eup %6177 }
0x322b   :  { %v4293_v34 = vmul.f32 %v6178_v24, %v4277_v56  ;;  %v4304_v54 = vadd.f32 %v4303_v28, %v4298_v27 }
0x322d   :  { %v4299_v40 = vmul.f32 %v4297_v18, %v4293_v34 }
0x322f   :  { %v4305_v30 = vadd.f32 %v4303_v28, %v4299_v40  ;;  %v4562_v28 = vrot.slane %v7212_v62, %v6494_v22 }
0x3231   :  { %v4306_v31 = vpack.c.bf16 %v4305_v30, %v4304_v54 }
0x3233   :  { %5306 = vmatmul.mubr.msk.bf16.vlgmr.msra.gmra.mxu0 %vm188_vm3, %v4306_v31  ;;  %v5323_v31 = vld [vmem:[%s7381_s8 + $0x58] ss:$0 sm:$0xff] }
0x3234   :  { %5871 = vmatprep.mubr.msk.bf16.mxu0 %vm6207_vm1, %v6206_v1  ;;  %5868 = vmatpush3.bf16.msra.mxu0 %v6083_v11 }
0x3235   :  { %5869 = vmatprep.subr.bf16.mxu0 %v6206_v1 }
0x3238   :  { %5870 = vmatpush3.bf16.msra.mxu0 %v6084_v41 }
0x3239   :  { %5875 = vmatprep.subr.bf16.mxu0 %v6206_v1 }
0x32f3   :  { %v4375_v21 = vpop.f32.mrf.mxu0 }
0x32f4   :  { %v4376_v44 = vadd.f32 %v4375_v21, %v4311_v37  ;;  %v6183_v21 = vld [vmem:[%s7373_s0] sm:$0xff]  }
0x32f5   :  { %v4377_v38 = vpop.f32.mrf.mxu0 }
0x32f6   :  { %v4378_v42 = vadd.f32 %v4377_v38, %v4315_v63  ;;  %v4384_v23 = vmax.f32 %v4376_v44, 0.0 }
0x32f7   :  { %v4379_v39 = vpop.f32.mrf.mxu0 }
0x32f8   :  { %v4380_v12 = vadd.f32 %v4379_v39, %v4311_v37  ;;  %v4385_v50 = vmax.f32 %v4378_v42, 0.0 }
0x32f9   :  { %v4381_v46 = vpop.f32.mrf.mxu0 }
0x32fa   :  { %v4382_v47 = vadd.f32 %v4381_v46, %v4315_v63  ;;  %v4386_v48 = vmax.f32 %v4380_v12, 0.0  ;;  %v5331_v63 = vld [vmem:[%s7384_s11 + $0x1] ss:$0 sm:$0xff] }
0x32fc   :  { %v4387_v51 = vmax.f32 %v4382_v47, 0.0  ;;  %v4388_v53 = vpack.c.bf16 %v4386_v48, %v4384_v23  ;;  %v4684_v23 = vld [vmem:[%s7374_s1] sm:$0x1] }
0x32fe   :  { %v4389_v52 = vpack.c.bf16 %v4387_v51, %v4385_v50 }
0x3300   :  { %4522 = vmatprep.mubr.bf16.mxu1 %v4389_v52  ;;  %v6085_v52 = vld [vmem:[%s7385_s12 + $0x8] sm:$0xff]  }
0x3301   :  { %4523 = vmatmul.mubr.bf16.vlgmr.msra.gmra.mxu1 %v4388_v53  ;;  %v6086_v53 = vld [vmem:[%s7385_s12] sm:$0xff]   ;;  %s6184_s12 = scalar_lea.vmem %s4805_s22, 32 }
0x3302   :  { %p6185_p0 = scmp.ne.s32.totalorder %s4805_s22, %s6184_s12  ;;  %p6190_p2 = scmp.lt.s32.totalorder %s6184_s12, %s6184_s12 }
0x3304   :  { %p6191_p3 = por %p6190_p2, %p6189_p1 }
0x3306   :  { %p6192_p4 = pnand %p6191_p3, %p6185_p0 }
0x33c1   :  { %v5567_v56 = vpop.f32.mrf.mxu1 }
0x33c3   :  { %v5568_v29 = vpop.f32.mrf.mxu1 }
0x33c4   :  { %v5569_v25 = vadd.f32 %v5568_v29, %v5567_v56 }
0x33c5   :  { %v5570_v57 = vpop.f32.mrf.mxu1 }
0x33c6   :  { %v4525_v43 = vadd.f32 %v5569_v25, %v4393_v20 }
0x33c7   :  { %v5571_v26 = vpop.f32.mrf.mxu1 }
0x33c8   :  { %v5572_v58 = vadd.f32 %v5571_v26, %v5570_v57  ;;  %v4531_v59 = vadd.f32 %v4525_v43, %v4304_v54  ;;  %v5334_v43 = vld [vmem:[%s7386_s13] ss:$0 sm:$0xff] }
0x33ca   :  { %v4528_v32 = vadd.f32 %v5572_v58, %v4393_v20  ;;  %v4533_v60 = vsel %vm188_vm3, %v4531_v59, 0.0 }
0x33cb   :  { %4534 = vadd.xlane.f32.xlu0 %v4533_v60 }
0x33cc   :  { %v4532_v61 = vadd.f32 %v4528_v32, %v4305_v30 }
0x33ce   :  { %v4536_v0 = vsel %vm188_vm3, %v4532_v61, 0.0 }
0x33cf   :  { %4537 = vadd.xlane.f32.xlu1 %v4536_v0 }
0x3454   :  { %v4535_v2 = vpop.xlane.xlu0 %4534 }
0x3455   :  { %v4539_v45 = vmul.f32 0.03125, %v4535_v2 }
0x3457   :  { %v4541_v35 = vsub.f32 %v4531_v59, %v4539_v45 }
0x3458   :  { %v4538_v4 = vpop.xlane.xlu1 %4537 }
0x3459   :  { %v4540_v13 = vmul.f32 0.03125, %v4538_v4  ;;  %v4543_v5 = vmul.f32 %v4541_v35, %v4541_v35 }
0x345b   :  { %v4542_v6 = vsub.f32 %v4532_v61, %v4540_v13  ;;  %v4545_v8 = vsel %vm188_vm3, %v4543_v5, 0.0 }
0x345c   :  { %4546 = vadd.xlane.f32.xlu0 %v4545_v8 }
0x345d   :  { %v4544_v9 = vmul.f32 %v4542_v6, %v4542_v6 }
0x345f   :  { %v4548_v10 = vsel %vm188_vm3, %v4544_v9, 0.0 }
0x3460   :  { %4549 = vadd.xlane.f32.xlu1 %v4548_v10 }
0x34e5   :  { %v4547_v14 = vpop.xlane.xlu0 %4546 }
0x34e6   :  { %v4551_v15 = vmul.f32 0.03125, %v4547_v14 }
0x34e8   :  { %v4553_v16 = vadd.f32 1e-05, %v4551_v15 }
0x34e9   :  { %v4550_v17 = vpop.xlane.xlu1 %4549 }
0x34ea   :  { %6179 = vrsqrt.f32 %v4553_v16  ;;  %v4552_v18 = vmul.f32 0.03125, %v4550_v17 }
0x34ec   :  { %v4554_v24 = vadd.f32 1e-05, %v4552_v18 }
0x34ee   :  { %6181 = vrsqrt.f32 %v4554_v24 }
0x34f7   :  { %v6180_v34 = vpop.eup %6179 }
0x34f8   :  { %v4557_v27 = vmul.f32 %v6180_v34, %v4541_v35 }
0x34fa   :  { %v4563_v30 = vmul.f32 %v4562_v28, %v4557_v27 }
0x34fb   :  { %v6182_v40 = vpop.eup %6181 }
0x34fc   :  { %v4558_v54 = vmul.f32 %v6182_v40, %v4542_v6  ;;  %v4569_v3 = vadd.f32 %v5323_v31, %v4563_v30 }
0x34fe   :  { %v4564_v55 = vmul.f32 %v4562_v28, %v4558_v54 }
0x3500   :  { %v4570_v7 = vadd.f32 %v5323_v31, %v4564_v55 }
0x3502   :  { %v4571_v33 = vpack.c.bf16 %v4570_v7, %v4569_v3 }
0x3504   :  { %5872 = vmatmul.mubr.msk.bf16.vlgmr.msra.gmra.mxu0 %vm188_vm3, %v4571_v33 }
0x3505   :  { %5877 = vmatprep.mubr.msk.bf16.mxu0 %vm6207_vm1, %v6206_v1 }
0x35c4   :  { %v4626_v19 = vpop.f32.mrf.mxu0 }
0x35c6   :  { %v5873_v36 = vpop.f32.mrf.mxu0 }
0x35c8   :  { %v4629_v49 = vpop.f32.mrf.mxu0 }
0x35c9   :  { %v4633_v22 = vpack.c.bf16 %v4629_v49, %v4626_v19 }
0x35ca   :  { %v5874_v62 = vpop.f32.mrf.mxu0 }
0x35cb   :  { %5876 = vmatpush3.bf16.msra.mxu0 %v4633_v22 }
0x35cc   :  { %5881 = vmatprep.subr.bf16.mxu0 %v6206_v1 }
0x35ce   :  { %5878 = vmatmul.mubr.msk.bf16.vlgmr.msra.gmra.mxu0 %vm398_vm4, %v6183_v21 }
0x35cf   :  { %5883 = vmatprep.mubr.msk.bf16.mxu0 %vm6207_vm1, %v6206_v1 }
0x368e   :  { %v4673_v37 = vpop.f32.mrf.mxu0 }
0x368f   :  { %v4674_v38 = vadd.f32 %v5331_v63, %v4673_v37 }
0x3690   :  { %v5879_v39 = vpop.f32.mrf.mxu0 }
0x3691   :  { %v4680_v12 = vmax.f32 %v4674_v38, 0.0 }
0x3692   :  { %v4676_v42 = vpop.f32.mrf.mxu0 }
0x3693   :  { %v4677_v44 = vadd.f32 %v5331_v63, %v4676_v42  ;;  %v4682_v48 = vadd.f32 %v4680_v12, %v4569_v3 }
0x3694   :  { %v5880_v46 = vpop.f32.mrf.mxu0 }
0x3695   :  { %v4681_v47 = vmax.f32 %v4677_v44, 0.0 }
0x3697   :  { %v4683_v50 = vadd.f32 %v4681_v47, %v4570_v7 }
0x3699   :  { %v4685_v51 = vpack.c.bf16 %v4683_v50, %v4682_v48 }
0x369b   :  { %5882 = vmatpush3.bf16.msra.mxu0 %v4685_v51 }
0x369c   :  { %5887 = vmatprep.subr.bf16.mxu0 %v6206_v1 }
0x369e   :  { %5884 = vmatmul.mubr.msk.bf16.vlgmr.msra.gmra.mxu0 %vm398_vm4, %v4684_v23 }
0x369f   :  { %5888 = vmatpush3.bf16.msra.mxu0 %v6085_v52  ;;  %5891 = vmatprep.mubr.msk.bf16.mxu0 %vm6207_vm1, %v6206_v1 }
0x36a0   :  { %5889 = vmatprep.subr.bf16.mxu0 %v6206_v1 }
0x36a3   :  { %5890 = vmatpush3.bf16.msra.mxu0 %v6086_v53 }
0x375e   :  { %v4723_v56 = vpop.f32.mrf.mxu0 }
0x375f   :  { %v4729_v20 = vpack.c.bf16 %v4723_v56, %v4723_v56 }
0x3760   :  { %v5885_v29 = vpop.f32.mrf.mxu0 }
0x3761   :  { %5892 = vmatmul.mubr.msk.bf16.vlgmr.msra.gmra.mxu0 %vm188_vm3, %v4729_v20 }
0x3762   :  { %v4726_v25 = vpop.f32.mrf.mxu0 }
0x3764   :  { %v5886_v57 = vpop.f32.mrf.mxu0 }
0x3821   :  { %v4790_v26 = vpop.f32.mrf.mxu0 }
0x3822   :  { %v4791_v1 = vadd.f32 %v5334_v43, %v4790_v26 }
0x3823   :  { %v5893_v58 = vpop.f32.mrf.mxu0 }
0x3824   :  { %4797 = vst.msk [vmem:[#allocation2] sm:$0x3] %vm4796_vm5, %v4791_v1 }
0x3825   :  { %v4793_v59 = vpop.f32.mrf.mxu0 }
0x3826   :  { %6195 = shalt.err (!%p6192_p4)
}
0x3827   :  { %4807 = dma.vmem_to_hbm [thread:$0]  %s4805_s22, 32, %s7387_s14, [#allocation3]   ;;  %v5894_v32 = vpop.f32.mrf.mxu0 }
0x3828   :  { %6204 = dma.done.wait [#allocation3], 32  }
0x3829   :  { %6205 = vsyncadd [#allocation3], 4294967264 }
0x382a   :  { %4811 = vsyncpa [#allocation3], 1 }

</bundles_post_ra>
